<compile_context>
chip_gen: v7x
topology: tpu7x:2x2x1
jax: 0.10.0
libtpu: 0.0.40
codegen_flags: <defaults>
</compile_context>

<pallas_src>
import functools

import jax
import jax.numpy as jnp
from jax.experimental import pallas as pl
from jax.experimental.pallas import tpu as pltpu


LEAKY_SLOPE = 0.01  # nn.LeakyReLU() default negative_slope


def _leaky_relu(x):
    # max(x, slope*x) == LeakyReLU for 0 < slope < 1 (cheaper than where()).
    return jnp.maximum(x, LEAKY_SLOPE * x)


def _round_up(x, m):
    return (x + m - 1) // m * m


def generator_kernel(z_ref, t_ref,
                     w1a_ref, w1b_ref, w2_ref, wr1_ref, wr2_ref, wo_ref,
                     bias_ref,
                     out_ref):
    f32 = jnp.float32
    bf16 = jnp.bfloat16

    # Static bias offsets (all multiples of 128 -> lane-aligned slices).
    d1 = w1a_ref.shape[1]            # 1024
    d2 = w2_ref.shape[1]             # 512
    do = wo_ref.shape[1]             # padded latent_out (multiple of 128)
    o1, o2, o3, o4 = d1, d1 + d2, d1 + 2 * d2, d1 + 3 * d2
    b1 = bias_ref[:, 0:o1]
    b2 = bias_ref[:, o1:o2]
    br1 = bias_ref[:, o2:o3]
    br2 = bias_ref[:, o3:o4]
    bo = bias_ref[:, o4:o4 + do]

    # layer1: Linear(latent_in + text_in -> 1024) + LeakyReLU
    # (split concat: [z, t] @ [w1a; w1b] == z @ w1a + t @ w1b)
    h1 = (jnp.dot(z_ref[...].astype(bf16), w1a_ref[...], preferred_element_type=f32)
          + jnp.dot(t_ref[...].astype(bf16), w1b_ref[...], preferred_element_type=f32)
          + b1)
    h1 = _leaky_relu(h1)

    # layer2: Linear(1024 -> 512) + LeakyReLU
    h2 = jnp.dot(h1.astype(bf16), w2_ref[...], preferred_element_type=f32) + b2
    h2 = _leaky_relu(h2)

    # ResidualBlock(512): relu(fc1) -> fc2 -> +residual -> relu
    r = jnp.dot(h2.astype(bf16), wr1_ref[...], preferred_element_type=f32) + br1
    r = jnp.maximum(r, 0.0)
    r = jnp.dot(r.astype(bf16), wr2_ref[...], preferred_element_type=f32) + br2
    r = jnp.maximum(r + h2, 0.0)

    # output: Linear(512 -> latent_out_pad) + Tanh; stored as bf16 to halve
    # the output writeback stream (tanh range [-1, 1]).
    o = jnp.dot(r.astype(bf16), wo_ref[...], preferred_element_type=f32) + bo
    out_ref[...] = jnp.tanh(o).astype(out_ref.dtype)


def init_params(key, latent_in, text_in, latent_out):
    """Deterministic PyTorch-style (uniform +-1/sqrt(fan_in)) init.

    Weights are stored as (in_features, out_features)."""
    dims = [
        (latent_in + text_in, 1024),  # layer1
        (1024, 512),                  # layer2
        (512, 512),                   # residual fc1
        (512, 512),                   # residual fc2
        (512, latent_out),            # output
    ]
    params = []
    for (fan_in, fan_out) in dims:
        key, kw, kb = jax.random.split(key, 3)
        bound = 1.0 / jnp.sqrt(jnp.float32(fan_in))
        w = jax.random.uniform(kw, (fan_in, fan_out), jnp.float32, -bound, bound)
        bvec = jax.random.uniform(kb, (fan_out,), jnp.float32, -bound, bound)
        params.append((w, bvec))
    return params


def prepare_params(params, latent_in):
    """Kernel-ready params (arrays only!) plus static shape metadata.

    bf16 weights, split w1, lane-padded wo/bo, packed f32 bias."""
    (w1, b1), (w2, b2), (wr1, br1), (wr2, br2), (wo, bo) = params
    latent_out = wo.shape[1]
    out_pad = _round_up(latent_out, 128)
    wo_p = jnp.pad(wo, ((0, 0), (0, out_pad - latent_out)))
    bo_p = jnp.pad(bo, (0, out_pad - latent_out))
    bias_packed = jnp.concatenate([b1, b2, br1, br2, bo_p]).reshape(1, -1).astype(jnp.float32)

    bf = lambda w: w.astype(jnp.bfloat16)
    kernel_params = dict(
        w1a=bf(w1[:latent_in]),      # (latent_in, 1024)
        w1b=bf(w1[latent_in:]),      # (text_in, 1024)
        w2=bf(w2), wr1=bf(wr1), wr2=bf(wr2),
        wo=bf(wo_p),                 # (512, out_pad)
        bias=bias_packed,            # (1, 1024 + 512*3 + out_pad)
    )
    meta = dict(latent_out=latent_out, out_pad=out_pad)   # plain Python ints
    return kernel_params, meta


@functools.partial(jax.jit, static_argnames=("block_b",))
def generator_forward_padded(z, text_emb, p, *, block_b=256):
    """Runs the kernel; returns the PADDED bf16 output (b_pad, out_pad)."""
    b = z.shape[0]
    latent_in = p["w1a"].shape[0]
    text_in = p["w1b"].shape[0]
    out_pad = p["wo"].shape[1]

    z = z.astype(jnp.float32)
    t = text_emb.reshape(b, -1).astype(jnp.float32)
    assert t.shape[1] == text_in

    # Ragged-friendly batch tiling: smallest tile (multiple of 16, for bf16
    # output sublane packing) that covers B in ceil(B / block_b) grid steps.
    num_tiles = -(-b // block_b)
    tb = _round_up(-(-b // num_tiles), 16)
    b_pad = tb * num_tiles
    if b_pad != b:
        z = jnp.pad(z, ((0, b_pad - b), (0, 0)))
        t = jnp.pad(t, ((0, b_pad - b), (0, 0)))

    row = lambda i: (i, 0)        # tiled over batch
    rep = lambda i: (0, 0)        # resident across the grid (weights / bias)

    out = pl.pallas_call(
        generator_kernel,
        out_shape=jax.ShapeDtypeStruct((b_pad, out_pad), jnp.bfloat16),
        grid=(b_pad // tb,),
        in_specs=[
            pl.BlockSpec((tb, latent_in), row),
            pl.BlockSpec((tb, text_in), row),
            pl.BlockSpec(p["w1a"].shape, rep),
            pl.BlockSpec(p["w1b"].shape, rep),
            pl.BlockSpec(p["w2"].shape, rep),
            pl.BlockSpec(p["wr1"].shape, rep),
            pl.BlockSpec(p["wr2"].shape, rep),
            pl.BlockSpec(p["wo"].shape, rep),
            pl.BlockSpec(p["bias"].shape, rep),
        ],
        out_specs=pl.BlockSpec((tb, out_pad), row),
        compiler_params=pltpu.CompilerParams(
            dimension_semantics=("parallel",),
            vmem_limit_bytes=32 * 1024 * 1024,
        ),
    )(z, t, p["w1a"], p["w1b"], p["w2"], p["wr1"], p["wr2"], p["wo"], p["bias"])
    return out


def generator_forward(z, text_emb, p, latent_out, *, block_b=256):
    """z: (B, latent_in), text_emb: (B, ...) -> (B, latent_out) bf16.

    The depad slice is done OUTSIDE the jitted kernel call (same dtype as the
    kernel output); latency-sensitive consumers should take the padded result
    from generator_forward_padded and fuse the slice downstream."""
    out = generator_forward_padded(z, text_emb, p, block_b=block_b)
    return out[:z.shape[0], :latent_out]


def reference_forward(z, text_emb, p, latent_out):
    """Pure-JAX f32 reference using the same (bf16-quantized) prepared params."""
    b = z.shape[0]
    z = z.astype(jnp.float32)
    t = text_emb.reshape(b, -1).astype(jnp.float32)
    mm = lambda x, w: jnp.dot(x.astype(jnp.bfloat16), w,
                              preferred_element_type=jnp.float32)
    d1 = p["w1a"].shape[1]
    d2 = p["w2"].shape[1]
    do = p["wo"].shape[1]
    bias = p["bias"][0]
    b1 = bias[:d1]
    b2 = bias[d1:d1 + d2]
    br1 = bias[d1 + d2:d1 + 2 * d2]
    br2 = bias[d1 + 2 * d2:d1 + 3 * d2]
    bo = bias[d1 + 3 * d2:d1 + 3 * d2 + do]

    h1 = _leaky_relu(mm(z, p["w1a"]) + mm(t, p["w1b"]) + b1)
    h2 = _leaky_relu(mm(h1, p["w2"]) + b2)
    r = jnp.maximum(mm(h2, p["wr1"]) + br1, 0.0)
    r = jnp.maximum(mm(r, p["wr2"]) + br2 + h2, 0.0)
    o = jnp.tanh(mm(r, p["wo"]) + bo)
    return o[:, :latent_out]


if __name__ == "__main__":
    # Module-consistent shapes: latent dim 100, text embedding (4, 7) flattened
    # to 28, output 784 (MNIST 28*28, lane-padded to 896 inside the kernel).
    B, LATENT_IN, LATENT_OUT = 8, 100, 784
    TEXT_SHAPE = (4, 7)
    TEXT_IN = TEXT_SHAPE[0] * TEXT_SHAPE[1]

    key = jax.random.PRNGKey(0)
    k_z, k_t, k_p, k_z2, k_t2 = jax.random.split(key, 5)

    z = jax.random.normal(k_z, (B, LATENT_IN), jnp.float32)
    text_emb = jax.random.normal(k_t, (B,) + TEXT_SHAPE, jnp.float32)
    params = init_params(k_p, LATENT_IN, TEXT_IN, LATENT_OUT)
    prepared, meta = prepare_params(params, LATENT_IN)
    latent_out = meta["latent_out"]

    # Small batch (single tile).
    out = jax.block_until_ready(generator_forward(z, text_emb, prepared, latent_out))
    ref = reference_forward(z, text_emb, prepared, latent_out)
    assert out.shape == (B, LATENT_OUT)
    assert out.dtype == jnp.bfloat16
    assert jnp.allclose(out.astype(jnp.float32), ref, atol=1e-2, rtol=1e-2), \
        "mismatch vs reference (B=8)"

    # Larger ragged batch: single-step grid, tb rounded to 16 (only 8 pad rows).
    B2 = 200
    z2 = jax.random.normal(k_z2, (B2, LATENT_IN), jnp.float32)
    t2 = jax.random.normal(k_t2, (B2,) + TEXT_SHAPE, jnp.float32)
    out2 = jax.block_until_ready(generator_forward(z2, t2, prepared, latent_out))
    ref2 = reference_forward(z2, t2, prepared, latent_out)
    assert out2.shape == (B2, LATENT_OUT)
    assert jnp.allclose(out2.astype(jnp.float32), ref2, atol=1e-2, rtol=1e-2), \
        "mismatch vs reference (B=200)"

    # Multi-step grid (exercises batch pipelining with resident weights).
    out3 = jax.block_until_ready(
        generator_forward(z2, t2, prepared, latent_out, block_b=64))
    assert jnp.allclose(out3.astype(jnp.float32), ref2, atol=1e-2, rtol=1e-2), \
        "mismatch vs reference (B=200, block_b=64)"

    print("KERNEL_OK")
</pallas_src>

<mosaic_0001>
module attributes {stable_mosaic.version = 11 : i64} {
  func.func @generator_kernel(%arg0: i32, %arg1: memref<16x100xf32, #tpu.memory_space<vmem>>, %arg2: memref<16x28xf32, #tpu.memory_space<vmem>>, %arg3: memref<100x1024xbf16, #tpu.memory_space<vmem>>, %arg4: memref<28x1024xbf16, #tpu.memory_space<vmem>>, %arg5: memref<1024x512xbf16, #tpu.memory_space<vmem>>, %arg6: memref<512x512xbf16, #tpu.memory_space<vmem>>, %arg7: memref<512x512xbf16, #tpu.memory_space<vmem>>, %arg8: memref<512x896xbf16, #tpu.memory_space<vmem>>, %arg9: memref<1x3456xf32, #tpu.memory_space<vmem>>, %arg10: memref<16x896xbf16, #tpu.memory_space<vmem>>) attributes {dimension_semantics = [#tpu.dimension_semantics<parallel>], iteration_bounds = array<i64: 1>, scalar_prefetch = 0 : i64, scratch_operands = 0 : i64, tpu.core_type = #tpu.core_type<tc>, window_params = [{transform_indices = @transform_0, window_bounds = array<i64: 16, 100>}, {transform_indices = @transform_1, window_bounds = array<i64: 16, 28>}, {pipeline_mode = #tpu.pipeline_mode<synchronous>, transform_indices = @transform_2, window_bounds = array<i64: 100, 1024>}, {pipeline_mode = #tpu.pipeline_mode<synchronous>, transform_indices = @transform_3, window_bounds = array<i64: 28, 1024>}, {pipeline_mode = #tpu.pipeline_mode<synchronous>, transform_indices = @transform_4, window_bounds = array<i64: 1024, 512>}, {pipeline_mode = #tpu.pipeline_mode<synchronous>, transform_indices = @transform_5, window_bounds = array<i64: 512, 512>}, {pipeline_mode = #tpu.pipeline_mode<synchronous>, transform_indices = @transform_6, window_bounds = array<i64: 512, 512>}, {pipeline_mode = #tpu.pipeline_mode<synchronous>, transform_indices = @transform_7, window_bounds = array<i64: 512, 896>}, {pipeline_mode = #tpu.pipeline_mode<synchronous>, transform_indices = @transform_8, window_bounds = array<i64: 1, 3456>}, {transform_indices = @transform_9, window_bounds = array<i64: 16, 896>}]} {
    %c0 = arith.constant 0 : index
    %c0_0 = arith.constant 0 : index
    %0 = vector.load %arg9[%c0, %c0_0] : memref<1x3456xf32, #tpu.memory_space<vmem>>, vector<1x1024xf32>
    %c0_1 = arith.constant 0 : index
    %c1024 = arith.constant 1024 : index
    %1 = vector.load %arg9[%c0_1, %c1024] : memref<1x3456xf32, #tpu.memory_space<vmem>>, vector<1x512xf32>
    %c0_2 = arith.constant 0 : index
    %c1536 = arith.constant 1536 : index
    %2 = vector.load %arg9[%c0_2, %c1536] : memref<1x3456xf32, #tpu.memory_space<vmem>>, vector<1x512xf32>
    %c0_3 = arith.constant 0 : index
    %c2048 = arith.constant 2048 : index
    %3 = vector.load %arg9[%c0_3, %c2048] : memref<1x3456xf32, #tpu.memory_space<vmem>>, vector<1x512xf32>
    %c0_4 = arith.constant 0 : index
    %c2560 = arith.constant 2560 : index
    %4 = vector.load %arg9[%c0_4, %c2560] : memref<1x3456xf32, #tpu.memory_space<vmem>>, vector<1x896xf32>
    %c0_5 = arith.constant 0 : index
    %c0_6 = arith.constant 0 : index
    %5 = vector.load %arg1[%c0_5, %c0_6] : memref<16x100xf32, #tpu.memory_space<vmem>>, vector<16x100xf32>
    %6 = arith.truncf %5 : vector<16x100xf32> to vector<16x100xbf16>
    %c0_7 = arith.constant 0 : index
    %c0_8 = arith.constant 0 : index
    %7 = vector.load %arg3[%c0_7, %c0_8] : memref<100x1024xbf16, #tpu.memory_space<vmem>>, vector<100x1024xbf16>
    %cst = arith.constant dense<0.000000e+00> : vector<16x1024xf32>
    %8 = tpu.matmul %6, %7, %cst {dimension_numbers = #tpu.dot_dimension_numbers<[1], [0], [0], [1], [0, 0, 1, 1], [], []>} : vector<16x100xbf16>, vector<100x1024xbf16>, vector<16x1024xf32> -> vector<16x1024xf32>
    %c0_9 = arith.constant 0 : index
    %c0_10 = arith.constant 0 : index
    %9 = vector.load %arg2[%c0_9, %c0_10] : memref<16x28xf32, #tpu.memory_space<vmem>>, vector<16x28xf32>
    %10 = arith.truncf %9 : vector<16x28xf32> to vector<16x28xbf16>
    %c0_11 = arith.constant 0 : index
    %c0_12 = arith.constant 0 : index
    %11 = vector.load %arg4[%c0_11, %c0_12] : memref<28x1024xbf16, #tpu.memory_space<vmem>>, vector<28x1024xbf16>
    %cst_13 = arith.constant dense<0.000000e+00> : vector<16x1024xf32>
    %12 = tpu.matmul %10, %11, %cst_13 {dimension_numbers = #tpu.dot_dimension_numbers<[1], [0], [0], [1], [0, 0, 1, 1], [], []>} : vector<16x28xbf16>, vector<28x1024xbf16>, vector<16x1024xf32> -> vector<16x1024xf32>
    %13 = arith.addf %8, %12 : vector<16x1024xf32>
    %14 = vector.broadcast %0 : vector<1x1024xf32> to vector<16x1024xf32>
    %15 = arith.addf %13, %14 : vector<16x1024xf32>
    %cst_14 = arith.constant 0.00999999977 : f32
    %16 = vector.broadcast %cst_14 : f32 to vector<16x1024xf32>
    %17 = arith.mulf %16, %15 : vector<16x1024xf32>
    %18 = arith.maximumf %15, %17 : vector<16x1024xf32>
    %19 = arith.truncf %18 : vector<16x1024xf32> to vector<16x1024xbf16>
    %c0_15 = arith.constant 0 : index
    %c0_16 = arith.constant 0 : index
    %20 = vector.load %arg5[%c0_15, %c0_16] : memref<1024x512xbf16, #tpu.memory_space<vmem>>, vector<1024x512xbf16>
    %cst_17 = arith.constant dense<0.000000e+00> : vector<16x512xf32>
    %21 = tpu.matmul %19, %20, %cst_17 {dimension_numbers = #tpu.dot_dimension_numbers<[1], [0], [0], [1], [0, 0, 1, 1], [], []>} : vector<16x1024xbf16>, vector<1024x512xbf16>, vector<16x512xf32> -> vector<16x512xf32>
    %22 = vector.broadcast %1 : vector<1x512xf32> to vector<16x512xf32>
    %23 = arith.addf %21, %22 : vector<16x512xf32>
    %cst_18 = arith.constant 0.00999999977 : f32
    %24 = vector.broadcast %cst_18 : f32 to vector<16x512xf32>
    %25 = arith.mulf %24, %23 : vector<16x512xf32>
    %26 = arith.maximumf %23, %25 : vector<16x512xf32>
    %27 = arith.truncf %26 : vector<16x512xf32> to vector<16x512xbf16>
    %c0_19 = arith.constant 0 : index
    %c0_20 = arith.constant 0 : index
    %28 = vector.load %arg6[%c0_19, %c0_20] : memref<512x512xbf16, #tpu.memory_space<vmem>>, vector<512x512xbf16>
    %cst_21 = arith.constant dense<0.000000e+00> : vector<16x512xf32>
    %29 = tpu.matmul %27, %28, %cst_21 {dimension_numbers = #tpu.dot_dimension_numbers<[1], [0], [0], [1], [0, 0, 1, 1], [], []>} : vector<16x512xbf16>, vector<512x512xbf16>, vector<16x512xf32> -> vector<16x512xf32>
    %30 = vector.broadcast %2 : vector<1x512xf32> to vector<16x512xf32>
    %31 = arith.addf %29, %30 : vector<16x512xf32>
    %cst_22 = arith.constant 0.000000e+00 : f32
    %32 = vector.broadcast %cst_22 : f32 to vector<16x512xf32>
    %33 = arith.maximumf %31, %32 : vector<16x512xf32>
    %34 = arith.truncf %33 : vector<16x512xf32> to vector<16x512xbf16>
    %c0_23 = arith.constant 0 : index
    %c0_24 = arith.constant 0 : index
    %35 = vector.load %arg7[%c0_23, %c0_24] : memref<512x512xbf16, #tpu.memory_space<vmem>>, vector<512x512xbf16>
    %cst_25 = arith.constant dense<0.000000e+00> : vector<16x512xf32>
    %36 = tpu.matmul %34, %35, %cst_25 {dimension_numbers = #tpu.dot_dimension_numbers<[1], [0], [0], [1], [0, 0, 1, 1], [], []>} : vector<16x512xbf16>, vector<512x512xbf16>, vector<16x512xf32> -> vector<16x512xf32>
    %37 = vector.broadcast %3 : vector<1x512xf32> to vector<16x512xf32>
    %38 = arith.addf %36, %37 : vector<16x512xf32>
    %39 = arith.addf %38, %26 : vector<16x512xf32>
    %cst_26 = arith.constant 0.000000e+00 : f32
    %40 = vector.broadcast %cst_26 : f32 to vector<16x512xf32>
    %41 = arith.maximumf %39, %40 : vector<16x512xf32>
    %42 = arith.truncf %41 : vector<16x512xf32> to vector<16x512xbf16>
    %c0_27 = arith.constant 0 : index
    %c0_28 = arith.constant 0 : index
    %43 = vector.load %arg8[%c0_27, %c0_28] : memref<512x896xbf16, #tpu.memory_space<vmem>>, vector<512x896xbf16>
    %cst_29 = arith.constant dense<0.000000e+00> : vector<16x896xf32>
    %44 = tpu.matmul %42, %43, %cst_29 {dimension_numbers = #tpu.dot_dimension_numbers<[1], [0], [0], [1], [0, 0, 1, 1], [], []>} : vector<16x512xbf16>, vector<512x896xbf16>, vector<16x896xf32> -> vector<16x896xf32>
    %45 = vector.broadcast %4 : vector<1x896xf32> to vector<16x896xf32>
    %46 = arith.addf %44, %45 : vector<16x896xf32>
    %47 = math.tanh %46 : vector<16x896xf32>
    %48 = arith.truncf %47 : vector<16x896xf32> to vector<16x896xbf16>
    %c0_30 = arith.constant 0 : index
    %c0_31 = arith.constant 0 : index
    %49 = vector.load %arg10[%c0_30, %c0_31] : memref<16x896xbf16, #tpu.memory_space<vmem>>, vector<16x896xbf16>
    tpu.vector_store %arg10[%c0_30, %c0_31], %48 {strides = array<i32>} : memref<16x896xbf16, #tpu.memory_space<vmem>>, vector<16x896xbf16>,
    return
  }
  func.func @transform_0(%arg0: i32) -> (i32, i32) {
    %c0_i32 = arith.constant 0 : i32
    %c0_i32_0 = arith.constant 0 : i32
    return %arg0, %c0_i32 : i32, i32
  }
  func.func @transform_1(%arg0: i32) -> (i32, i32) {
    %c0_i32 = arith.constant 0 : i32
    %c0_i32_0 = arith.constant 0 : i32
    return %arg0, %c0_i32 : i32, i32
  }
  func.func @transform_2(%arg0: i32) -> (i32, i32) {
    %c0_i32 = arith.constant 0 : i32
    %c0_i32_0 = arith.constant 0 : i32
    %c0_i32_1 = arith.constant 0 : i32
    return %c0_i32, %c0_i32_0 : i32, i32
  }
  func.func @transform_3(%arg0: i32) -> (i32, i32) {
    %c0_i32 = arith.constant 0 : i32
    %c0_i32_0 = arith.constant 0 : i32
    %c0_i32_1 = arith.constant 0 : i32
    return %c0_i32, %c0_i32_0 : i32, i32
  }
  func.func @transform_4(%arg0: i32) -> (i32, i32) {
    %c0_i32 = arith.constant 0 : i32
    %c0_i32_0 = arith.constant 0 : i32
    %c0_i32_1 = arith.constant 0 : i32
    return %c0_i32, %c0_i32_0 : i32, i32
  }
  func.func @transform_5(%arg0: i32) -> (i32, i32) {
    %c0_i32 = arith.constant 0 : i32
    %c0_i32_0 = arith.constant 0 : i32
    %c0_i32_1 = arith.constant 0 : i32
    return %c0_i32, %c0_i32_0 : i32, i32
  }
  func.func @transform_6(%arg0: i32) -> (i32, i32) {
    %c0_i32 = arith.constant 0 : i32
    %c0_i32_0 = arith.constant 0 : i32
    %c0_i32_1 = arith.constant 0 : i32
    return %c0_i32, %c0_i32_0 : i32, i32
  }
  func.func @transform_7(%arg0: i32) -> (i32, i32) {
    %c0_i32 = arith.constant 0 : i32
    %c0_i32_0 = arith.constant 0 : i32
    %c0_i32_1 = arith.constant 0 : i32
    return %c0_i32, %c0_i32_0 : i32, i32
  }
  func.func @transform_8(%arg0: i32) -> (i32, i32) {
    %c0_i32 = arith.constant 0 : i32
    %c0_i32_0 = arith.constant 0 : i32
    %c0_i32_1 = arith.constant 0 : i32
    return %c0_i32, %c0_i32_0 : i32, i32
  }
  func.func @transform_9(%arg0: i32) -> (i32, i32) {
    %c0_i32 = arith.constant 0 : i32
    %c0_i32_0 = arith.constant 0 : i32
    return %arg0, %c0_i32 : i32, i32
  }
}

</mosaic_0001>

<bundles_post_ra>
// kernel: generator_forward_padded.1
= control target key start
LH: loop header
LB: loop body
LE: loop exit
PB: predicated region body
PF: predicated region fallthrough
CT: control target
= control target key end

     0   :  { %14 = vsyncpa [#allocation3], 0  ;;  %s9451_s0 = inlined_call_operand.vmem [shape: f32[16,100], index: 0, kind: input, shape index: {}]   ;;  %s9452_s1 = inlined_call_operand.vmem [shape: f32[16,28], index: 1, kind: input, shape index: {}]   ;;  %s9453_s2 = inlined_call_operand.hbm [shape: bf16[100,1024], index: 2, kind: input, shape index: {}]   ;;  %s9454_s3 = inlined_call_operand.vmem [shape: bf16[28,1024], index: 3, kind: input, shape index: {}]   ;;  %s9455_s4 = inlined_call_operand.hbm [shape: bf16[1024,512], index: 4, kind: input, shape index: {}]   ;;  %s9456_s5 = inlined_call_operand.hbm [shape: bf16[512,512], index: 5, kind: input, shape index: {}]   ;;  %s9457_s6 = inlined_call_operand.hbm [shape: bf16[512,512], index: 6, kind: input, shape index: {}]   ;;  %s9458_s7 = inlined_call_operand.hbm [shape: bf16[512,896], index: 7, kind: input, shape index: {}]   ;;  %s9459_s8 = inlined_call_operand.vmem [shape: f32[1,3456], index: 8, kind: input, shape index: {}]   ;;  %s9460_s9 = inlined_call_operand.hbm [shape: bf16[16,896], index: 9, kind: output, shape index: {}]  }
   0x1   :  { %15 = vsyncpa [#allocation6], 0 }
   0x2   :  { %16 = vsyncpa [#allocation9], 0 }
   0x3   :  { %17 = vsyncpa [#allocation4], 0  ;;  %s9021_s30 = smov [#allocation5]   ;;  %s8881_s13 = scalar_lea.hbm %s9455_s4, 32768 }
   0x4   :  { %s41_s10 = sshll.u32 %s9021_s30, 4  ;;  %p8882_p0 = scmp.ne.s32.totalorder %s9455_s4, %s8881_s13  ;;  %s42_s10 = int_to_ptr.vmem [resolvable:$true] %s41_s10 }
   0x5   :  { %p8885_p1 = scmp.lt.u32.totalorder %s8881_s13, %s9455_s4 }
   0x7   :  { %p8887_p2 = pnand %p8885_p1, %p8882_p0 }
   0x9   :  { %8890 = shalt.err (!%p8887_p2)
}
   0xa   :  { %s8891_s18 = scalar_lea.vmem %s42_s10, 32768  ;;  %p8896_p4 = scmp.lt.s32.totalorder %s42_s10, %s42_s10 }
   0xb   :  { %p8892_p3 = scmp.ne.s32.totalorder %s42_s10, %s8891_s18  ;;  %p8897_p5 = scmp.lt.s32.totalorder %s8891_s18, %s8891_s18 }
   0xd   :  { %p8898_p6 = por %p8897_p5, %p8896_p4 }
   0xf   :  { %p8899_p7 = pnand %p8898_p6, %p8892_p3 }
  0x11   :  { %8902 = shalt.err (!%p8899_p7)
}
  0x12   :  { %s9022_s19 = smov 256   ;;  %s9023_s20 = smov 16  }
  0x13   :  { %47 = dma.hbm_to_vmem [thread:$0]  %s9455_s4, 32768, %s42_s10, [#allocation6], %s9022_s19, %s9022_s19, %s9023_s20  }
  0x14   :  { %s9024_s23 = smov [#allocation8]   ;;  %s9025_s25 = smov [#allocation2]  }
  0x15   :  { %s65_s24 = sshll.u32 %s9024_s23, 4  ;;  %s27_s26 = sshll.u32 %s9025_s25, 4  ;;  %s66_s24 = int_to_ptr.vmem [resolvable:$true] %s65_s24  ;;  %s28_s26 = int_to_ptr.vmem [resolvable:$true] %s27_s26 }
  0x16   :  { %s8903_s29 = scalar_lea.hbm %s9457_s6, 16384 }
  0x17   :  { %p8904_p8 = scmp.ne.s32.totalorder %s9457_s6, %s8903_s29  ;;  %p8907_p9 = scmp.lt.u32.totalorder %s8903_s29, %s9457_s6 }
  0x19   :  { %p8909_p10 = pnand %p8907_p9, %p8904_p8 }
  0x1b   :  { %8912 = shalt.err (!%p8909_p10)
}
  0x1c   :  { %s8913_s4 = scalar_lea.vmem %s66_s24, 16384  ;;  %p8918_p12 = scmp.lt.s32.totalorder %s66_s24, %s66_s24 }
  0x1d   :  { %p8914_p11 = scmp.ne.s32.totalorder %s66_s24, %s8913_s4  ;;  %p8919_p13 = scmp.lt.s32.totalorder %s8913_s4, %s8913_s4 }
  0x1f   :  { %p8920_p0 = por %p8919_p13, %p8918_p12 }
  0x21   :  { %p8921_p1 = pnand %p8920_p0, %p8914_p11 }
  0x23   :  { %8924 = shalt.err (!%p8921_p1)
}
  0x24   :  { %71 = dma.hbm_to_vmem [thread:$0]  %s9457_s6, 16384, %s66_s24, [#allocation9], %s9022_s19, %s9022_s19, %s9023_s20  }
  0x25   :  { %s8925_s17 = scalar_lea.hbm %s9453_s2, 6656 }
  0x26   :  { %p8926_p2 = scmp.ne.s32.totalorder %s9453_s2, %s8925_s17  ;;  %p8929_p3 = scmp.lt.u32.totalorder %s8925_s17, %s9453_s2 }
  0x28   :  { %p8931_p4 = pnand %p8929_p3, %p8926_p2 }
  0x2a   :  { %8934 = shalt.err (!%p8931_p4)
}
  0x2b   :  { %s8935_s25 = scalar_lea.vmem %s28_s26, 6656  ;;  %p8940_p6 = scmp.lt.s32.totalorder %s28_s26, %s28_s26 }
  0x2c   :  { %p8936_p5 = scmp.ne.s32.totalorder %s28_s26, %s8935_s25  ;;  %p8941_p7 = scmp.lt.s32.totalorder %s8935_s25, %s8935_s25 }
  0x2e   :  { %p8942_p8 = por %p8941_p7, %p8940_p6 }
  0x30   :  { %p8943_p9 = pnand %p8942_p8, %p8936_p5 }
  0x32   :  { %8946 = shalt.err (!%p8943_p9)
}
  0x33   :  { %s9026_s6 = smov 512   ;;  %s9027_s24 = smov 32  }
  0x34   :  { %33 = dma.hbm_to_vmem [thread:$0]  %s9453_s2, 6656, %s28_s26, [#allocation3], %s9026_s6, %s9026_s6, %s9027_s24  }
  0x35   :  { %s9028_s29 = smov [#allocation7]   ;;  %s9029_s11 = smov [#allocation10]  }
  0x36   :  { %s53_s30 = sshll.u32 %s9028_s29, 4  ;;  %s77_s12 = sshll.u32 %s9029_s11, 4  ;;  %s54_s30 = int_to_ptr.vmem [resolvable:$true] %s53_s30  ;;  %s78_s12 = int_to_ptr.vmem [resolvable:$true] %s77_s12 }
  0x37   :  { %s8947_s10 = scalar_lea.hbm %s9456_s5, 16384 }
  0x38   :  { %p8948_p10 = scmp.ne.s32.totalorder %s9456_s5, %s8947_s10  ;;  %p8951_p11 = scmp.lt.u32.totalorder %s8947_s10, %s9456_s5 }
  0x3a   :  { %p8953_p12 = pnand %p8951_p11, %p8948_p10 }
  0x3c   :  { %8956 = shalt.err (!%p8953_p12)
}
  0x3d   :  { %s8957_s2 = scalar_lea.vmem %s54_s30, 16384  ;;  %p8962_p0 = scmp.lt.s32.totalorder %s54_s30, %s54_s30 }
  0x3e   :  { %p8958_p13 = scmp.ne.s32.totalorder %s54_s30, %s8957_s2  ;;  %p8963_p1 = scmp.lt.s32.totalorder %s8957_s2, %s8957_s2 }
  0x40   :  { %p8964_p2 = por %p8963_p1, %p8962_p0 }
  0x42   :  { %p8965_p3 = pnand %p8964_p2, %p8958_p13 }
  0x44   :  { %8968 = shalt.err (!%p8965_p3)
}
  0x45   :  { %59 = dma.hbm_to_vmem [thread:$0]  %s9456_s5, 16384, %s54_s30, [#allocation6], %s9022_s19, %s9022_s19, %s9023_s20  }
  0x46   :  { %s8969_s23 = scalar_lea.hbm %s9458_s7, 28672 }
  0x47   :  { %p8970_p4 = scmp.ne.s32.totalorder %s9458_s7, %s8969_s23  ;;  %p8973_p5 = scmp.lt.u32.totalorder %s8969_s23, %s9458_s7 }
  0x49   :  { %p8975_p6 = pnand %p8973_p5, %p8970_p4 }
  0x4b   :  { %8978 = shalt.err (!%p8975_p6)
}
  0x4c   :  { %s8979_s28 = scalar_lea.vmem %s78_s12, 28672  ;;  %p8984_p8 = scmp.lt.s32.totalorder %s78_s12, %s78_s12 }
  0x4d   :  { %p8980_p7 = scmp.ne.s32.totalorder %s78_s12, %s8979_s28  ;;  %p8985_p9 = scmp.lt.s32.totalorder %s8979_s28, %s8979_s28 }
  0x4f   :  { %p8986_p10 = por %p8985_p9, %p8984_p8 }
  0x51   :  { %p8987_p11 = pnand %p8986_p10, %p8980_p7 }
  0x53   :  { %8990 = shalt.err (!%p8987_p11)
}
  0x54   :  { %s9030_s5 = smov 448   ;;  %s9031_s19 = smov 28  }
  0x55   :  { %83 = dma.hbm_to_vmem [thread:$0]  %s9458_s7, 28672, %s78_s12, [#allocation9], %s9030_s5, %s9030_s5, %s9031_s19  }
  0x56   :  { %9013 = dma.done.wait [#allocation3], 6656  }
  0x57   :  { %9014 = vsyncadd [#allocation3], 4294960640 }
  0x58   :  { %9015 = dma.done.wait [#allocation6], 49152  }
  0x59   :  { %9016 = vsyncadd [#allocation6], 4294918144 }
  0x5a   :  { %9017 = dma.done.wait [#allocation9], 45056  }
  0x5b   :  { %9018 = vsyncadd [#allocation9], 4294922240  ;;  %v9032_v0 = vmov 0   ;;  %v166_v1 = vld [vmem:[%s9454_s3 + $0x8] sm:$0xff]  ;;  %vm257_vm0 = vcmask 1045504   ;;  %v168_v9 = vld [vmem:[%s9454_s3 + $0x18] sm:$0xff] }
  0x5c   :  { %357 = vmatprep.mubr.bf16.mxu1 %v9032_v0  ;;  %314 = vmatprep.mubr.bf16.mxu0 %v9032_v0  ;;  %v170_v2 = vld [vmem:[%s9454_s3 + $0x28] sm:$0xff]  ;;  %v172_v10 = vld [vmem:[%s9454_s3 + $0x38] sm:$0xff]  ;;  %v162_v11 = vld [vmem:[%s9452_s1] sm:$0xff]  ;;  %vm253_vm1 = vcmask 228352   ;;  %vm718_vm2 = vcmask 1041408   ;;  %vm714_vm3 = vcmask 818176  }
  0x5d   :  { %v174_v3 = vld [vmem:[%s9454_s3 + $0x48] sm:$0xff]  ;;  %v6759_v4 = vcombine.high %v166_v1, %v170_v2  ;;  %v6758_v5 = vcombine.low %v166_v1, %v170_v2  ;;  %v6763_v14 = vcombine.high %v168_v9, %v172_v10  ;;  %v176_v15 = vld [vmem:[%s9454_s3 + $0x58] sm:$0xff]  ;;  %v165_v17 = vld [vmem:[%s9454_s3] sm:$0xff]  ;;  %v6762_v20 = vcombine.low %v168_v9, %v172_v10 }
  0x5e   :  { %v178_v6 = vld [vmem:[%s9454_s3 + $0x68] sm:$0x33]  ;;  %v180_v16 = vld [vmem:[%s9454_s3 + $0x78] sm:$0x33]  ;;  %v169_v19 = vld [vmem:[%s9454_s3 + $0x20] sm:$0xff] }
  0x5f   :  { %v6767_v7 = vcombine.high %v174_v3, %v178_v6  ;;  %v6766_v8 = vcombine.low %v174_v3, %v178_v6  ;;  %325 = vmatprep.subr.bf16.mxu1 %v6759_v4  ;;  %v163_v12 = vld [vmem:[%s9452_s1 + $0x8] sm:$0xff]  ;;  %v6757_v21 = vcombine.high %v165_v17, %v169_v19  ;;  %v6756_v22 = vcombine.low %v165_v17, %v169_v19  ;;  %v173_v23 = vld [vmem:[%s9454_s3 + $0x40] sm:$0xff]  ;;  %v110_v29 = vld [vmem:[#allocation2] sm:$0xff] }
  0x60   :  { %326 = vmatpush1.bf16.msra.mxu1 %v6758_v5  ;;  %v9193_v18 = vpack.c.bf16 %v163_v12, %v162_v11  ;;  %v177_v24 = vld [vmem:[%s9454_s3 + $0x60] sm:$0x33]  ;;  %v6771_v25 = vcombine.high %v176_v15, %v180_v16  ;;  %v6770_v26 = vcombine.low %v176_v15, %v180_v16  ;;  %v114_v30 = vld [vmem:[#allocation2 + $0x20] sm:$0xff] }
  0x61   :  { %6774 = vmatprep.subr.msk.bf16.mxu1 %vm257_vm0, %v6767_v7  ;;  %v265_v13 = vsel %vm257_vm0, %v6766_v8, 0  ;;  %v6765_v27 = vcombine.high %v173_v23, %v177_v24  ;;  %v6764_v28 = vcombine.low %v173_v23, %v177_v24  ;;  %282 = vmatprep.subr.bf16.mxu0 %v6757_v21  ;;  %v6781_v33 = vcombine.high %v110_v29, %v114_v30  ;;  %v118_v34 = vld [vmem:[#allocation2 + $0x40] sm:$0xff]  ;;  %v112_v49 = vld [vmem:[#allocation2 + $0x10] sm:$0xff]  ;;  %v115_v23 = vld [vmem:[#allocation2 + $0x28] sm:$0xff] }
  0x62   :  { %283 = vmatpush1.bf16.msra.mxu0 %v6756_v22  ;;  %v277_v32 = vsel %vm257_vm0, %v6770_v26, 0  ;;  %v122_v35 = vld [vmem:[#allocation2 + $0x60] sm:$0xff]  ;;  %v6780_v36 = vcombine.low %v110_v29, %v114_v30  ;;  %v116_v50 = vld [vmem:[#allocation2 + $0x30] sm:$0xff]  ;;  %v111_v22 = vld [vmem:[#allocation2 + $0x8] sm:$0xff] }
  0x63   :  { %v259_v31 = vsel %vm257_vm0, %v6764_v28, 0  ;;  %6772 = vmatprep.subr.msk.bf16.mxu0 %vm257_vm0, %v6765_v27  ;;  %v6789_v37 = vcombine.high %v118_v34, %v122_v35  ;;  %v126_v38 = vld [vmem:[#allocation2 + $0x80] sm:$0xff]  ;;  %v6788_v46 = vcombine.low %v118_v34, %v122_v35  ;;  %v6785_v55 = vcombine.high %v112_v49, %v116_v50  ;;  %v120_v56 = vld [vmem:[#allocation2 + $0x50] sm:$0xff] }
  0x64   :  { %328 = vmatpush1.bf16.msra.mxu1 %v265_v13  ;;  %v130_v39 = vld [vmem:[#allocation2 + $0xa0] sm:$0xff]  ;;  %v124_v58 = vld [vmem:[#allocation2 + $0x70] sm:$0xff]  ;;  %v6784_v62 = vcombine.low %v112_v49, %v116_v50  ;;  %v6783_v30 = vcombine.high %v111_v22, %v115_v23 }
  0x65   :  { %411 = vmatprep.subr.bf16.mxu1 %v6763_v14  ;;  %v167_v40 = vld [vmem:[%s9454_s3 + $0x10] sm:$0xff]  ;;  %v6797_v51 = vcombine.high %v126_v38, %v130_v39  ;;  %v6796_v57 = vcombine.low %v126_v38, %v130_v39  ;;  %v6793_v63 = vcombine.high %v120_v56, %v124_v58  ;;  %v128_v1 = vld [vmem:[#allocation2 + $0x90] sm:$0xff]  ;;  %v6792_v7 = vcombine.low %v120_v56, %v124_v58  ;;  %v127_v39 = vld [vmem:[#allocation2 + $0x88] sm:$0xff] }
  0x66   :  { %285 = vmatpush1.bf16.msra.mxu0 %v259_v31  ;;  %v171_v41 = vld [vmem:[%s9454_s3 + $0x30] sm:$0xff]  ;;  %v132_v3 = vld [vmem:[#allocation2 + $0xb0] sm:$0xff]  ;;  %v119_v31 = vld [vmem:[#allocation2 + $0x48] sm:$0xff] }
  0x67   :  { %6775 = vmatmul.mubr.msk.bf16.vlgmr.msra.gmra.mrb[0].mxu1 %vm253_vm1, %v9193_v18  ;;  %v6760_v42 = vcombine.low %v167_v40, %v171_v41  ;;  %v6761_v43 = vcombine.high %v167_v40, %v171_v41  ;;  %v175_v44 = vld [vmem:[%s9454_s3 + $0x50] sm:$0xff]  ;;  %v6801_v8 = vcombine.high %v128_v1, %v132_v3  ;;  %v136_v9 = vld [vmem:[#allocation2 + $0xd0] sm:$0xff]  ;;  %v6800_v14 = vcombine.low %v128_v1, %v132_v3  ;;  %v131_v40 = vld [vmem:[#allocation2 + $0xa8] sm:$0xff] }
  0x68   :  { %412 = vmatpush1.bf16.msra.mxu1 %v6762_v20  ;;  %443 = vmatprep.mubr.bf16.mxu1 %v9032_v0  ;;  %v179_v45 = vld [vmem:[%s9454_s3 + $0x70] sm:$0x33]  ;;  %v140_v11 = vld [vmem:[#allocation2 + $0xf0] sm:$0xff]  ;;  %v6798_v50 = vcombine.low %v127_v39, %v131_v40  ;;  %v155_v58 = vld [vmem:[#allocation2 + $0x168] sm:$0xff] }
  0x69   :  { %6778 = vmatprep.subr.msk.bf16.mxu1 %vm257_vm0, %v6771_v25  ;;  %6773 = vmatmul.mubr.msk.bf16.vlgmr.msra.gmra.mrb[0].mxu0 %vm253_vm1, %v9193_v18  ;;  %v6769_v47 = vcombine.high %v175_v44, %v179_v45  ;;  %v6768_v48 = vcombine.low %v175_v44, %v179_v45  ;;  %v134_v52 = vld [vmem:[#allocation2 + $0xc0] sm:$0xff]  ;;  %v6809_v15 = vcombine.high %v136_v9, %v140_v11  ;;  %v144_v16 = vld [vmem:[#allocation2 + $0x110] sm:$0xff]  ;;  %v108_v25 = vld [vmem:[%s9451_s0 + $0x8] sm:$0xff] }
  0x6a   :  { %368 = vmatprep.subr.bf16.mxu0 %v6761_v43  ;;  %v138_v53 = vld [vmem:[#allocation2 + $0xe0] sm:$0xff]  ;;  %400 = vmatprep.mubr.bf16.mxu0 %v9032_v0  ;;  %v107_v21 = vld [vmem:[%s9451_s0] sm:$0xff]  ;;  %v6808_v24 = vcombine.low %v136_v9, %v140_v11  ;;  %v6799_v45 = vcombine.high %v127_v39, %v131_v40  ;;  %v121_v11 = vld [vmem:[#allocation2 + $0x58] sm:$0xff] }
  0x6b   :  { %369 = vmatpush1.bf16.msra.mxu0 %v6760_v42  ;;  %v271_v54 = vsel %vm257_vm0, %v6768_v48, 0  ;;  %v6805_v59 = vcombine.high %v134_v52, %v138_v53  ;;  %v142_v60 = vld [vmem:[#allocation2 + $0x100] sm:$0xff]  ;;  %v6804_v2 = vcombine.low %v134_v52, %v138_v53  ;;  %v152_v27 = vld [vmem:[#allocation2 + $0x150] sm:$0xff]  ;;  %v9242_v34 = vpack.c.bf16 %v108_v25, %v107_v21  ;;  %v143_v52 = vld [vmem:[#allocation2 + $0x108] sm:$0xff] }
  0x6c   :  { %414 = vmatpush1.bf16.msra.mxu1 %v277_v32  ;;  %6776 = vmatprep.subr.msk.bf16.mxu0 %vm257_vm0, %v6769_v47  ;;  %v146_v61 = vld [vmem:[#allocation2 + $0x120] sm:$0xff]  ;;  %v156_v28 = vld [vmem:[#allocation2 + $0x170] sm:$0xff]  ;;  %v123_v32 = vld [vmem:[#allocation2 + $0x68] sm:$0xff] }
  0x6d   :  { %743 = vmatprep.subr.bf16.mxu1 %v6781_v33  ;;  %v6813_v4 = vcombine.high %v142_v60, %v146_v61  ;;  %v150_v5 = vld [vmem:[#allocation2 + $0x140] sm:$0xff]  ;;  %v6812_v10 = vcombine.low %v142_v60, %v146_v61  ;;  %v6825_v35 = vcombine.high %v152_v27, %v156_v28  ;;  %v6791_v38 = vcombine.high %v119_v31, %v123_v32  ;;  %v139_v47 = vld [vmem:[#allocation2 + $0xe8] sm:$0xff]  ;;  %v141_v25 = vld [vmem:[#allocation2 + $0xf8] sm:$0xff] }
  0x6e   :  { %v154_v6 = vld [vmem:[#allocation2 + $0x160] sm:$0xff]  ;;  %v6824_v41 = vcombine.low %v152_v27, %v156_v28  ;;  %v6790_v44 = vcombine.low %v119_v31, %v123_v32  ;;  %v147_v53 = vld [vmem:[#allocation2 + $0x128] sm:$0xff]  ;;  %v149_v31 = vld [vmem:[#allocation2 + $0x138] sm:$0xff] }
  0x6f   :  { %6779 = vmatmul.mubr.msk.bf16.vlgmr.msra.gmra.mrb[4].mxu1 %vm253_vm1, %v9193_v18  ;;  %371 = vmatpush1.bf16.msra.mxu0 %v271_v54  ;;  %v6821_v12 = vcombine.high %v150_v5, %v154_v6  ;;  %v158_v13 = vld [vmem:[#allocation2 + $0x180] sm:$0x33]  ;;  %v6820_v17 = vcombine.low %v150_v5, %v154_v6  ;;  %v6815_v60 = vcombine.high %v143_v52, %v147_v53  ;;  %v113_v5 = vld [vmem:[#allocation2 + $0x18] sm:$0xff] }
  0x70   :  { %744 = vmatpush1.bf16.msra.mxu1 %v6780_v36  ;;  %775 = vmatprep.mubr.bf16.mxu1 %v9032_v0  ;;  %v6829_v19 = vcombine.high %v158_v13, %v158_v13  ;;  %v6828_v20 = vcombine.low %v158_v13, %v158_v13  ;;  %v6782_v36 = vcombine.low %v111_v22, %v115_v23  ;;  %v7767_v49 = vld [vmem:[#allocation5 + $0x4] ss:$16 sps:$4 sm:$0xff]   ;;  %v7765_v54 = vld [vmem:[#allocation5] ss:$16 sps:$4 sm:$0xff]   ;;  %v117_v6 = vld [vmem:[#allocation2 + $0x38] sm:$0xff] }
  0x71   :  { %745 = vmatprep.subr.bf16.mxu1 %v6789_v37  ;;  %829 = vmatprep.subr.bf16.mxu0 %v6785_v55  ;;  %v160_v37 = vld [vmem:[#allocation2 + $0x190] sm:$0x33] }
  0x72   :  { %6777 = vmatmul.mubr.msk.bf16.vlgmr.msra.gmra.mrb[4].mxu0 %vm253_vm1, %v9193_v18  ;;  %v148_v18 = vld [vmem:[#allocation2 + $0x130] sm:$0xff]  ;;  %v720_v29 = vsel %vm718_vm2, %v6828_v20, 0  ;;  %v6833_v42 = vcombine.high %v160_v37, %v160_v37  ;;  %v6832_v43 = vcombine.low %v160_v37, %v160_v37  ;;  %v153_v37 = vld [vmem:[#allocation2 + $0x158] sm:$0xff] }
  0x73   :  { %830 = vmatpush1.bf16.msra.mxu0 %v6784_v62  ;;  %861 = vmatprep.mubr.bf16.mxu0 %v9032_v0  ;;  %v6817_v26 = vcombine.high %v144_v16, %v148_v18  ;;  %v6816_v33 = vcombine.low %v144_v16, %v148_v18  ;;  %v7773_v55 = vld [vmem:[#allocation5 + $0x24] ss:$16 sps:$4 sm:$0xff]   ;;  %v6814_v62 = vcombine.low %v143_v52, %v147_v53  ;;  %v7777_v1 = vld [vmem:[#allocation5 + $0x40] ss:$16 sps:$4 sm:$0xff]   ;;  %v129_v18 = vld [vmem:[#allocation2 + $0x98] sm:$0xff] }
  0x74   :  { %746 = vmatpush1.bf16.msra.mxu1 %v6788_v46  ;;  %831 = vmatprep.subr.bf16.mxu0 %v6793_v63  ;;  %v135_v46 = vld [vmem:[#allocation2 + $0xc8] sm:$0xff]  ;;  %v732_v48 = vsel %vm718_vm2, %v6832_v43, 0  ;;  %v7779_v61 = vld [vmem:[#allocation5 + $0x44] ss:$16 sps:$4 sm:$0xff]   ;;  %v7789_v13 = vld [vmem:[#allocation5 + $0x80] ss:$16 sps:$4 sm:$0xff]  }
  0x75   :  { %747 = vmatprep.subr.bf16.mxu1 %v6797_v51  ;;  %v6807_v51 = vcombine.high %v135_v46, %v139_v47  ;;  %v6806_v56 = vcombine.low %v135_v46, %v139_v47  ;;  %v159_v63 = vld [vmem:[#allocation2 + $0x188] sm:$0x33]  ;;  %v7785_v3 = vld [vmem:[#allocation5 + $0x64] ss:$16 sps:$4 sm:$0xff]   ;;  %v7795_v20 = vld [vmem:[#allocation5 + $0xa0] ss:$16 sps:$4 sm:$0xff]  }
  0x76   :  { %v6830_v9 = vcombine.low %v159_v63, %v159_v63  ;;  %v7797_v16 = vld [vmem:[#allocation5 + $0xa4] ss:$16 sps:$4 sm:$0xff]   ;;  %v7807_v32 = vld [vmem:[#allocation5 + $0xe0] ss:$16 sps:$4 sm:$0xff]  }
  0x77   :  { %832 = vmatpush1.bf16.msra.mxu0 %v6792_v7  ;;  %v7783_v7 = vld [vmem:[#allocation5 + $0x60] ss:$16 sps:$4 sm:$0xff]   ;;  %v7803_v22 = vld [vmem:[#allocation5 + $0xc4] ss:$16 sps:$4 sm:$0xff]  }
  0x78   :  { %748 = vmatpush1.bf16.msra.mxu1 %v6796_v57  ;;  %833 = vmatprep.subr.bf16.mxu0 %v6801_v8  ;;  %v151_v57 = vld [vmem:[#allocation2 + $0x148] sm:$0xff]  ;;  %v6831_v8 = vcombine.high %v159_v63, %v159_v63  ;;  %v7809_v28 = vld [vmem:[#allocation5 + $0xe4] ss:$16 sps:$4 sm:$0xff]   ;;  %v7819_v43 = vld [vmem:[#allocation5 + $0x120] ss:$16 sps:$4 sm:$0xff]  }
  0x79   :  { %749 = vmatprep.subr.bf16.mxu1 %v6805_v59  ;;  %v7771_v59 = vld [vmem:[#allocation5 + $0x20] ss:$16 sps:$4 sm:$0xff]   ;;  %v7821_v40 = vld [vmem:[#allocation5 + $0x124] ss:$16 sps:$4 sm:$0xff]   ;;  %v7794_v63 = vld [vmem:[#allocation5 + $0x8c] ss:$16 sps:$4 sm:$0xff]  }
  0x7a   :  { %v7825_v47 = vld [vmem:[#allocation5 + $0x140] ss:$16 sps:$4 sm:$0xff]  }
  0x7b   :  { %834 = vmatpush1.bf16.msra.mxu0 %v6800_v14  ;;  %v726_v14 = vsel %vm718_vm2, %v6830_v9, 0  ;;  %v7831_v52 = vld [vmem:[#allocation5 + $0x160] ss:$16 sps:$4 sm:$0xff]   ;;  %v7845_v9 = vld [vmem:[#allocation5 + $0x1a4] ss:$16 sps:$4 sm:$0xff]  }
  0x7c   :  { %750 = vmatpush1.bf16.msra.mxu1 %v6804_v2  ;;  %835 = vmatprep.subr.bf16.mxu0 %v6809_v15  ;;  %v6823_v2 = vcombine.high %v151_v57, %v155_v58  ;;  %v6787_v15 = vcombine.high %v113_v5, %v117_v6 }
  0x7d   :  { %751 = vmatprep.subr.bf16.mxu1 %v6813_v4  ;;  %v6822_v4 = vcombine.low %v151_v57, %v155_v58  ;;  %v7839_v57 = vld [vmem:[#allocation5 + $0x184] ss:$16 sps:$4 sm:$0xff]   ;;  %v7774_v58 = vld [vmem:[#allocation5 + $0x28] ss:$16 sps:$4 sm:$0xff]  }
  0x7f   :  { %836 = vmatpush1.bf16.msra.mxu0 %v6808_v24  ;;  %v137_v24 = vld [vmem:[#allocation2 + $0xd8] sm:$0xff] }
  0x80   :  { %752 = vmatpush1.bf16.msra.mxu1 %v6812_v10  ;;  %837 = vmatprep.subr.bf16.mxu0 %v6817_v26  ;;  %v7791_v10 = vld [vmem:[#allocation5 + $0x84] ss:$16 sps:$4 sm:$0xff]   ;;  %v7801_v26 = vld [vmem:[#allocation5 + $0xc0] ss:$16 sps:$4 sm:$0xff]  }
  0x81   :  { %753 = vmatprep.subr.bf16.mxu1 %v6821_v12  ;;  %v125_v12 = vld [vmem:[#allocation2 + $0x78] sm:$0xff] }
  0x82   :  { %v6795_v21 = vcombine.high %v121_v11, %v125_v12  ;;  %v6794_v23 = vcombine.low %v121_v11, %v125_v12  ;;  %v7843_v11 = vld [vmem:[#allocation5 + $0x1a0] ss:$16 sps:$4 sm:$0xff]   ;;  %v7822_v12 = vld [vmem:[#allocation5 + $0x128] ss:$16 sps:$4 sm:$0xff]  }
  0x83   :  { %838 = vmatpush1.bf16.msra.mxu0 %v6816_v33  ;;  %v6811_v33 = vcombine.high %v137_v24, %v141_v25 }
  0x84   :  { %754 = vmatpush1.bf16.msra.mxu1 %v6820_v17  ;;  %839 = vmatprep.subr.bf16.mxu0 %v6825_v35  ;;  %v6786_v17 = vcombine.low %v113_v5, %v117_v6  ;;  %v7815_v35 = vld [vmem:[#allocation5 + $0x104] ss:$16 sps:$4 sm:$0xff]   ;;  %v7812_v5 = vld [vmem:[#allocation5 + $0xec] ss:$16 sps:$4 sm:$0xff]   ;;  %v7810_v6 = vld [vmem:[#allocation5 + $0xe8] ss:$16 sps:$4 sm:$0xff]  }
  0x85   :  { %6836 = vmatprep.subr.msk.bf16.mxu1 %vm718_vm2, %v6829_v19  ;;  %v133_v19 = vld [vmem:[#allocation2 + $0xb8] sm:$0xff] }
  0x86   :  { %v6803_v27 = vcombine.high %v129_v18, %v133_v19 }
  0x87   :  { %840 = vmatpush1.bf16.msra.mxu0 %v6824_v41 }
  0x88   :  { %756 = vmatpush1.bf16.msra.mxu1 %v720_v29  ;;  %6840 = vmatprep.subr.msk.bf16.mxu0 %vm718_vm2, %v6833_v42  ;;  %v6802_v29 = vcombine.low %v129_v18, %v133_v19  ;;  %v161_v42 = vld [vmem:[#allocation2 + $0x198] sm:$0x33]  ;;  %v7855_v19 = vld [vmem:[#allocation5 + $0x1e0] ss:$16 sps:$4 sm:$0xff]  }
  0x89   :  { %786 = vmatprep.subr.bf16.mxu1 %v6783_v30  ;;  %v145_v30 = vld [vmem:[#allocation2 + $0x118] sm:$0xff] }
  0x8a   :  { %v6819_v39 = vcombine.high %v145_v30, %v149_v31  ;;  %v6818_v41 = vcombine.low %v145_v30, %v149_v31  ;;  %v7836_v18 = vld [vmem:[#allocation5 + $0x16c] ss:$16 sps:$4 sm:$0xff]  }
  0x8b   :  { %6837 = vmatmul.mubr.msk.bf16.vlgmr.msra.gmra.mrb[8].mxu1 %vm714_vm3, %v9242_v34  ;;  %842 = vmatpush1.bf16.msra.mxu0 %v732_v48  ;;  %v6835_v48 = vcombine.high %v161_v42, %v161_v42  ;;  %v7866_v30 = vld [vmem:[#allocation5 + $0x20c] ss:$16 sps:$4 sm:$0xff]  }
  0x8c   :  { %787 = vmatpush1.bf16.msra.mxu1 %v6782_v36  ;;  %818 = vmatprep.mubr.bf16.mxu1 %v9032_v0  ;;  %v6810_v36 = vcombine.low %v137_v24, %v141_v25  ;;  %v7848_v24 = vld [vmem:[#allocation5 + $0x1ac] ss:$16 sps:$4 sm:$0xff]   ;;  %v7846_v25 = vld [vmem:[#allocation5 + $0x1a8] ss:$16 sps:$4 sm:$0xff]  }
  0x8d   :  { %788 = vmatprep.subr.bf16.mxu1 %v6791_v38  ;;  %2569 = vmatprep.subr.bf16.mxu0 %v7767_v49  ;;  %v7813_v38 = vld [vmem:[#allocation5 + $0x100] ss:$16 sps:$4 sm:$0xff]   ;;  %v6834_v49 = vcombine.low %v161_v42, %v161_v42 }
  0x8e   :  { %6841 = vmatmul.mubr.msk.bf16.vlgmr.msra.gmra.mrb[4].mxu0 %vm714_vm3, %v9242_v34 }
  0x8f   :  { %2570 = vmatpush1.bf16.msra.mxu0 %v7765_v54  ;;  %v738_v53 = vsel %vm718_vm2, %v6834_v49, 0  ;;  %v7768_v54 = vld [vmem:[#allocation5 + $0x8] ss:$16 sps:$4 sm:$0xff]  }
  0x90   :  { %789 = vmatpush1.bf16.msra.mxu1 %v6790_v44  ;;  %2571 = vmatprep.subr.bf16.mxu0 %v7773_v55  ;;  %v7776_v55 = vld [vmem:[#allocation5 + $0x2c] ss:$16 sps:$4 sm:$0xff]  }
  0x91   :  { %790 = vmatprep.subr.bf16.mxu1 %v6799_v45  ;;  %v7827_v45 = vld [vmem:[#allocation5 + $0x144] ss:$16 sps:$4 sm:$0xff]  }
  0x93   :  { %2572 = vmatpush1.bf16.msra.mxu0 %v7771_v59  ;;  %v7782_v59 = vld [vmem:[#allocation5 + $0x4c] ss:$16 sps:$4 sm:$0xff]  }
  0x94   :  { %791 = vmatpush1.bf16.msra.mxu1 %v6798_v50  ;;  %2573 = vmatprep.subr.bf16.mxu0 %v7779_v61  ;;  %v7833_v50 = vld [vmem:[#allocation5 + $0x164] ss:$16 sps:$4 sm:$0xff]   ;;  %v7788_v61 = vld [vmem:[#allocation5 + $0x6c] ss:$16 sps:$4 sm:$0xff]  }
  0x95   :  { %792 = vmatprep.subr.bf16.mxu1 %v6807_v51  ;;  %v7770_v51 = vld [vmem:[#allocation5 + $0xc] ss:$16 sps:$4 sm:$0xff]  }
  0x97   :  { %2574 = vmatpush1.bf16.msra.mxu0 %v7777_v1  ;;  %v7792_v1 = vld [vmem:[#allocation5 + $0x88] ss:$16 sps:$4 sm:$0xff]  }
  0x98   :  { %793 = vmatpush1.bf16.msra.mxu1 %v6806_v56  ;;  %2575 = vmatprep.subr.bf16.mxu0 %v7785_v3  ;;  %v7837_v56 = vld [vmem:[#allocation5 + $0x180] ss:$16 sps:$4 sm:$0xff]   ;;  %v7798_v3 = vld [vmem:[#allocation5 + $0xa8] ss:$16 sps:$4 sm:$0xff]  }
  0x99   :  { %794 = vmatprep.subr.bf16.mxu1 %v6815_v60  ;;  %v7780_v60 = vld [vmem:[#allocation5 + $0x48] ss:$16 sps:$4 sm:$0xff]  }
  0x9b   :  { %2576 = vmatpush1.bf16.msra.mxu0 %v7783_v7  ;;  %v7818_v7 = vld [vmem:[#allocation5 + $0x10c] ss:$16 sps:$4 sm:$0xff]  }
  0x9c   :  { %795 = vmatpush1.bf16.msra.mxu1 %v6814_v62  ;;  %2577 = vmatprep.subr.bf16.mxu0 %v7791_v10  ;;  %v7786_v62 = vld [vmem:[#allocation5 + $0x68] ss:$16 sps:$4 sm:$0xff]   ;;  %v7824_v10 = vld [vmem:[#allocation5 + $0x12c] ss:$16 sps:$4 sm:$0xff]  }
  0x9d   :  { %796 = vmatprep.subr.bf16.mxu1 %v6823_v2  ;;  %v7800_v2 = vld [vmem:[#allocation5 + $0xac] ss:$16 sps:$4 sm:$0xff]  }
  0x9f   :  { %2578 = vmatpush1.bf16.msra.mxu0 %v7789_v13  ;;  %v7851_v13 = vld [vmem:[#allocation5 + $0x1c4] ss:$16 sps:$4 sm:$0xff]  }
  0xa0   :  { %797 = vmatpush1.bf16.msra.mxu1 %v6822_v4  ;;  %2579 = vmatprep.subr.bf16.mxu0 %v7797_v16  ;;  %v7804_v4 = vld [vmem:[#allocation5 + $0xc8] ss:$16 sps:$4 sm:$0xff]  }
  0xa1   :  { %6838 = vmatprep.subr.msk.bf16.mxu1 %vm718_vm2, %v6831_v8  ;;  %v7816_v8 = vld [vmem:[#allocation5 + $0x108] ss:$16 sps:$4 sm:$0xff]  }
  0xa2   :  { %v7828_v16 = vld [vmem:[#allocation5 + $0x148] ss:$16 sps:$4 sm:$0xff]  }
  0xa3   :  { %2580 = vmatpush1.bf16.msra.mxu0 %v7795_v20  ;;  %v7863_v20 = vld [vmem:[#allocation5 + $0x204] ss:$16 sps:$4 sm:$0xff]  }
  0xa4   :  { %799 = vmatpush1.bf16.msra.mxu1 %v726_v14  ;;  %2581 = vmatprep.subr.bf16.mxu0 %v7803_v22  ;;  %v7830_v14 = vld [vmem:[#allocation5 + $0x14c] ss:$16 sps:$4 sm:$0xff]  }
  0xa5   :  { %872 = vmatprep.subr.bf16.mxu1 %v6787_v15  ;;  %v7849_v15 = vld [vmem:[#allocation5 + $0x1c0] ss:$16 sps:$4 sm:$0xff]   ;;  %v7842_v22 = vld [vmem:[#allocation5 + $0x18c] ss:$16 sps:$4 sm:$0xff]  }
  0xa7   :  { %6839 = vmatmul.mubr.msk.bf16.vlgmr.msra.gmra.mrb[0].mxu1 %vm714_vm3, %v9242_v34  ;;  %2582 = vmatpush1.bf16.msra.mxu0 %v7801_v26  ;;  %v7854_v26 = vld [vmem:[#allocation5 + $0x1cc] ss:$16 sps:$4 sm:$0xff]  }
  0xa8   :  { %873 = vmatpush1.bf16.msra.mxu1 %v6786_v17  ;;  %904 = vmatprep.mubr.bf16.mxu1 %v9032_v0  ;;  %v157_v0 = vld [vmem:[#allocation2 + $0x178] sm:$0xff]  ;;  %v7857_v17 = vld [vmem:[#allocation5 + $0x1e4] ss:$16 sps:$4 sm:$0xff]  }
  0xa9   :  { %874 = vmatprep.subr.bf16.mxu1 %v6795_v21  ;;  %2583 = vmatprep.subr.bf16.mxu0 %v7809_v28  ;;  %v6827_v44 = vcombine.high %v153_v37, %v157_v0  ;;  %v6826_v46 = vcombine.low %v153_v37, %v157_v0  ;;  %v7834_v21 = vld [vmem:[#allocation5 + $0x168] ss:$16 sps:$4 sm:$0xff]   ;;  %v7860_v28 = vld [vmem:[#allocation5 + $0x1ec] ss:$16 sps:$4 sm:$0xff]  }
  0xab   :  { %2584 = vmatpush1.bf16.msra.mxu0 %v7807_v32 }
  0xac   :  { %875 = vmatpush1.bf16.msra.mxu1 %v6794_v23  ;;  %2585 = vmatprep.subr.bf16.mxu0 %v7815_v35  ;;  %v7840_v23 = vld [vmem:[#allocation5 + $0x188] ss:$16 sps:$4 sm:$0xff]  }
  0xad   :  { %876 = vmatprep.subr.bf16.mxu1 %v6803_v27  ;;  %v7852_v27 = vld [vmem:[#allocation5 + $0x1c8] ss:$16 sps:$4 sm:$0xff]  }
  0xaf   :  { %2586 = vmatpush1.bf16.msra.mxu0 %v7813_v38  ;;  %v9268_v38 = vld [vmem:[%s9459_s8] sm:$0xff] }
  0xb0   :  { %877 = vmatpush1.bf16.msra.mxu1 %v6802_v29  ;;  %2587 = vmatprep.subr.bf16.mxu0 %v7821_v40  ;;  %v7858_v29 = vld [vmem:[#allocation5 + $0x1e8] ss:$16 sps:$4 sm:$0xff]  }
  0xb1   :  { %878 = vmatprep.subr.bf16.mxu1 %v6811_v33 }
  0xb3   :  { %2588 = vmatpush1.bf16.msra.mxu0 %v7819_v43 }
  0xb4   :  { %879 = vmatpush1.bf16.msra.mxu1 %v6810_v36  ;;  %2589 = vmatprep.subr.bf16.mxu0 %v7827_v45  ;;  %v916_v36 = vlaneseq }
  0xb5   :  { %880 = vmatprep.subr.bf16.mxu1 %v6819_v39 }
  0xb6   :  { %v9260_v37 = vshrl.u32 %v916_v36, 7  ;;  %v7879_v36 = vld [vmem:[#allocation5 + $0x260] ss:$16 sps:$4 sm:$0xff]  }
  0xb7   :  { %2590 = vmatpush1.bf16.msra.mxu0 %v7825_v47 }
  0xb8   :  { %881 = vmatpush1.bf16.msra.mxu1 %v6818_v41  ;;  %2591 = vmatprep.subr.bf16.mxu0 %v7833_v50  ;;  %v9263_v0 = vsub.s32 0, %v9260_v37  ;;  %v9271_v39 = vsub.s32 1, %v9260_v37  ;;  %v934_v50 = vsub.s32 4, %v9260_v37 }
  0xb9   :  { %882 = vmatprep.subr.bf16.mxu1 %v6827_v44 }
  0xba   :  { %v919_v40 = vrot.slane %v9268_v38, %v9263_v0  ;;  %v923_v42 = vrot.slane %v9268_v38, %v9271_v39 }
  0xbb   :  { %2592 = vmatpush1.bf16.msra.mxu0 %v7831_v52 }
  0xbc   :  { %883 = vmatpush1.bf16.msra.mxu1 %v6826_v46  ;;  %2593 = vmatprep.subr.bf16.mxu0 %v7839_v57 }
  0xbd   :  { %6842 = vmatprep.subr.msk.bf16.mxu1 %vm718_vm2, %v6835_v48 }
  0xbf   :  { %2594 = vmatpush1.bf16.msra.mxu0 %v7837_v56 }
  0xc0   :  { %885 = vmatpush1.bf16.msra.mxu1 %v738_v53  ;;  %2595 = vmatprep.subr.bf16.mxu0 %v7845_v9  ;;  %v938_v53 = vsub.s32 5, %v9260_v37 }
  0xc1   :  { %2741 = vmatprep.subr.bf16.mxu1 %v7770_v51 }
  0xc3   :  { %6843 = vmatmul.mubr.msk.bf16.vlgmr.msra.gmra.mrb[4].mxu1 %vm714_vm3, %v9242_v34  ;;  %v7806_v34 = vld [vmem:[#allocation5 + $0xcc] ss:$16 sps:$4 sm:$0xff]   ;;  %2596 = vmatpush1.bf16.msra.mxu0 %v7843_v11 }
  0xc4   :  { %2742 = vmatpush1.bf16.msra.mxu1 %v7768_v54  ;;  %2597 = vmatprep.subr.bf16.mxu0 %v7851_v13 }
  0xc5   :  { %2743 = vmatprep.subr.bf16.mxu1 %v7776_v55 }
  0xc7   :  { %2598 = vmatpush1.bf16.msra.mxu0 %v7849_v15 }
  0xc8   :  { %2744 = vmatpush1.bf16.msra.mxu1 %v7774_v58  ;;  %2599 = vmatprep.subr.bf16.mxu0 %v7857_v17 }
  0xc9   :  { %2745 = vmatprep.subr.bf16.mxu1 %v7782_v59  ;;  %v935_v59 = vrot.slane %v9268_v38, %v934_v50 }
  0xcb   :  { %2600 = vmatpush1.bf16.msra.mxu0 %v7855_v19  ;;  %v7870_v19 = vld [vmem:[#allocation5 + $0x228] ss:$16 sps:$4 sm:$0xff]  }
  0xcc   :  { %2746 = vmatpush1.bf16.msra.mxu1 %v7780_v60  ;;  %2612 = vmatprep.subr.bf16.mxu0 %v7863_v20 }
  0xcd   :  { %2747 = vmatprep.subr.bf16.mxu1 %v7788_v61  ;;  %v939_v61 = vrot.slane %v9268_v38, %v938_v53 }
  0xd0   :  { %2748 = vmatpush1.bf16.msra.mxu1 %v7786_v62 }
  0xd1   :  { %2749 = vmatprep.subr.bf16.mxu1 %v7794_v63 }
  0xd4   :  { %2750 = vmatpush1.bf16.msra.mxu1 %v7792_v1 }
  0xd5   :  { %2751 = vmatprep.subr.bf16.mxu1 %v7800_v2 }
  0xd8   :  { %2752 = vmatpush1.bf16.msra.mxu1 %v7798_v3  ;;  %v7861_v3 = vld [vmem:[#allocation5 + $0x200] ss:$16 sps:$4 sm:$0xff]  }
  0xd9   :  { %2753 = vmatprep.subr.bf16.mxu1 %v7806_v34  ;;  %v7864_v34 = vld [vmem:[#allocation5 + $0x208] ss:$16 sps:$4 sm:$0xff]  }
  0xdc   :  { %2754 = vmatpush1.bf16.msra.mxu1 %v7804_v4 }
  0xdd   :  { %2755 = vmatprep.subr.bf16.mxu1 %v7812_v5 }
  0xe0   :  { %2756 = vmatpush1.bf16.msra.mxu1 %v7810_v6  ;;  %v7869_v6 = vld [vmem:[#allocation5 + $0x224] ss:$16 sps:$4 sm:$0xff]  }
  0xe1   :  { %2757 = vmatprep.subr.bf16.mxu1 %v7818_v7 }
  0xe4   :  { %2758 = vmatpush1.bf16.msra.mxu1 %v7816_v8 }
  0xe5   :  { %2759 = vmatprep.subr.bf16.mxu1 %v7824_v10 }
  0xe8   :  { %2760 = vmatpush1.bf16.msra.mxu1 %v7822_v12  ;;  %v7872_v12 = vld [vmem:[#allocation5 + $0x22c] ss:$16 sps:$4 sm:$0xff]  }
  0xe9   :  { %2761 = vmatprep.subr.bf16.mxu1 %v7830_v14 }
  0xec   :  { %2762 = vmatpush1.bf16.msra.mxu1 %v7828_v16  ;;  %v7867_v16 = vld [vmem:[#allocation5 + $0x220] ss:$16 sps:$4 sm:$0xff]  }
  0xed   :  { %2763 = vmatprep.subr.bf16.mxu1 %v7836_v18 }
  0xf0   :  { %2764 = vmatpush1.bf16.msra.mxu1 %v7834_v21 }
  0xf1   :  { %2765 = vmatprep.subr.bf16.mxu1 %v7842_v22 }
  0xf4   :  { %2766 = vmatpush1.bf16.msra.mxu1 %v7840_v23 }
  0xf5   :  { %2767 = vmatprep.subr.bf16.mxu1 %v7848_v24  ;;  %v7875_v24 = vld [vmem:[#allocation5 + $0x244] ss:$16 sps:$4 sm:$0xff]  }
  0xf8   :  { %2768 = vmatpush1.bf16.msra.mxu1 %v7846_v25  ;;  %v7878_v25 = vld [vmem:[#allocation5 + $0x24c] ss:$16 sps:$4 sm:$0xff]  }
  0xf9   :  { %2769 = vmatprep.subr.bf16.mxu1 %v7854_v26 }
  0xfc   :  { %2770 = vmatpush1.bf16.msra.mxu1 %v7852_v27  ;;  %v7873_v27 = vld [vmem:[#allocation5 + $0x240] ss:$16 sps:$4 sm:$0xff]  }
  0xfd   :  { %2771 = vmatprep.subr.bf16.mxu1 %v7860_v28  ;;  %v7876_v28 = vld [vmem:[#allocation5 + $0x248] ss:$16 sps:$4 sm:$0xff]  }
 0x100   :  { %2772 = vmatpush1.bf16.msra.mxu1 %v7858_v29 }
 0x101   :  { %2784 = vmatprep.subr.bf16.mxu1 %v7866_v30 }
 0x13c   :  { %v316_v31 = vpop.f32.mrb[0].mxu0 }
 0x13d   :  { %v318_v32 = vpop.f32.mrb[1].mxu0 }
 0x13e   :  { %v320_v33 = vpop.f32.mrb[2].mxu0 }
 0x13f   :  { %v322_v35 = vpop.f32.mrb[3].mxu0 }
 0x15e   :  { %v777_v41 = vpop.f32.mrb[8].mxu1 }
 0x15f   :  { %v778_v43 = vadd.f32 %v777_v41, %v316_v31  ;;  %v779_v44 = vpop.f32.mrb[9].mxu1  ;;  %v9293_v41 = vsub.s32 3, %v9260_v37 }
 0x160   :  { %v780_v45 = vadd.f32 %v779_v44, %v318_v32  ;;  %v781_v46 = vpop.f32.mrb[10].mxu1  ;;  %v7881_v32 = vld [vmem:[#allocation5 + $0x264] ss:$16 sps:$4 sm:$0xff]   ;;  %v7890_v44 = vld [vmem:[#allocation5 + $0x28c] ss:$16 sps:$4 sm:$0xff]  }
 0x161   :  { %v956_v47 = vadd.f32 %v919_v40, %v778_v43  ;;  %v782_v48 = vadd.f32 %v781_v46, %v320_v33  ;;  %v783_v49 = vpop.f32.mrb[11].mxu1  ;;  %v863_v4 = vpop.f32.mrb[4].mxu0  ;;  %v7884_v33 = vld [vmem:[#allocation5 + $0x26c] ss:$16 sps:$4 sm:$0xff]   ;;  %v7887_v43 = vld [vmem:[#allocation5 + $0x284] ss:$16 sps:$4 sm:$0xff]  }
 0x162   :  { %v957_v51 = vadd.f32 %v923_v42, %v780_v45  ;;  %v784_v52 = vadd.f32 %v783_v49, %v322_v35  ;;  %v960_v7 = vadd.f32 %v935_v59, %v863_v4  ;;  %v865_v8 = vpop.f32.mrb[5].mxu0  ;;  %v9290_v35 = vsub.s32 2, %v9260_v37  ;;  %v7885_v46 = vld [vmem:[#allocation5 + $0x280] ss:$16 sps:$4 sm:$0xff]  }
 0x163   :  { %v972_v54 = vmul.f32 0.01, %v956_v47  ;;  %v964_v55 = vadd.f32 %v919_v40, %v782_v48  ;;  %v961_v10 = vadd.f32 %v939_v61, %v865_v8  ;;  %v867_v11 = vpop.f32.mrb[6].mxu0  ;;  %v7882_v40 = vld [vmem:[#allocation5 + $0x268] ss:$16 sps:$4 sm:$0xff]   ;;  %v931_v45 = vrot.slane %v9268_v38, %v9293_v41 }
 0x164   :  { %v973_v56 = vmul.f32 0.01, %v957_v51  ;;  %v965_v57 = vadd.f32 %v923_v42, %v784_v52  ;;  %v976_v13 = vmul.f32 0.01, %v960_v7  ;;  %v968_v14 = vadd.f32 %v935_v59, %v867_v11  ;;  %v869_v15 = vpop.f32.mrb[7].mxu0 }
 0x165   :  { %v980_v58 = vmul.f32 0.01, %v964_v55  ;;  %v988_v62 = vmax.f32 %v956_v47, %v972_v54  ;;  %v977_v17 = vmul.f32 0.01, %v961_v10  ;;  %v969_v18 = vadd.f32 %v939_v61, %v869_v15  ;;  %v7888_v47 = vld [vmem:[#allocation5 + $0x288] ss:$16 sps:$4 sm:$0xff]  }
 0x166   :  { %v981_v60 = vmul.f32 0.01, %v965_v57  ;;  %v989_v1 = vmax.f32 %v957_v51, %v973_v56  ;;  %v992_v20 = vmax.f32 %v960_v7, %v976_v13  ;;  %v984_v21 = vmul.f32 0.01, %v968_v14  ;;  %v7893_v52 = vld [vmem:[#allocation5 + $0x2a4] ss:$16 sps:$4 sm:$0xff]  }
 0x167   :  { %v996_v63 = vmax.f32 %v964_v55, %v980_v58  ;;  %v993_v22 = vmax.f32 %v961_v10, %v977_v17  ;;  %v985_v23 = vmul.f32 0.01, %v969_v18  ;;  %v927_v42 = vrot.slane %v9268_v38, %v9290_v35  ;;  %v7896_v54 = vld [vmem:[#allocation5 + $0x2ac] ss:$16 sps:$4 sm:$0xff]   ;;  %v7894_v58 = vld [vmem:[#allocation5 + $0x2a8] ss:$16 sps:$4 sm:$0xff]  }
 0x168   :  { %v997_v2 = vmax.f32 %v965_v57, %v981_v60  ;;  %v1000_v26 = vmax.f32 %v968_v14, %v984_v21  ;;  %v7891_v57 = vld [vmem:[#allocation5 + $0x2a0] ss:$16 sps:$4 sm:$0xff]   ;;  %v7905_v11 = vld [vmem:[#allocation5 + $0x2e4] ss:$16 sps:$4 sm:$0xff]   ;;  %v7906_v15 = vld [vmem:[#allocation5 + $0x2e8] ss:$16 sps:$4 sm:$0xff]  }
 0x169   :  { %v1004_v5 = vpack.c.bf16 %v996_v63, %v988_v62  ;;  %v1001_v29 = vmax.f32 %v969_v18, %v985_v23  ;;  %v7897_v4 = vld [vmem:[#allocation5 + $0x2c0] ss:$16 sps:$4 sm:$0xff]   ;;  %v7914_v17 = vld [vmem:[#allocation5 + $0x30c] ss:$16 sps:$4 sm:$0xff]   ;;  %v7918_v23 = vld [vmem:[#allocation5 + $0x328] ss:$16 sps:$4 sm:$0xff]  }
 0x16a   :  { %v1005_v9 = vpack.c.bf16 %v997_v2, %v989_v1  ;;  %v9285_v30 = vpack.c.bf16 %v1000_v26, %v992_v20  ;;  %v7899_v2 = vld [vmem:[#allocation5 + $0x2c4] ss:$16 sps:$4 sm:$0xff]   ;;  %v7903_v14 = vld [vmem:[#allocation5 + $0x2e0] ss:$16 sps:$4 sm:$0xff]   ;;  %v7920_v21 = vld [vmem:[#allocation5 + $0x32c] ss:$16 sps:$4 sm:$0xff]  }
 0x16b   :  { %v9287_v31 = vpack.c.bf16 %v1001_v29, %v993_v22  ;;  %v7909_v18 = vld [vmem:[#allocation5 + $0x300] ss:$16 sps:$4 sm:$0xff]   ;;  %v7917_v20 = vld [vmem:[#allocation5 + $0x324] ss:$16 sps:$4 sm:$0xff]   ;;  %v942_v26 = vsub.s32 6, %v9260_v37  ;;  %v946_v29 = vsub.s32 7, %v9260_v37 }
 0x16c   :  { %2601 = vmatprep.mubr.bf16.mxu0 %v1005_v9  ;;  %2773 = vmatprep.mubr.bf16.mxu1 %v1005_v9  ;;  %v7915_v22 = vld [vmem:[#allocation5 + $0x320] ss:$16 sps:$4 sm:$0xff]  }
 0x16d   :  { %2602 = vmatmul.mubr.bf16.vlgmr.msra.gmra.mrb[8].mxu0 %v1004_v5  ;;  %2774 = vmatmul.mubr.bf16.vlgmr.msra.gmra.mrb[12].mxu1 %v1004_v5  ;;  %v7900_v5 = vld [vmem:[#allocation5 + $0x2c8] ss:$16 sps:$4 sm:$0xff]  }
 0x16e   :  { %2613 = vmatpush1.bf16.msra.mxu0 %v7861_v3  ;;  %2785 = vmatpush1.bf16.msra.mxu1 %v7864_v34  ;;  %v7902_v3 = vld [vmem:[#allocation5 + $0x2cc] ss:$16 sps:$4 sm:$0xff]  }
 0x16f   :  { %2614 = vmatprep.subr.bf16.mxu0 %v7869_v6  ;;  %2786 = vmatprep.subr.bf16.mxu1 %v7872_v12  ;;  %v7908_v12 = vld [vmem:[#allocation5 + $0x2ec] ss:$16 sps:$4 sm:$0xff]  }
 0x172   :  { %2615 = vmatpush1.bf16.msra.mxu0 %v7867_v16  ;;  %2787 = vmatpush1.bf16.msra.mxu1 %v7870_v19  ;;  %v7911_v16 = vld [vmem:[#allocation5 + $0x304] ss:$16 sps:$4 sm:$0xff]   ;;  %v7912_v19 = vld [vmem:[#allocation5 + $0x308] ss:$16 sps:$4 sm:$0xff]  }
 0x173   :  { %2616 = vmatprep.subr.bf16.mxu0 %v7875_v24  ;;  %2788 = vmatprep.subr.bf16.mxu1 %v7878_v25  ;;  %v7923_v24 = vld [vmem:[#allocation5 + $0x344] ss:$16 sps:$4 sm:$0xff]   ;;  %v7926_v25 = vld [vmem:[#allocation5 + $0x34c] ss:$16 sps:$4 sm:$0xff]  }
 0x176   :  { %2617 = vmatpush1.bf16.msra.mxu0 %v7873_v27  ;;  %2789 = vmatpush1.bf16.msra.mxu1 %v7876_v28  ;;  %v7921_v27 = vld [vmem:[#allocation5 + $0x340] ss:$16 sps:$4 sm:$0xff]   ;;  %v7924_v28 = vld [vmem:[#allocation5 + $0x348] ss:$16 sps:$4 sm:$0xff]  }
 0x177   :  { %2618 = vmatprep.subr.bf16.mxu0 %v7881_v32  ;;  %2790 = vmatprep.subr.bf16.mxu1 %v7884_v33  ;;  %v943_v32 = vrot.slane %v9268_v38, %v942_v26  ;;  %v7929_v33 = vld [vmem:[#allocation5 + $0x364] ss:$16 sps:$4 sm:$0xff]  }
 0x17a   :  { %2619 = vmatpush1.bf16.msra.mxu0 %v7879_v36  ;;  %2791 = vmatpush1.bf16.msra.mxu1 %v7882_v40  ;;  %v820_v48 = vpop.f32.mrb[0].mxu1  ;;  %v7932_v36 = vld [vmem:[#allocation5 + $0x36c] ss:$16 sps:$4 sm:$0xff]   ;;  %v947_v40 = vrot.slane %v9268_v38, %v946_v29  ;;  %v7977_v29 = vld [vmem:[#allocation5 + $0x464] ss:$16 sps:$4 sm:$0xff]  }
 0x17b   :  { %v958_v49 = vadd.f32 %v927_v42, %v820_v48  ;;  %v822_v51 = vpop.f32.mrb[1].mxu1  ;;  %2620 = vmatprep.subr.bf16.mxu0 %v7887_v43  ;;  %2792 = vmatprep.subr.bf16.mxu1 %v7890_v44  ;;  %v7930_v43 = vld [vmem:[#allocation5 + $0x368] ss:$16 sps:$4 sm:$0xff]   ;;  %v7938_v48 = vld [vmem:[#allocation5 + $0x38c] ss:$16 sps:$4 sm:$0xff]  }
 0x17c   :  { %v959_v55 = vadd.f32 %v931_v45, %v822_v51  ;;  %v824_v56 = vpop.f32.mrb[2].mxu1 }
 0x17d   :  { %v974_v59 = vmul.f32 0.01, %v958_v49  ;;  %v966_v60 = vadd.f32 %v927_v42, %v824_v56  ;;  %v826_v61 = vpop.f32.mrb[3].mxu1  ;;  %v7927_v42 = vld [vmem:[#allocation5 + $0x360] ss:$16 sps:$4 sm:$0xff]  }
 0x17e   :  { %v975_v62 = vmul.f32 0.01, %v959_v55  ;;  %v967_v63 = vadd.f32 %v931_v45, %v826_v61  ;;  %2621 = vmatpush1.bf16.msra.mxu0 %v7885_v46  ;;  %2793 = vmatpush1.bf16.msra.mxu1 %v7888_v47  ;;  %v7935_v47 = vld [vmem:[#allocation5 + $0x384] ss:$16 sps:$4 sm:$0xff]   ;;  %v7944_v61 = vld [vmem:[#allocation5 + $0x3ac] ss:$16 sps:$4 sm:$0xff]  }
 0x17f   :  { %v982_v1 = vmul.f32 0.01, %v966_v60  ;;  %2622 = vmatprep.subr.bf16.mxu0 %v7893_v52  ;;  %2794 = vmatprep.subr.bf16.mxu1 %v7896_v54  ;;  %v990_v6 = vmax.f32 %v958_v49, %v974_v59  ;;  %v7933_v52 = vld [vmem:[#allocation5 + $0x380] ss:$16 sps:$4 sm:$0xff]   ;;  %v7936_v54 = vld [vmem:[#allocation5 + $0x388] ss:$16 sps:$4 sm:$0xff]  }
 0x180   :  { %v983_v34 = vmul.f32 0.01, %v967_v63  ;;  %v991_v8 = vmax.f32 %v959_v55, %v975_v62 }
 0x181   :  { %v998_v7 = vmax.f32 %v966_v60, %v982_v1  ;;  %v7941_v60 = vld [vmem:[#allocation5 + $0x3a4] ss:$16 sps:$4 sm:$0xff]   ;;  %v7942_v1 = vld [vmem:[#allocation5 + $0x3a8] ss:$16 sps:$4 sm:$0xff]  }
 0x182   :  { %v999_v9 = vmax.f32 %v967_v63, %v983_v34  ;;  %2623 = vmatpush1.bf16.msra.mxu0 %v7891_v57  ;;  %2795 = vmatpush1.bf16.msra.mxu1 %v7894_v58  ;;  %v7939_v63 = vld [vmem:[#allocation5 + $0x3a0] ss:$16 sps:$4 sm:$0xff]  }
 0x183   :  { %v9299_v10 = vpack.c.bf16 %v998_v7, %v990_v6  ;;  %2624 = vmatprep.subr.bf16.mxu0 %v7899_v2  ;;  %2796 = vmatprep.subr.bf16.mxu1 %v7902_v3  ;;  %v7947_v6 = vld [vmem:[#allocation5 + $0x3c4] ss:$16 sps:$4 sm:$0xff]   ;;  %v7950_v7 = vld [vmem:[#allocation5 + $0x3cc] ss:$16 sps:$4 sm:$0xff]  }
 0x184   :  { %v1007_v13 = vpack.c.bf16 %v999_v9, %v991_v8  ;;  %v7945_v8 = vld [vmem:[#allocation5 + $0x3c0] ss:$16 sps:$4 sm:$0xff]   ;;  %v7948_v9 = vld [vmem:[#allocation5 + $0x3c8] ss:$16 sps:$4 sm:$0xff]  }
 0x186   :  { %2625 = vmatpush1.bf16.msra.mxu0 %v7897_v4  ;;  %2797 = vmatpush1.bf16.msra.mxu1 %v7900_v5 }
 0x187   :  { %2644 = vmatprep.mubr.bf16.mxu0 %v1007_v13  ;;  %2816 = vmatprep.mubr.bf16.mxu1 %v1007_v13  ;;  %v7956_v13 = vld [vmem:[#allocation5 + $0x3ec] ss:$16 sps:$4 sm:$0xff]  }
 0x188   :  { %2626 = vmatprep.subr.bf16.mxu0 %v7905_v11  ;;  %2798 = vmatprep.subr.bf16.mxu1 %v7908_v12  ;;  %v7953_v12 = vld [vmem:[#allocation5 + $0x3e4] ss:$16 sps:$4 sm:$0xff]  }
 0x18a   :  { %2627 = vmatpush1.bf16.msra.mxu0 %v7903_v14  ;;  %2799 = vmatpush1.bf16.msra.mxu1 %v7906_v15  ;;  %v7951_v14 = vld [vmem:[#allocation5 + $0x3e0] ss:$16 sps:$4 sm:$0xff]   ;;  %v7954_v15 = vld [vmem:[#allocation5 + $0x3e8] ss:$16 sps:$4 sm:$0xff]  }
 0x18b   :  { %2628 = vmatprep.subr.bf16.mxu0 %v7911_v16  ;;  %2800 = vmatprep.subr.bf16.mxu1 %v7914_v17  ;;  %v7959_v16 = vld [vmem:[#allocation5 + $0x404] ss:$16 sps:$4 sm:$0xff]   ;;  %v7962_v17 = vld [vmem:[#allocation5 + $0x40c] ss:$16 sps:$4 sm:$0xff]  }
 0x18e   :  { %2629 = vmatpush1.bf16.msra.mxu0 %v7909_v18  ;;  %2801 = vmatpush1.bf16.msra.mxu1 %v7912_v19  ;;  %v7957_v18 = vld [vmem:[#allocation5 + $0x400] ss:$16 sps:$4 sm:$0xff]   ;;  %v7960_v19 = vld [vmem:[#allocation5 + $0x408] ss:$16 sps:$4 sm:$0xff]  }
 0x18f   :  { %2630 = vmatprep.subr.bf16.mxu0 %v7917_v20  ;;  %2802 = vmatprep.subr.bf16.mxu1 %v7920_v21  ;;  %v7965_v20 = vld [vmem:[#allocation5 + $0x424] ss:$16 sps:$4 sm:$0xff]   ;;  %v7968_v21 = vld [vmem:[#allocation5 + $0x42c] ss:$16 sps:$4 sm:$0xff]  }
 0x192   :  { %2631 = vmatpush1.bf16.msra.mxu0 %v7915_v22  ;;  %2803 = vmatpush1.bf16.msra.mxu1 %v7918_v23  ;;  %v7963_v22 = vld [vmem:[#allocation5 + $0x420] ss:$16 sps:$4 sm:$0xff]   ;;  %v7966_v23 = vld [vmem:[#allocation5 + $0x428] ss:$16 sps:$4 sm:$0xff]  }
 0x193   :  { %2632 = vmatprep.subr.bf16.mxu0 %v7923_v24  ;;  %2804 = vmatprep.subr.bf16.mxu1 %v7926_v25  ;;  %v7971_v24 = vld [vmem:[#allocation5 + $0x444] ss:$16 sps:$4 sm:$0xff]   ;;  %v7974_v25 = vld [vmem:[#allocation5 + $0x44c] ss:$16 sps:$4 sm:$0xff]  }
 0x196   :  { %2633 = vmatpush1.bf16.msra.mxu0 %v7921_v27  ;;  %2805 = vmatpush1.bf16.msra.mxu1 %v7924_v28  ;;  %v906_v44 = vpop.f32.mrb[4].mxu1  ;;  %v7969_v27 = vld [vmem:[#allocation5 + $0x440] ss:$16 sps:$4 sm:$0xff]   ;;  %v7972_v28 = vld [vmem:[#allocation5 + $0x448] ss:$16 sps:$4 sm:$0xff]  }
 0x197   :  { %v962_v45 = vadd.f32 %v943_v32, %v906_v44  ;;  %v908_v46 = vpop.f32.mrb[5].mxu1  ;;  %2634 = vmatprep.subr.bf16.mxu0 %v7929_v33  ;;  %2806 = vmatprep.subr.bf16.mxu1 %v7932_v36  ;;  %v7978_v33 = vld [vmem:[#allocation5 + $0x468] ss:$16 sps:$4 sm:$0xff]   ;;  %v7983_v36 = vld [vmem:[#allocation5 + $0x484] ss:$16 sps:$4 sm:$0xff]  }
 0x198   :  { %v963_v49 = vadd.f32 %v947_v40, %v908_v46  ;;  %v910_v51 = vpop.f32.mrb[6].mxu1  ;;  %v7992_v44 = vld [vmem:[#allocation5 + $0x4ac] ss:$16 sps:$4 sm:$0xff]   ;;  %v7990_v46 = vld [vmem:[#allocation5 + $0x4a8] ss:$16 sps:$4 sm:$0xff]  }
 0x199   :  { %v978_v55 = vmul.f32 0.01, %v962_v45  ;;  %v970_v56 = vadd.f32 %v943_v32, %v910_v51  ;;  %v912_v57 = vpop.f32.mrb[7].mxu1  ;;  %v7975_v32 = vld [vmem:[#allocation5 + $0x460] ss:$16 sps:$4 sm:$0xff]  }
 0x19a   :  { %v979_v58 = vmul.f32 0.01, %v963_v49  ;;  %v971_v38 = vadd.f32 %v947_v40, %v912_v57  ;;  %2635 = vmatpush1.bf16.msra.mxu0 %v7927_v42  ;;  %2807 = vmatpush1.bf16.msra.mxu1 %v7930_v43  ;;  %v7986_v40 = vld [vmem:[#allocation5 + $0x48c] ss:$16 sps:$4 sm:$0xff]   ;;  %v7981_v42 = vld [vmem:[#allocation5 + $0x480] ss:$16 sps:$4 sm:$0xff]  }
 0x19b   :  { %v986_v59 = vmul.f32 0.01, %v970_v56  ;;  %2636 = vmatprep.subr.bf16.mxu0 %v7935_v47  ;;  %2808 = vmatprep.subr.bf16.mxu1 %v7938_v48  ;;  %v994_v2 = vmax.f32 %v962_v45, %v978_v55  ;;  %v7984_v43 = vld [vmem:[#allocation5 + $0x488] ss:$16 sps:$4 sm:$0xff]   ;;  %v7987_v45 = vld [vmem:[#allocation5 + $0x4a0] ss:$16 sps:$4 sm:$0xff]  }
 0x19c   :  { %v987_v62 = vmul.f32 0.01, %v971_v38  ;;  %v995_v34 = vmax.f32 %v963_v49, %v979_v58  ;;  %v7995_v47 = vld [vmem:[#allocation5 + $0x4c4] ss:$16 sps:$4 sm:$0xff]   ;;  %v7998_v48 = vld [vmem:[#allocation5 + $0x4cc] ss:$16 sps:$4 sm:$0xff]  }
 0x19d   :  { %v1002_v3 = vmax.f32 %v970_v56, %v986_v59  ;;  %v7993_v49 = vld [vmem:[#allocation5 + $0x4c0] ss:$16 sps:$4 sm:$0xff]   ;;  %v7996_v51 = vld [vmem:[#allocation5 + $0x4c8] ss:$16 sps:$4 sm:$0xff]   ;;  %v8007_v57 = vld [vmem:[#allocation5 + $0x504] ss:$16 sps:$4 sm:$0xff]  }
 0x19e   :  { %v1003_v4 = vmax.f32 %v971_v38, %v987_v62  ;;  %2637 = vmatpush1.bf16.msra.mxu0 %v7933_v52  ;;  %2809 = vmatpush1.bf16.msra.mxu1 %v7936_v54  ;;  %v8001_v52 = vld [vmem:[#allocation5 + $0x4e4] ss:$16 sps:$4 sm:$0xff]   ;;  %v8004_v54 = vld [vmem:[#allocation5 + $0x4ec] ss:$16 sps:$4 sm:$0xff]   ;;  %v7999_v55 = vld [vmem:[#allocation5 + $0x4e0] ss:$16 sps:$4 sm:$0xff]  }
 0x19f   :  { %v9307_v5 = vpack.c.bf16 %v1002_v3, %v994_v2  ;;  %2638 = vmatprep.subr.bf16.mxu0 %v7941_v60  ;;  %2810 = vmatprep.subr.bf16.mxu1 %v7944_v61  ;;  %v8002_v56 = vld [vmem:[#allocation5 + $0x4e8] ss:$16 sps:$4 sm:$0xff]   ;;  %v8010_v58 = vld [vmem:[#allocation5 + $0x50c] ss:$16 sps:$4 sm:$0xff]   ;;  %v8005_v38 = vld [vmem:[#allocation5 + $0x500] ss:$16 sps:$4 sm:$0xff]  }
 0x1a0   :  { %v9309_v11 = vpack.c.bf16 %v1003_v4, %v995_v34  ;;  %v8008_v59 = vld [vmem:[#allocation5 + $0x508] ss:$16 sps:$4 sm:$0xff]   ;;  %v8013_v60 = vld [vmem:[#allocation5 + $0x524] ss:$16 sps:$4 sm:$0xff]   ;;  %v8016_v61 = vld [vmem:[#allocation5 + $0x52c] ss:$16 sps:$4 sm:$0xff]  }
 0x1a1   :  { %v8011_v62 = vld [vmem:[#allocation5 + $0x520] ss:$16 sps:$4 sm:$0xff]   ;;  %v8022_v2 = vld [vmem:[#allocation5 + $0x54c] ss:$16 sps:$4 sm:$0xff]   ;;  %v8020_v34 = vld [vmem:[#allocation5 + $0x548] ss:$16 sps:$4 sm:$0xff]  }
 0x1a2   :  { %2639 = vmatpush1.bf16.msra.mxu0 %v7939_v63  ;;  %2811 = vmatpush1.bf16.msra.mxu1 %v7942_v1  ;;  %v8014_v63 = vld [vmem:[#allocation5 + $0x528] ss:$16 sps:$4 sm:$0xff]   ;;  %v8019_v1 = vld [vmem:[#allocation5 + $0x544] ss:$16 sps:$4 sm:$0xff]   ;;  %v8017_v3 = vld [vmem:[#allocation5 + $0x540] ss:$16 sps:$4 sm:$0xff]  }
 0x1a3   :  { %2640 = vmatprep.subr.bf16.mxu0 %v7947_v6  ;;  %2812 = vmatprep.subr.bf16.mxu1 %v7950_v7  ;;  %v8025_v4 = vld [vmem:[#allocation5 + $0x564] ss:$16 sps:$4 sm:$0xff]   ;;  %v8028_v6 = vld [vmem:[#allocation5 + $0x56c] ss:$16 sps:$4 sm:$0xff]   ;;  %v8023_v7 = vld [vmem:[#allocation5 + $0x560] ss:$16 sps:$4 sm:$0xff]  }
 0x1a6   :  { %2641 = vmatpush1.bf16.msra.mxu0 %v7945_v8  ;;  %2813 = vmatpush1.bf16.msra.mxu1 %v7948_v9  ;;  %v8026_v8 = vld [vmem:[#allocation5 + $0x568] ss:$16 sps:$4 sm:$0xff]   ;;  %v8031_v9 = vld [vmem:[#allocation5 + $0x584] ss:$16 sps:$4 sm:$0xff]  }
 0x1a7   :  { %2642 = vmatprep.subr.bf16.mxu0 %v7953_v12  ;;  %2814 = vmatprep.subr.bf16.mxu1 %v7956_v13  ;;  %v8034_v12 = vld [vmem:[#allocation5 + $0x58c] ss:$16 sps:$4 sm:$0xff]   ;;  %v8029_v13 = vld [vmem:[#allocation5 + $0x580] ss:$16 sps:$4 sm:$0xff]  }
 0x1aa   :  { %2643 = vmatpush1.bf16.msra.mxu0 %v7951_v14  ;;  %2815 = vmatpush1.bf16.msra.mxu1 %v7954_v15  ;;  %v8032_v14 = vld [vmem:[#allocation5 + $0x588] ss:$16 sps:$4 sm:$0xff]   ;;  %v8037_v15 = vld [vmem:[#allocation5 + $0x5a4] ss:$16 sps:$4 sm:$0xff]  }
 0x1ab   :  { %2655 = vmatprep.subr.bf16.mxu0 %v7959_v16  ;;  %2827 = vmatprep.subr.bf16.mxu1 %v7962_v17  ;;  %v8040_v16 = vld [vmem:[#allocation5 + $0x5ac] ss:$16 sps:$4 sm:$0xff]   ;;  %v8035_v17 = vld [vmem:[#allocation5 + $0x5a0] ss:$16 sps:$4 sm:$0xff]  }
 0x1ad   :  { %2645 = vmatmul.mubr.bf16.vlgmr.msra.gmra.mrb[8].mxu0 %v9299_v10  ;;  %2817 = vmatmul.mubr.bf16.vlgmr.msra.gmra.mrb[12].mxu1 %v9299_v10  ;;  %v7980_v10 = vld [vmem:[#allocation5 + $0x46c] ss:$16 sps:$4 sm:$0xff]  }
 0x1ae   :  { %2656 = vmatpush1.bf16.msra.mxu0 %v7957_v18  ;;  %2828 = vmatpush1.bf16.msra.mxu1 %v7960_v19  ;;  %v8038_v18 = vld [vmem:[#allocation5 + $0x5a8] ss:$16 sps:$4 sm:$0xff]   ;;  %v8043_v19 = vld [vmem:[#allocation5 + $0x5c4] ss:$16 sps:$4 sm:$0xff]  }
 0x1af   :  { %2657 = vmatprep.subr.bf16.mxu0 %v7965_v20  ;;  %2829 = vmatprep.subr.bf16.mxu1 %v7968_v21  ;;  %v8046_v20 = vld [vmem:[#allocation5 + $0x5cc] ss:$16 sps:$4 sm:$0xff]   ;;  %v8041_v21 = vld [vmem:[#allocation5 + $0x5c0] ss:$16 sps:$4 sm:$0xff]  }
 0x1b0   :  { %2687 = vmatprep.mubr.bf16.mxu0 %v9287_v31  ;;  %2859 = vmatprep.mubr.bf16.mxu1 %v9287_v31  ;;  %v7989_v31 = vld [vmem:[#allocation5 + $0x4a4] ss:$16 sps:$4 sm:$0xff]  }
 0x1b2   :  { %2658 = vmatpush1.bf16.msra.mxu0 %v7963_v22  ;;  %2830 = vmatpush1.bf16.msra.mxu1 %v7966_v23  ;;  %v8044_v22 = vld [vmem:[#allocation5 + $0x5c8] ss:$16 sps:$4 sm:$0xff]   ;;  %v8049_v23 = vld [vmem:[#allocation5 + $0x5e4] ss:$16 sps:$4 sm:$0xff]  }
 0x1b3   :  { %2659 = vmatprep.subr.bf16.mxu0 %v7971_v24  ;;  %2831 = vmatprep.subr.bf16.mxu1 %v7974_v25  ;;  %v8052_v24 = vld [vmem:[#allocation5 + $0x5ec] ss:$16 sps:$4 sm:$0xff]   ;;  %v8047_v25 = vld [vmem:[#allocation5 + $0x5e0] ss:$16 sps:$4 sm:$0xff]  }
 0x1b6   :  { %2660 = vmatpush1.bf16.msra.mxu0 %v7969_v27  ;;  %2832 = vmatpush1.bf16.msra.mxu1 %v7972_v28  ;;  %v8050_v27 = vld [vmem:[#allocation5 + $0x5e8] ss:$16 sps:$4 sm:$0xff]   ;;  %v8055_v28 = vld [vmem:[#allocation5 + $0x604] ss:$16 sps:$4 sm:$0xff]  }
 0x1b7   :  { %2661 = vmatprep.subr.bf16.mxu0 %v7977_v29  ;;  %2833 = vmatprep.subr.bf16.mxu1 %v7980_v10  ;;  %v8058_v29 = vld [vmem:[#allocation5 + $0x60c] ss:$16 sps:$4 sm:$0xff]   ;;  %v8053_v10 = vld [vmem:[#allocation5 + $0x600] ss:$16 sps:$4 sm:$0xff]  }
 0x1ba   :  { %2662 = vmatpush1.bf16.msra.mxu0 %v7975_v32  ;;  %2834 = vmatpush1.bf16.msra.mxu1 %v7978_v33  ;;  %v8056_v32 = vld [vmem:[#allocation5 + $0x608] ss:$16 sps:$4 sm:$0xff]   ;;  %v8061_v33 = vld [vmem:[#allocation5 + $0x624] ss:$16 sps:$4 sm:$0xff]  }
 0x1bb   :  { %2663 = vmatprep.subr.bf16.mxu0 %v7983_v36  ;;  %2835 = vmatprep.subr.bf16.mxu1 %v7986_v40  ;;  %v8064_v36 = vld [vmem:[#allocation5 + $0x62c] ss:$16 sps:$4 sm:$0xff]   ;;  %v8059_v40 = vld [vmem:[#allocation5 + $0x620] ss:$16 sps:$4 sm:$0xff]  }
 0x1be   :  { %2664 = vmatpush1.bf16.msra.mxu0 %v7981_v42  ;;  %2836 = vmatpush1.bf16.msra.mxu1 %v7984_v43  ;;  %v8062_v42 = vld [vmem:[#allocation5 + $0x628] ss:$16 sps:$4 sm:$0xff]   ;;  %v8067_v43 = vld [vmem:[#allocation5 + $0x644] ss:$16 sps:$4 sm:$0xff]  }
 0x1bf   :  { %2665 = vmatprep.subr.bf16.mxu0 %v7989_v31  ;;  %2837 = vmatprep.subr.bf16.mxu1 %v7992_v44  ;;  %v8070_v31 = vld [vmem:[#allocation5 + $0x64c] ss:$16 sps:$4 sm:$0xff]   ;;  %v8065_v44 = vld [vmem:[#allocation5 + $0x640] ss:$16 sps:$4 sm:$0xff]  }
 0x1c2   :  { %2666 = vmatpush1.bf16.msra.mxu0 %v7987_v45  ;;  %2838 = vmatpush1.bf16.msra.mxu1 %v7990_v46  ;;  %v8068_v45 = vld [vmem:[#allocation5 + $0x648] ss:$16 sps:$4 sm:$0xff]   ;;  %v8073_v46 = vld [vmem:[#allocation5 + $0x664] ss:$16 sps:$4 sm:$0xff]  }
 0x1c3   :  { %2667 = vmatprep.subr.bf16.mxu0 %v7995_v47  ;;  %2839 = vmatprep.subr.bf16.mxu1 %v7998_v48  ;;  %v8071_v47 = vld [vmem:[#allocation5 + $0x660] ss:$16 sps:$4 sm:$0xff]   ;;  %v8074_v48 = vld [vmem:[#allocation5 + $0x668] ss:$16 sps:$4 sm:$0xff]  }
 0x1c6   :  { %2668 = vmatpush1.bf16.msra.mxu0 %v7993_v49  ;;  %2840 = vmatpush1.bf16.msra.mxu1 %v7996_v51  ;;  %v8079_v49 = vld [vmem:[#allocation5 + $0x684] ss:$16 sps:$4 sm:$0xff]   ;;  %v8077_v51 = vld [vmem:[#allocation5 + $0x680] ss:$16 sps:$4 sm:$0xff]  }
 0x1c7   :  { %2669 = vmatprep.subr.bf16.mxu0 %v8001_v52  ;;  %2841 = vmatprep.subr.bf16.mxu1 %v8004_v54  ;;  %v8080_v52 = vld [vmem:[#allocation5 + $0x688] ss:$16 sps:$4 sm:$0xff]   ;;  %v8085_v54 = vld [vmem:[#allocation5 + $0x6a4] ss:$16 sps:$4 sm:$0xff]  }
 0x1ca   :  { %2670 = vmatpush1.bf16.msra.mxu0 %v7999_v55  ;;  %2842 = vmatpush1.bf16.msra.mxu1 %v8002_v56  ;;  %v8088_v55 = vld [vmem:[#allocation5 + $0x6ac] ss:$16 sps:$4 sm:$0xff]   ;;  %v8083_v56 = vld [vmem:[#allocation5 + $0x6a0] ss:$16 sps:$4 sm:$0xff]  }
 0x1cb   :  { %2671 = vmatprep.subr.bf16.mxu0 %v8007_v57  ;;  %2843 = vmatprep.subr.bf16.mxu1 %v8010_v58  ;;  %v8086_v57 = vld [vmem:[#allocation5 + $0x6a8] ss:$16 sps:$4 sm:$0xff]   ;;  %v8091_v58 = vld [vmem:[#allocation5 + $0x6c4] ss:$16 sps:$4 sm:$0xff]  }
 0x1ce   :  { %2672 = vmatpush1.bf16.msra.mxu0 %v8005_v38  ;;  %2844 = vmatpush1.bf16.msra.mxu1 %v8008_v59  ;;  %v8094_v38 = vld [vmem:[#allocation5 + $0x6cc] ss:$16 sps:$4 sm:$0xff]   ;;  %v8089_v59 = vld [vmem:[#allocation5 + $0x6c0] ss:$16 sps:$4 sm:$0xff]  }
 0x1cf   :  { %2673 = vmatprep.subr.bf16.mxu0 %v8013_v60  ;;  %2845 = vmatprep.subr.bf16.mxu1 %v8016_v61  ;;  %v8092_v60 = vld [vmem:[#allocation5 + $0x6c8] ss:$16 sps:$4 sm:$0xff]   ;;  %v8097_v61 = vld [vmem:[#allocation5 + $0x6e4] ss:$16 sps:$4 sm:$0xff]  }
 0x1d2   :  { %2674 = vmatpush1.bf16.msra.mxu0 %v8011_v62  ;;  %2846 = vmatpush1.bf16.msra.mxu1 %v8014_v63  ;;  %v8100_v62 = vld [vmem:[#allocation5 + $0x6ec] ss:$16 sps:$4 sm:$0xff]   ;;  %v8095_v63 = vld [vmem:[#allocation5 + $0x6e0] ss:$16 sps:$4 sm:$0xff]  }
 0x1d3   :  { %2675 = vmatprep.subr.bf16.mxu0 %v8019_v1  ;;  %2847 = vmatprep.subr.bf16.mxu1 %v8022_v2  ;;  %v8098_v1 = vld [vmem:[#allocation5 + $0x6e8] ss:$16 sps:$4 sm:$0xff]   ;;  %v8103_v2 = vld [vmem:[#allocation5 + $0x704] ss:$16 sps:$4 sm:$0xff]  }
 0x1d6   :  { %2676 = vmatpush1.bf16.msra.mxu0 %v8017_v3  ;;  %2848 = vmatpush1.bf16.msra.mxu1 %v8020_v34  ;;  %v8106_v3 = vld [vmem:[#allocation5 + $0x70c] ss:$16 sps:$4 sm:$0xff]   ;;  %v8101_v34 = vld [vmem:[#allocation5 + $0x700] ss:$16 sps:$4 sm:$0xff]  }
 0x1d7   :  { %2677 = vmatprep.subr.bf16.mxu0 %v8025_v4  ;;  %2849 = vmatprep.subr.bf16.mxu1 %v8028_v6  ;;  %v8104_v4 = vld [vmem:[#allocation5 + $0x708] ss:$16 sps:$4 sm:$0xff]   ;;  %v8109_v6 = vld [vmem:[#allocation5 + $0x724] ss:$16 sps:$4 sm:$0xff]  }
 0x1da   :  { %2678 = vmatpush1.bf16.msra.mxu0 %v8023_v7  ;;  %2850 = vmatpush1.bf16.msra.mxu1 %v8026_v8  ;;  %v8112_v7 = vld [vmem:[#allocation5 + $0x72c] ss:$16 sps:$4 sm:$0xff]   ;;  %v8107_v8 = vld [vmem:[#allocation5 + $0x720] ss:$16 sps:$4 sm:$0xff]  }
 0x1db   :  { %2679 = vmatprep.subr.bf16.mxu0 %v8031_v9  ;;  %2851 = vmatprep.subr.bf16.mxu1 %v8034_v12  ;;  %v8110_v9 = vld [vmem:[#allocation5 + $0x728] ss:$16 sps:$4 sm:$0xff]   ;;  %v8115_v12 = vld [vmem:[#allocation5 + $0x744] ss:$16 sps:$4 sm:$0xff]  }
 0x1de   :  { %2680 = vmatpush1.bf16.msra.mxu0 %v8029_v13  ;;  %2852 = vmatpush1.bf16.msra.mxu1 %v8032_v14  ;;  %v8118_v13 = vld [vmem:[#allocation5 + $0x74c] ss:$16 sps:$4 sm:$0xff]   ;;  %v8113_v14 = vld [vmem:[#allocation5 + $0x740] ss:$16 sps:$4 sm:$0xff]  }
 0x1df   :  { %2681 = vmatprep.subr.bf16.mxu0 %v8037_v15  ;;  %2853 = vmatprep.subr.bf16.mxu1 %v8040_v16  ;;  %v8116_v15 = vld [vmem:[#allocation5 + $0x748] ss:$16 sps:$4 sm:$0xff]   ;;  %v8121_v16 = vld [vmem:[#allocation5 + $0x764] ss:$16 sps:$4 sm:$0xff]  }
 0x1e2   :  { %2682 = vmatpush1.bf16.msra.mxu0 %v8035_v17  ;;  %2854 = vmatpush1.bf16.msra.mxu1 %v8038_v18  ;;  %v8124_v17 = vld [vmem:[#allocation5 + $0x76c] ss:$16 sps:$4 sm:$0xff]   ;;  %v8119_v18 = vld [vmem:[#allocation5 + $0x760] ss:$16 sps:$4 sm:$0xff]  }
 0x1e3   :  { %2683 = vmatprep.subr.bf16.mxu0 %v8043_v19  ;;  %2855 = vmatprep.subr.bf16.mxu1 %v8046_v20  ;;  %v8122_v19 = vld [vmem:[#allocation5 + $0x768] ss:$16 sps:$4 sm:$0xff]   ;;  %v8127_v20 = vld [vmem:[#allocation5 + $0x784] ss:$16 sps:$4 sm:$0xff]  }
 0x1e6   :  { %2684 = vmatpush1.bf16.msra.mxu0 %v8041_v21  ;;  %2856 = vmatpush1.bf16.msra.mxu1 %v8044_v22  ;;  %v8130_v21 = vld [vmem:[#allocation5 + $0x78c] ss:$16 sps:$4 sm:$0xff]   ;;  %v8125_v22 = vld [vmem:[#allocation5 + $0x780] ss:$16 sps:$4 sm:$0xff]  }
 0x1e7   :  { %2685 = vmatprep.subr.bf16.mxu0 %v8049_v23  ;;  %2857 = vmatprep.subr.bf16.mxu1 %v8052_v24  ;;  %v8128_v23 = vld [vmem:[#allocation5 + $0x788] ss:$16 sps:$4 sm:$0xff]   ;;  %v8133_v24 = vld [vmem:[#allocation5 + $0x7a4] ss:$16 sps:$4 sm:$0xff]  }
 0x1ea   :  { %2686 = vmatpush1.bf16.msra.mxu0 %v8047_v25  ;;  %2858 = vmatpush1.bf16.msra.mxu1 %v8050_v27  ;;  %v8136_v25 = vld [vmem:[#allocation5 + $0x7ac] ss:$16 sps:$4 sm:$0xff]   ;;  %v8131_v27 = vld [vmem:[#allocation5 + $0x7a0] ss:$16 sps:$4 sm:$0xff]  }
 0x1eb   :  { %2698 = vmatprep.subr.bf16.mxu0 %v8055_v28  ;;  %2870 = vmatprep.subr.bf16.mxu1 %v8058_v29  ;;  %v8134_v28 = vld [vmem:[#allocation5 + $0x7a8] ss:$16 sps:$4 sm:$0xff]   ;;  %v8139_v29 = vld [vmem:[#allocation5 + $0x7c4] ss:$16 sps:$4 sm:$0xff]  }
 0x1ed   :  { %2688 = vmatmul.mubr.bf16.vlgmr.msra.gmra.mrb[8].mxu0 %v9285_v30  ;;  %2860 = vmatmul.mubr.bf16.vlgmr.msra.gmra.mrb[12].mxu1 %v9285_v30  ;;  %v8076_v30 = vld [vmem:[#allocation5 + $0x66c] ss:$16 sps:$4 sm:$0xff]  }
 0x1ee   :  { %2699 = vmatpush1.bf16.msra.mxu0 %v8053_v10  ;;  %2730 = vmatprep.mubr.bf16.mxu0 %v9309_v11  ;;  %v8142_v10 = vld [vmem:[#allocation5 + $0x7cc] ss:$16 sps:$4 sm:$0xff]  }
 0x1ef   :  { %2871 = vmatpush1.bf16.msra.mxu1 %v8056_v32  ;;  %2902 = vmatprep.mubr.bf16.mxu1 %v9309_v11  ;;  %v8082_v11 = vld [vmem:[#allocation5 + $0x68c] ss:$16 sps:$4 sm:$0xff]   ;;  %v8137_v32 = vld [vmem:[#allocation5 + $0x7c0] ss:$16 sps:$4 sm:$0xff]  }
 0x1f0   :  { %2700 = vmatprep.subr.bf16.mxu0 %v8061_v33  ;;  %2872 = vmatprep.subr.bf16.mxu1 %v8064_v36  ;;  %v8140_v33 = vld [vmem:[#allocation5 + $0x7c8] ss:$16 sps:$4 sm:$0xff]   ;;  %v8145_v36 = vld [vmem:[#allocation5 + $0x7e4] ss:$16 sps:$4 sm:$0xff]  }
 0x1f2   :  { %2701 = vmatpush1.bf16.msra.mxu0 %v8059_v40  ;;  %v8148_v40 = vld [vmem:[#allocation5 + $0x7ec] ss:$16 sps:$4 sm:$0xff]  }
 0x1f3   :  { %2873 = vmatpush1.bf16.msra.mxu1 %v8062_v42  ;;  %2702 = vmatprep.subr.bf16.mxu0 %v8067_v43  ;;  %v8143_v42 = vld [vmem:[#allocation5 + $0x7e0] ss:$16 sps:$4 sm:$0xff]   ;;  %v8146_v43 = vld [vmem:[#allocation5 + $0x7e8] ss:$16 sps:$4 sm:$0xff]  }
 0x1f4   :  { %2874 = vmatprep.subr.bf16.mxu1 %v8070_v31  ;;  %v8151_v31 = vld [vmem:[#allocation7 + $0x4] ss:$16 sps:$4 sm:$0xff]  }
 0x1f6   :  { %2703 = vmatpush1.bf16.msra.mxu0 %v8065_v44  ;;  %v8154_v44 = vld [vmem:[#allocation7 + $0xc] ss:$16 sps:$4 sm:$0xff]  }
 0x1f7   :  { %2875 = vmatpush1.bf16.msra.mxu1 %v8068_v45  ;;  %2704 = vmatprep.subr.bf16.mxu0 %v8073_v46  ;;  %v8149_v45 = vld [vmem:[#allocation7] ss:$16 sps:$4 sm:$0xff]   ;;  %v8152_v46 = vld [vmem:[#allocation7 + $0x8] ss:$16 sps:$4 sm:$0xff]  }
 0x1f8   :  { %2876 = vmatprep.subr.bf16.mxu1 %v8076_v30  ;;  %v8157_v30 = vld [vmem:[#allocation7 + $0x24] ss:$16 sps:$4 sm:$0xff]  }
 0x1fa   :  { %2705 = vmatpush1.bf16.msra.mxu0 %v8071_v47  ;;  %v8160_v47 = vld [vmem:[#allocation7 + $0x2c] ss:$16 sps:$4 sm:$0xff]  }
 0x1fb   :  { %2877 = vmatpush1.bf16.msra.mxu1 %v8074_v48  ;;  %2706 = vmatprep.subr.bf16.mxu0 %v8079_v49  ;;  %v8155_v48 = vld [vmem:[#allocation7 + $0x20] ss:$16 sps:$4 sm:$0xff]   ;;  %v8158_v49 = vld [vmem:[#allocation7 + $0x28] ss:$16 sps:$4 sm:$0xff]  }
 0x1fc   :  { %2878 = vmatprep.subr.bf16.mxu1 %v8082_v11  ;;  %v8163_v11 = vld [vmem:[#allocation7 + $0x44] ss:$16 sps:$4 sm:$0xff]  }
 0x1fe   :  { %2707 = vmatpush1.bf16.msra.mxu0 %v8077_v51  ;;  %v8166_v51 = vld [vmem:[#allocation7 + $0x4c] ss:$16 sps:$4 sm:$0xff]  }
 0x1ff   :  { %2879 = vmatpush1.bf16.msra.mxu1 %v8080_v52  ;;  %2708 = vmatprep.subr.bf16.mxu0 %v8085_v54  ;;  %v8161_v52 = vld [vmem:[#allocation7 + $0x40] ss:$16 sps:$4 sm:$0xff]   ;;  %v8164_v54 = vld [vmem:[#allocation7 + $0x48] ss:$16 sps:$4 sm:$0xff]  }
 0x200   :  { %2880 = vmatprep.subr.bf16.mxu1 %v8088_v55  ;;  %v8169_v55 = vld [vmem:[#allocation7 + $0x64] ss:$16 sps:$4 sm:$0xff]  }
 0x202   :  { %2709 = vmatpush1.bf16.msra.mxu0 %v8083_v56  ;;  %v8172_v56 = vld [vmem:[#allocation7 + $0x6c] ss:$16 sps:$4 sm:$0xff]  }
 0x203   :  { %2881 = vmatpush1.bf16.msra.mxu1 %v8086_v57  ;;  %2710 = vmatprep.subr.bf16.mxu0 %v8091_v58  ;;  %v8167_v57 = vld [vmem:[#allocation7 + $0x60] ss:$16 sps:$4 sm:$0xff]   ;;  %v8175_v58 = vld [vmem:[#allocation7 + $0x84] ss:$16 sps:$4 sm:$0xff]  }
 0x204   :  { %2882 = vmatprep.subr.bf16.mxu1 %v8094_v38  ;;  %v8178_v38 = vld [vmem:[#allocation7 + $0x8c] ss:$16 sps:$4 sm:$0xff]  }
 0x206   :  { %2711 = vmatpush1.bf16.msra.mxu0 %v8089_v59  ;;  %v8173_v59 = vld [vmem:[#allocation7 + $0x80] ss:$16 sps:$4 sm:$0xff]  }
 0x207   :  { %2883 = vmatpush1.bf16.msra.mxu1 %v8092_v60  ;;  %2712 = vmatprep.subr.bf16.mxu0 %v8097_v61  ;;  %v8176_v60 = vld [vmem:[#allocation7 + $0x88] ss:$16 sps:$4 sm:$0xff]   ;;  %v8181_v61 = vld [vmem:[#allocation7 + $0xa4] ss:$16 sps:$4 sm:$0xff]  }
 0x208   :  { %2884 = vmatprep.subr.bf16.mxu1 %v8100_v62  ;;  %v8184_v62 = vld [vmem:[#allocation7 + $0xac] ss:$16 sps:$4 sm:$0xff]  }
 0x20a   :  { %2713 = vmatpush1.bf16.msra.mxu0 %v8095_v63  ;;  %v8179_v63 = vld [vmem:[#allocation7 + $0xa0] ss:$16 sps:$4 sm:$0xff]  }
 0x20b   :  { %2885 = vmatpush1.bf16.msra.mxu1 %v8098_v1  ;;  %2714 = vmatprep.subr.bf16.mxu0 %v8103_v2  ;;  %v8182_v1 = vld [vmem:[#allocation7 + $0xa8] ss:$16 sps:$4 sm:$0xff]   ;;  %v8187_v2 = vld [vmem:[#allocation7 + $0xc4] ss:$16 sps:$4 sm:$0xff]  }
 0x20c   :  { %2886 = vmatprep.subr.bf16.mxu1 %v8106_v3  ;;  %v8190_v3 = vld [vmem:[#allocation7 + $0xcc] ss:$16 sps:$4 sm:$0xff]  }
 0x20e   :  { %2715 = vmatpush1.bf16.msra.mxu0 %v8101_v34  ;;  %v8185_v34 = vld [vmem:[#allocation7 + $0xc0] ss:$16 sps:$4 sm:$0xff]  }
 0x20f   :  { %2887 = vmatpush1.bf16.msra.mxu1 %v8104_v4  ;;  %2716 = vmatprep.subr.bf16.mxu0 %v8109_v6  ;;  %v8188_v4 = vld [vmem:[#allocation7 + $0xc8] ss:$16 sps:$4 sm:$0xff]   ;;  %v8193_v6 = vld [vmem:[#allocation7 + $0xe4] ss:$16 sps:$4 sm:$0xff]  }
 0x210   :  { %2888 = vmatprep.subr.bf16.mxu1 %v8112_v7  ;;  %v8196_v7 = vld [vmem:[#allocation7 + $0xec] ss:$16 sps:$4 sm:$0xff]  }
 0x212   :  { %2717 = vmatpush1.bf16.msra.mxu0 %v8107_v8  ;;  %v8191_v8 = vld [vmem:[#allocation7 + $0xe0] ss:$16 sps:$4 sm:$0xff]  }
 0x213   :  { %2889 = vmatpush1.bf16.msra.mxu1 %v8110_v9  ;;  %2718 = vmatprep.subr.bf16.mxu0 %v8115_v12  ;;  %v8194_v9 = vld [vmem:[#allocation7 + $0xe8] ss:$16 sps:$4 sm:$0xff]   ;;  %v8199_v12 = vld [vmem:[#allocation7 + $0x104] ss:$16 sps:$4 sm:$0xff]  }
 0x214   :  { %2890 = vmatprep.subr.bf16.mxu1 %v8118_v13  ;;  %v8202_v13 = vld [vmem:[#allocation7 + $0x10c] ss:$16 sps:$4 sm:$0xff]  }
 0x216   :  { %2719 = vmatpush1.bf16.msra.mxu0 %v8113_v14  ;;  %v8197_v14 = vld [vmem:[#allocation7 + $0x100] ss:$16 sps:$4 sm:$0xff]  }
 0x217   :  { %2891 = vmatpush1.bf16.msra.mxu1 %v8116_v15  ;;  %2720 = vmatprep.subr.bf16.mxu0 %v8121_v16  ;;  %v8200_v15 = vld [vmem:[#allocation7 + $0x108] ss:$16 sps:$4 sm:$0xff]   ;;  %v8205_v16 = vld [vmem:[#allocation7 + $0x124] ss:$16 sps:$4 sm:$0xff]  }
 0x218   :  { %2892 = vmatprep.subr.bf16.mxu1 %v8124_v17  ;;  %v8208_v17 = vld [vmem:[#allocation7 + $0x12c] ss:$16 sps:$4 sm:$0xff]  }
 0x21a   :  { %2721 = vmatpush1.bf16.msra.mxu0 %v8119_v18  ;;  %v8203_v18 = vld [vmem:[#allocation7 + $0x120] ss:$16 sps:$4 sm:$0xff]  }
 0x21b   :  { %2893 = vmatpush1.bf16.msra.mxu1 %v8122_v19  ;;  %2722 = vmatprep.subr.bf16.mxu0 %v8127_v20  ;;  %v8206_v19 = vld [vmem:[#allocation7 + $0x128] ss:$16 sps:$4 sm:$0xff]   ;;  %v8211_v20 = vld [vmem:[#allocation7 + $0x144] ss:$16 sps:$4 sm:$0xff]  }
 0x21c   :  { %2894 = vmatprep.subr.bf16.mxu1 %v8130_v21  ;;  %v8214_v21 = vld [vmem:[#allocation7 + $0x14c] ss:$16 sps:$4 sm:$0xff]  }
 0x21e   :  { %2723 = vmatpush1.bf16.msra.mxu0 %v8125_v22  ;;  %v8209_v22 = vld [vmem:[#allocation7 + $0x140] ss:$16 sps:$4 sm:$0xff]  }
 0x21f   :  { %2895 = vmatpush1.bf16.msra.mxu1 %v8128_v23  ;;  %2724 = vmatprep.subr.bf16.mxu0 %v8133_v24  ;;  %v8212_v23 = vld [vmem:[#allocation7 + $0x148] ss:$16 sps:$4 sm:$0xff]   ;;  %v8217_v24 = vld [vmem:[#allocation7 + $0x164] ss:$16 sps:$4 sm:$0xff]  }
 0x220   :  { %2896 = vmatprep.subr.bf16.mxu1 %v8136_v25  ;;  %v8220_v25 = vld [vmem:[#allocation7 + $0x16c] ss:$16 sps:$4 sm:$0xff]  }
 0x222   :  { %2725 = vmatpush1.bf16.msra.mxu0 %v8131_v27  ;;  %v8215_v27 = vld [vmem:[#allocation7 + $0x160] ss:$16 sps:$4 sm:$0xff]  }
 0x223   :  { %2897 = vmatpush1.bf16.msra.mxu1 %v8134_v28  ;;  %2726 = vmatprep.subr.bf16.mxu0 %v8139_v29  ;;  %v8218_v28 = vld [vmem:[#allocation7 + $0x168] ss:$16 sps:$4 sm:$0xff]   ;;  %v8223_v29 = vld [vmem:[#allocation7 + $0x184] ss:$16 sps:$4 sm:$0xff]  }
 0x224   :  { %2898 = vmatprep.subr.bf16.mxu1 %v8142_v10  ;;  %v8226_v10 = vld [vmem:[#allocation7 + $0x18c] ss:$16 sps:$4 sm:$0xff]  }
 0x226   :  { %2727 = vmatpush1.bf16.msra.mxu0 %v8137_v32  ;;  %v8221_v32 = vld [vmem:[#allocation7 + $0x180] ss:$16 sps:$4 sm:$0xff]  }
 0x227   :  { %2899 = vmatpush1.bf16.msra.mxu1 %v8140_v33  ;;  %2728 = vmatprep.subr.bf16.mxu0 %v8145_v36  ;;  %v8224_v33 = vld [vmem:[#allocation7 + $0x188] ss:$16 sps:$4 sm:$0xff]   ;;  %v8229_v36 = vld [vmem:[#allocation7 + $0x1a4] ss:$16 sps:$4 sm:$0xff]  }
 0x228   :  { %2900 = vmatprep.subr.bf16.mxu1 %v8148_v40  ;;  %v8232_v40 = vld [vmem:[#allocation7 + $0x1ac] ss:$16 sps:$4 sm:$0xff]  }
 0x22a   :  { %2729 = vmatpush1.bf16.msra.mxu0 %v8143_v42  ;;  %v8227_v42 = vld [vmem:[#allocation7 + $0x1a0] ss:$16 sps:$4 sm:$0xff]  }
 0x22b   :  { %2901 = vmatpush1.bf16.msra.mxu1 %v8146_v43  ;;  %3722 = vmatprep.subr.bf16.mxu0 %v8151_v31  ;;  %v8230_v43 = vld [vmem:[#allocation7 + $0x1a8] ss:$16 sps:$4 sm:$0xff]   ;;  %v8235_v31 = vld [vmem:[#allocation7 + $0x1c4] ss:$16 sps:$4 sm:$0xff]  }
 0x22c   :  { %3808 = vmatprep.subr.bf16.mxu1 %v8154_v44  ;;  %v8238_v44 = vld [vmem:[#allocation7 + $0x1cc] ss:$16 sps:$4 sm:$0xff]  }
 0x22d   :  { %2731 = vmatmul.mubr.bf16.vlgmr.msra.gmra.mrb[8].mxu0 %v9307_v5 }
 0x22e   :  { %2903 = vmatmul.mubr.bf16.vlgmr.msra.gmra.mrb[12].mxu1 %v9307_v5  ;;  %3723 = vmatpush1.bf16.msra.mxu0 %v8149_v45  ;;  %v8170_v5 = vld [vmem:[#allocation7 + $0x68] ss:$16 sps:$4 sm:$0xff]   ;;  %v8233_v45 = vld [vmem:[#allocation7 + $0x1c0] ss:$16 sps:$4 sm:$0xff]  }
 0x22f   :  { %3809 = vmatpush1.bf16.msra.mxu1 %v8152_v46  ;;  %3724 = vmatprep.subr.bf16.mxu0 %v8157_v30  ;;  %v8236_v46 = vld [vmem:[#allocation7 + $0x1c8] ss:$16 sps:$4 sm:$0xff]   ;;  %v8241_v30 = vld [vmem:[#allocation7 + $0x1e4] ss:$16 sps:$4 sm:$0xff]  }
 0x230   :  { %3810 = vmatprep.subr.bf16.mxu1 %v8160_v47  ;;  %v8244_v47 = vld [vmem:[#allocation7 + $0x1ec] ss:$16 sps:$4 sm:$0xff]  }
 0x232   :  { %3725 = vmatpush1.bf16.msra.mxu0 %v8155_v48  ;;  %v8239_v48 = vld [vmem:[#allocation7 + $0x1e0] ss:$16 sps:$4 sm:$0xff]  }
 0x233   :  { %3811 = vmatpush1.bf16.msra.mxu1 %v8158_v49  ;;  %3726 = vmatprep.subr.bf16.mxu0 %v8163_v11  ;;  %v8242_v49 = vld [vmem:[#allocation7 + $0x1e8] ss:$16 sps:$4 sm:$0xff]   ;;  %v8247_v11 = vld [vmem:[#allocation7 + $0x204] ss:$16 sps:$4 sm:$0xff]  }
 0x234   :  { %3812 = vmatprep.subr.bf16.mxu1 %v8166_v51  ;;  %v8250_v51 = vld [vmem:[#allocation7 + $0x20c] ss:$16 sps:$4 sm:$0xff]  }
 0x236   :  { %3727 = vmatpush1.bf16.msra.mxu0 %v8161_v52  ;;  %v9324_v52 = vld [vmem:[%s9459_s8 + $0x8] sm:$0xf] }
 0x237   :  { %3813 = vmatpush1.bf16.msra.mxu1 %v8164_v54  ;;  %3728 = vmatprep.subr.bf16.mxu0 %v8169_v55  ;;  %v1272_v54 = vrot.slane %v9324_v52, %v9263_v0  ;;  %v1276_v55 = vrot.slane %v9324_v52, %v9271_v39 }
 0x238   :  { %3814 = vmatprep.subr.bf16.mxu1 %v8172_v56  ;;  %v1284_v56 = vrot.slane %v9324_v52, %v9293_v41 }
 0x23a   :  { %3729 = vmatpush1.bf16.msra.mxu0 %v8167_v57 }
 0x23b   :  { %3815 = vmatpush1.bf16.msra.mxu1 %v8170_v5  ;;  %3730 = vmatprep.subr.bf16.mxu0 %v8175_v58 }
 0x23c   :  { %3816 = vmatprep.subr.bf16.mxu1 %v8178_v38 }
 0x23e   :  { %3731 = vmatpush1.bf16.msra.mxu0 %v8173_v59 }
 0x23f   :  { %3817 = vmatpush1.bf16.msra.mxu1 %v8176_v60  ;;  %3732 = vmatprep.subr.bf16.mxu0 %v8181_v61 }
 0x240   :  { %3818 = vmatprep.subr.bf16.mxu1 %v8184_v62 }
 0x242   :  { %3733 = vmatpush1.bf16.msra.mxu0 %v8179_v63 }
 0x243   :  { %3819 = vmatpush1.bf16.msra.mxu1 %v8182_v1  ;;  %3734 = vmatprep.subr.bf16.mxu0 %v8187_v2 }
 0x244   :  { %3820 = vmatprep.subr.bf16.mxu1 %v8190_v3 }
 0x246   :  { %3735 = vmatpush1.bf16.msra.mxu0 %v8185_v34 }
 0x247   :  { %3821 = vmatpush1.bf16.msra.mxu1 %v8188_v4  ;;  %3736 = vmatprep.subr.bf16.mxu0 %v8193_v6 }
 0x248   :  { %3822 = vmatprep.subr.bf16.mxu1 %v8196_v7 }
 0x24a   :  { %3737 = vmatpush1.bf16.msra.mxu0 %v8191_v8 }
 0x24b   :  { %3823 = vmatpush1.bf16.msra.mxu1 %v8194_v9  ;;  %3738 = vmatprep.subr.bf16.mxu0 %v8199_v12 }
 0x24c   :  { %3824 = vmatprep.subr.bf16.mxu1 %v8202_v13 }
 0x24e   :  { %3739 = vmatpush1.bf16.msra.mxu0 %v8197_v14 }
 0x24f   :  { %3825 = vmatpush1.bf16.msra.mxu1 %v8200_v15  ;;  %3740 = vmatprep.subr.bf16.mxu0 %v8205_v16 }
 0x250   :  { %3826 = vmatprep.subr.bf16.mxu1 %v8208_v17 }
 0x252   :  { %3741 = vmatpush1.bf16.msra.mxu0 %v8203_v18 }
 0x253   :  { %3827 = vmatpush1.bf16.msra.mxu1 %v8206_v19  ;;  %3742 = vmatprep.subr.bf16.mxu0 %v8211_v20  ;;  %v8245_v20 = vld [vmem:[#allocation7 + $0x200] ss:$16 sps:$4 sm:$0xff]  }
 0x254   :  { %3828 = vmatprep.subr.bf16.mxu1 %v8214_v21  ;;  %v8248_v21 = vld [vmem:[#allocation7 + $0x208] ss:$16 sps:$4 sm:$0xff]  }
 0x256   :  { %3743 = vmatpush1.bf16.msra.mxu0 %v8209_v22 }
 0x257   :  { %3829 = vmatpush1.bf16.msra.mxu1 %v8212_v23  ;;  %3744 = vmatprep.subr.bf16.mxu0 %v8217_v24  ;;  %v8253_v24 = vld [vmem:[#allocation7 + $0x224] ss:$16 sps:$4 sm:$0xff]  }
 0x258   :  { %3830 = vmatprep.subr.bf16.mxu1 %v8220_v25  ;;  %v8256_v25 = vld [vmem:[#allocation7 + $0x22c] ss:$16 sps:$4 sm:$0xff]  }
 0x25a   :  { %3745 = vmatpush1.bf16.msra.mxu0 %v8215_v27 }
 0x25b   :  { %3831 = vmatpush1.bf16.msra.mxu1 %v8218_v28  ;;  %3746 = vmatprep.subr.bf16.mxu0 %v8223_v29  ;;  %v8251_v28 = vld [vmem:[#allocation7 + $0x220] ss:$16 sps:$4 sm:$0xff]   ;;  %v8254_v29 = vld [vmem:[#allocation7 + $0x228] ss:$16 sps:$4 sm:$0xff]  }
 0x25c   :  { %3832 = vmatprep.subr.bf16.mxu1 %v8226_v10  ;;  %v8259_v10 = vld [vmem:[#allocation7 + $0x244] ss:$16 sps:$4 sm:$0xff]  }
 0x25e   :  { %3747 = vmatpush1.bf16.msra.mxu0 %v8221_v32  ;;  %v8262_v32 = vld [vmem:[#allocation7 + $0x24c] ss:$16 sps:$4 sm:$0xff]  }
 0x25f   :  { %3833 = vmatpush1.bf16.msra.mxu1 %v8224_v33  ;;  %3748 = vmatprep.subr.bf16.mxu0 %v8229_v36  ;;  %v8257_v33 = vld [vmem:[#allocation7 + $0x240] ss:$16 sps:$4 sm:$0xff]   ;;  %v8260_v36 = vld [vmem:[#allocation7 + $0x248] ss:$16 sps:$4 sm:$0xff]  }
 0x260   :  { %3834 = vmatprep.subr.bf16.mxu1 %v8232_v40  ;;  %v8265_v40 = vld [vmem:[#allocation7 + $0x264] ss:$16 sps:$4 sm:$0xff]  }
 0x262   :  { %3749 = vmatpush1.bf16.msra.mxu0 %v8227_v42  ;;  %v8268_v42 = vld [vmem:[#allocation7 + $0x26c] ss:$16 sps:$4 sm:$0xff]  }
 0x263   :  { %3835 = vmatpush1.bf16.msra.mxu1 %v8230_v43  ;;  %3750 = vmatprep.subr.bf16.mxu0 %v8235_v31  ;;  %v8263_v43 = vld [vmem:[#allocation7 + $0x260] ss:$16 sps:$4 sm:$0xff]   ;;  %v8266_v31 = vld [vmem:[#allocation7 + $0x268] ss:$16 sps:$4 sm:$0xff]  }
 0x264   :  { %3836 = vmatprep.subr.bf16.mxu1 %v8238_v44  ;;  %v8271_v44 = vld [vmem:[#allocation7 + $0x284] ss:$16 sps:$4 sm:$0xff]  }
 0x266   :  { %3751 = vmatpush1.bf16.msra.mxu0 %v8233_v45  ;;  %v8274_v45 = vld [vmem:[#allocation7 + $0x28c] ss:$16 sps:$4 sm:$0xff]  }
 0x267   :  { %3837 = vmatpush1.bf16.msra.mxu1 %v8236_v46  ;;  %3752 = vmatprep.subr.bf16.mxu0 %v8241_v30  ;;  %v8269_v46 = vld [vmem:[#allocation7 + $0x280] ss:$16 sps:$4 sm:$0xff]   ;;  %v8272_v30 = vld [vmem:[#allocation7 + $0x288] ss:$16 sps:$4 sm:$0xff]  }
 0x268   :  { %3838 = vmatprep.subr.bf16.mxu1 %v8244_v47  ;;  %v8277_v47 = vld [vmem:[#allocation7 + $0x2a4] ss:$16 sps:$4 sm:$0xff]  }
 0x26a   :  { %3753 = vmatpush1.bf16.msra.mxu0 %v8239_v48  ;;  %v8280_v48 = vld [vmem:[#allocation7 + $0x2ac] ss:$16 sps:$4 sm:$0xff]  }
 0x26b   :  { %3839 = vmatpush1.bf16.msra.mxu1 %v8242_v49  ;;  %3765 = vmatprep.subr.bf16.mxu0 %v8247_v11  ;;  %v8275_v49 = vld [vmem:[#allocation7 + $0x2a0] ss:$16 sps:$4 sm:$0xff]   ;;  %v8278_v11 = vld [vmem:[#allocation7 + $0x2a8] ss:$16 sps:$4 sm:$0xff]  }
 0x26c   :  { %3851 = vmatprep.subr.bf16.mxu1 %v8250_v51  ;;  %v8283_v51 = vld [vmem:[#allocation7 + $0x2c4] ss:$16 sps:$4 sm:$0xff]  }
 0x300   :  { %v2732_v57 = vpop.f32.mrb[8].mxu0 }
 0x301   :  { %v7644_v5 = vadd.f32 %v2732_v57, %v1272_v54  ;;  %v9332_v58 = vpop.f32.mrb[12].mxu1  ;;  %v2734_v38 = vpop.f32.mrb[9].mxu0  ;;  %v8289_v57 = vld [vmem:[#allocation7 + $0x2e4] ss:$16 sps:$4 sm:$0xff]  }
 0x302   :  { %v7645_v59 = vadd.f32 %v2734_v38, %v1276_v55  ;;  %v2906_v60 = vpop.f32.mrb[13].mxu1  ;;  %v2736_v61 = vpop.f32.mrb[10].mxu0  ;;  %v8287_v38 = vld [vmem:[#allocation7 + $0x2e0] ss:$16 sps:$4 sm:$0xff]  }
 0x303   :  { %v7649_v62 = vadd.f32 %v2906_v60, %v1284_v56  ;;  %v7646_v63 = vadd.f32 %v2736_v61, %v1272_v54  ;;  %v9334_v1 = vpop.f32.mrb[14].mxu1  ;;  %v2738_v2 = vpop.f32.mrb[11].mxu0  ;;  %v2913_v6 = vmul.f32 0.01, %v7644_v5  ;;  %v8286_v54 = vld [vmem:[#allocation7 + $0x2cc] ss:$16 sps:$4 sm:$0xff]  }
 0x304   :  { %v2914_v3 = vmul.f32 0.01, %v7645_v59  ;;  %v7647_v34 = vadd.f32 %v2738_v2, %v1276_v55  ;;  %v2910_v4 = vpop.f32.mrb[15].mxu1  ;;  %v8281_v55 = vld [vmem:[#allocation7 + $0x2c0] ss:$16 sps:$4 sm:$0xff]  }
 0x305   :  { %v2917_v7 = vmul.f32 0.01, %v7646_v63  ;;  %v7651_v8 = vadd.f32 %v2910_v4, %v1284_v56  ;;  %v2916_v12 = vmul.f32 0.01, %v7649_v62  ;;  %v9342_v17 = vmax.f32 %v7644_v5, %v2913_v6  ;;  %v8284_v56 = vld [vmem:[#allocation7 + $0x2c8] ss:$16 sps:$4 sm:$0xff]  }
 0x306   :  { %v2918_v9 = vmul.f32 0.01, %v7647_v34  ;;  %v9338_v15 = vmax.f32 %v7645_v59, %v2914_v3  ;;  %v8292_v5 = vld [vmem:[#allocation7 + $0x2ec] ss:$16 sps:$4 sm:$0xff]   ;;  %v8290_v59 = vld [vmem:[#allocation7 + $0x2e8] ss:$16 sps:$4 sm:$0xff]  }
 0x307   :  { %v9336_v13 = vmax.f32 %v7646_v63, %v2917_v7  ;;  %v2920_v14 = vmul.f32 0.01, %v7651_v8  ;;  %v9348_v22 = vmax.f32 %v7649_v62, %v2916_v12  ;;  %v8295_v60 = vld [vmem:[#allocation7 + $0x304] ss:$16 sps:$4 sm:$0xff]   ;;  %v8298_v61 = vld [vmem:[#allocation7 + $0x30c] ss:$16 sps:$4 sm:$0xff]  }
 0x308   :  { %v9340_v16 = vmax.f32 %v7647_v34, %v2918_v9  ;;  %v8293_v62 = vld [vmem:[#allocation7 + $0x300] ss:$16 sps:$4 sm:$0xff]   ;;  %v8296_v63 = vld [vmem:[#allocation7 + $0x308] ss:$16 sps:$4 sm:$0xff]   ;;  %v8301_v2 = vld [vmem:[#allocation7 + $0x324] ss:$16 sps:$4 sm:$0xff]  }
 0x309   :  { %v9344_v18 = vmax.f32 %v7651_v8, %v2920_v14  ;;  %v2929_v23 = vpack.c.bf16 %v9336_v13, %v9342_v17  ;;  %v8304_v3 = vld [vmem:[#allocation7 + $0x32c] ss:$16 sps:$4 sm:$0xff]   ;;  %v8299_v34 = vld [vmem:[#allocation7 + $0x320] ss:$16 sps:$4 sm:$0xff]   ;;  %v8302_v4 = vld [vmem:[#allocation7 + $0x328] ss:$16 sps:$4 sm:$0xff]  }
 0x30a   :  { %v2930_v19 = vpack.c.bf16 %v9340_v16, %v9338_v15  ;;  %v8307_v6 = vld [vmem:[#allocation7 + $0x344] ss:$16 sps:$4 sm:$0xff]   ;;  %v8310_v7 = vld [vmem:[#allocation7 + $0x34c] ss:$16 sps:$4 sm:$0xff]   ;;  %v8305_v8 = vld [vmem:[#allocation7 + $0x340] ss:$16 sps:$4 sm:$0xff]  }
 0x30b   :  { %v2932_v27 = vpack.c.bf16 %v9344_v18, %v9348_v22  ;;  %v8308_v9 = vld [vmem:[#allocation7 + $0x348] ss:$16 sps:$4 sm:$0xff]   ;;  %v8313_v12 = vld [vmem:[#allocation7 + $0x364] ss:$16 sps:$4 sm:$0xff]   ;;  %v8316_v14 = vld [vmem:[#allocation7 + $0x36c] ss:$16 sps:$4 sm:$0xff]  }
 0x30c   :  { %3754 = vmatprep.mubr.bf16.mxu0 %v2930_v19  ;;  %3840 = vmatprep.mubr.bf16.mxu1 %v2930_v19  ;;  %v8311_v19 = vld [vmem:[#allocation7 + $0x360] ss:$16 sps:$4 sm:$0xff]  }
 0x30d   :  { %3755 = vmatmul.mubr.bf16.vlgmr.msra.gmra.mrb[12].mxu0 %v2929_v23  ;;  %3841 = vmatmul.mubr.bf16.vlgmr.msra.gmra.mrb[16].mxu1 %v2929_v23  ;;  %v8322_v23 = vld [vmem:[#allocation7 + $0x38c] ss:$16 sps:$4 sm:$0xff]  }
 0x30e   :  { %3766 = vmatpush1.bf16.msra.mxu0 %v8245_v20  ;;  %3852 = vmatpush1.bf16.msra.mxu1 %v8248_v21  ;;  %v8314_v20 = vld [vmem:[#allocation7 + $0x368] ss:$16 sps:$4 sm:$0xff]   ;;  %v8319_v21 = vld [vmem:[#allocation7 + $0x384] ss:$16 sps:$4 sm:$0xff]  }
 0x30f   :  { %3797 = vmatprep.mubr.bf16.mxu0 %v2932_v27  ;;  %3883 = vmatprep.mubr.bf16.mxu1 %v2932_v27  ;;  %v8325_v27 = vld [vmem:[#allocation7 + $0x3a4] ss:$16 sps:$4 sm:$0xff]  }
 0x310   :  { %3767 = vmatprep.subr.bf16.mxu0 %v8253_v24  ;;  %3853 = vmatprep.subr.bf16.mxu1 %v8256_v25  ;;  %v8317_v24 = vld [vmem:[#allocation7 + $0x380] ss:$16 sps:$4 sm:$0xff]   ;;  %v8320_v25 = vld [vmem:[#allocation7 + $0x388] ss:$16 sps:$4 sm:$0xff]  }
 0x312   :  { %3768 = vmatpush1.bf16.msra.mxu0 %v8251_v28  ;;  %3854 = vmatpush1.bf16.msra.mxu1 %v8254_v29  ;;  %v8328_v28 = vld [vmem:[#allocation7 + $0x3ac] ss:$16 sps:$4 sm:$0xff]   ;;  %v1280_v29 = vrot.slane %v9324_v52, %v9290_v35  ;;  %v8337_v52 = vld [vmem:[#allocation7 + $0x3e4] ss:$16 sps:$4 sm:$0xff]  }
 0x313   :  { %3769 = vmatprep.subr.bf16.mxu0 %v8259_v10  ;;  %3855 = vmatprep.subr.bf16.mxu1 %v8262_v32  ;;  %v8323_v10 = vld [vmem:[#allocation7 + $0x3a0] ss:$16 sps:$4 sm:$0xff]   ;;  %v8326_v32 = vld [vmem:[#allocation7 + $0x3a8] ss:$16 sps:$4 sm:$0xff]  }
 0x316   :  { %3770 = vmatpush1.bf16.msra.mxu0 %v8257_v33  ;;  %3856 = vmatpush1.bf16.msra.mxu1 %v8260_v36  ;;  %v7650_v33 = vadd.f32 %v9334_v1, %v1280_v29  ;;  %v8331_v36 = vld [vmem:[#allocation7 + $0x3c4] ss:$16 sps:$4 sm:$0xff]   ;;  %v8338_v1 = vld [vmem:[#allocation7 + $0x3e8] ss:$16 sps:$4 sm:$0xff]  }
 0x317   :  { %3771 = vmatprep.subr.bf16.mxu0 %v8265_v40  ;;  %3857 = vmatprep.subr.bf16.mxu1 %v8268_v42  ;;  %v8334_v40 = vld [vmem:[#allocation7 + $0x3cc] ss:$16 sps:$4 sm:$0xff]   ;;  %v7648_v42 = vadd.f32 %v9332_v58, %v1280_v29  ;;  %v8391_v29 = vld [vmem:[#allocation8 + $0x104] ss:$16 sps:$4 sm:$0xff]  }
 0x318   :  { %v8346_v58 = vld [vmem:[#allocation8 + $0xc] ss:$16 sps:$4 sm:$0xff]  }
 0x31a   :  { %3772 = vmatpush1.bf16.msra.mxu0 %v8263_v43  ;;  %3858 = vmatpush1.bf16.msra.mxu1 %v8266_v31  ;;  %v8329_v43 = vld [vmem:[#allocation7 + $0x3c0] ss:$16 sps:$4 sm:$0xff]   ;;  %v8332_v31 = vld [vmem:[#allocation7 + $0x3c8] ss:$16 sps:$4 sm:$0xff]  }
 0x31b   :  { %3773 = vmatprep.subr.bf16.mxu0 %v8271_v44  ;;  %3859 = vmatprep.subr.bf16.mxu1 %v8274_v45  ;;  %v2919_v44 = vmul.f32 0.01, %v7650_v33  ;;  %v8340_v45 = vld [vmem:[#allocation7 + $0x3ec] ss:$16 sps:$4 sm:$0xff]  }
 0x31e   :  { %3774 = vmatpush1.bf16.msra.mxu0 %v8269_v46  ;;  %3860 = vmatpush1.bf16.msra.mxu1 %v8272_v30  ;;  %v2915_v46 = vmul.f32 0.01, %v7648_v42  ;;  %v8335_v30 = vld [vmem:[#allocation7 + $0x3e0] ss:$16 sps:$4 sm:$0xff]  }
 0x31f   :  { %3775 = vmatprep.subr.bf16.mxu0 %v8277_v47  ;;  %3861 = vmatprep.subr.bf16.mxu1 %v8280_v48  ;;  %v9358_v47 = vmax.f32 %v7650_v33, %v2919_v44  ;;  %v8343_v48 = vld [vmem:[#allocation8 + $0x4] ss:$16 sps:$4 sm:$0xff]   ;;  %v8392_v33 = vld [vmem:[#allocation8 + $0x108] ss:$16 sps:$4 sm:$0xff]   ;;  %v8406_v44 = vld [vmem:[#allocation8 + $0x14c] ss:$16 sps:$4 sm:$0xff]  }
 0x322   :  { %3776 = vmatpush1.bf16.msra.mxu0 %v8275_v49  ;;  %3862 = vmatpush1.bf16.msra.mxu1 %v8278_v11  ;;  %v9360_v49 = vmax.f32 %v7648_v42, %v2915_v46  ;;  %v8341_v11 = vld [vmem:[#allocation8] ss:$16 sps:$4 sm:$0xff]   ;;  %v8409_v46 = vld [vmem:[#allocation8 + $0x164] ss:$16 sps:$4 sm:$0xff]  }
 0x323   :  { %3777 = vmatprep.subr.bf16.mxu0 %v8283_v51  ;;  %3863 = vmatprep.subr.bf16.mxu1 %v8286_v54  ;;  %v8344_v51 = vld [vmem:[#allocation8 + $0x8] ss:$16 sps:$4 sm:$0xff]   ;;  %v8395_v42 = vld [vmem:[#allocation8 + $0x120] ss:$16 sps:$4 sm:$0xff]  }
 0x324   :  { %v2931_v54 = vpack.c.bf16 %v9358_v47, %v9360_v49 }
 0x326   :  { %3778 = vmatpush1.bf16.msra.mxu0 %v8281_v55  ;;  %3864 = vmatpush1.bf16.msra.mxu1 %v8284_v56  ;;  %v8349_v55 = vld [vmem:[#allocation8 + $0x24] ss:$16 sps:$4 sm:$0xff]   ;;  %v8352_v56 = vld [vmem:[#allocation8 + $0x2c] ss:$16 sps:$4 sm:$0xff]  }
 0x327   :  { %3779 = vmatprep.subr.bf16.mxu0 %v8289_v57  ;;  %3865 = vmatprep.subr.bf16.mxu1 %v8292_v5  ;;  %v8347_v57 = vld [vmem:[#allocation8 + $0x20] ss:$16 sps:$4 sm:$0xff]   ;;  %v8350_v5 = vld [vmem:[#allocation8 + $0x28] ss:$16 sps:$4 sm:$0xff]  }
 0x32a   :  { %3780 = vmatpush1.bf16.msra.mxu0 %v8287_v38  ;;  %3866 = vmatpush1.bf16.msra.mxu1 %v8290_v59  ;;  %v8355_v38 = vld [vmem:[#allocation8 + $0x44] ss:$16 sps:$4 sm:$0xff]   ;;  %v8358_v59 = vld [vmem:[#allocation8 + $0x4c] ss:$16 sps:$4 sm:$0xff]  }
 0x32b   :  { %3781 = vmatprep.subr.bf16.mxu0 %v8295_v60  ;;  %3867 = vmatprep.subr.bf16.mxu1 %v8298_v61  ;;  %v8353_v60 = vld [vmem:[#allocation8 + $0x40] ss:$16 sps:$4 sm:$0xff]   ;;  %v8356_v61 = vld [vmem:[#allocation8 + $0x48] ss:$16 sps:$4 sm:$0xff]  }
 0x32e   :  { %3782 = vmatpush1.bf16.msra.mxu0 %v8293_v62  ;;  %3868 = vmatpush1.bf16.msra.mxu1 %v8296_v63  ;;  %v8361_v62 = vld [vmem:[#allocation8 + $0x64] ss:$16 sps:$4 sm:$0xff]   ;;  %v8364_v63 = vld [vmem:[#allocation8 + $0x6c] ss:$16 sps:$4 sm:$0xff]  }
 0x32f   :  { %3783 = vmatprep.subr.bf16.mxu0 %v8301_v2  ;;  %3869 = vmatprep.subr.bf16.mxu1 %v8304_v3  ;;  %v8359_v2 = vld [vmem:[#allocation8 + $0x60] ss:$16 sps:$4 sm:$0xff]   ;;  %v8362_v3 = vld [vmem:[#allocation8 + $0x68] ss:$16 sps:$4 sm:$0xff]  }
 0x332   :  { %3784 = vmatpush1.bf16.msra.mxu0 %v8299_v34  ;;  %3870 = vmatpush1.bf16.msra.mxu1 %v8302_v4  ;;  %v8367_v34 = vld [vmem:[#allocation8 + $0x84] ss:$16 sps:$4 sm:$0xff]   ;;  %v8370_v4 = vld [vmem:[#allocation8 + $0x8c] ss:$16 sps:$4 sm:$0xff]  }
 0x333   :  { %3785 = vmatprep.subr.bf16.mxu0 %v8307_v6  ;;  %3871 = vmatprep.subr.bf16.mxu1 %v8310_v7  ;;  %v8365_v6 = vld [vmem:[#allocation8 + $0x80] ss:$16 sps:$4 sm:$0xff]   ;;  %v8368_v7 = vld [vmem:[#allocation8 + $0x88] ss:$16 sps:$4 sm:$0xff]  }
 0x336   :  { %3786 = vmatpush1.bf16.msra.mxu0 %v8305_v8  ;;  %3872 = vmatpush1.bf16.msra.mxu1 %v8308_v9  ;;  %v8373_v8 = vld [vmem:[#allocation8 + $0xa4] ss:$16 sps:$4 sm:$0xff]   ;;  %v8376_v9 = vld [vmem:[#allocation8 + $0xac] ss:$16 sps:$4 sm:$0xff]  }
 0x337   :  { %3787 = vmatprep.subr.bf16.mxu0 %v8313_v12  ;;  %3873 = vmatprep.subr.bf16.mxu1 %v8316_v14  ;;  %v8371_v12 = vld [vmem:[#allocation8 + $0xa0] ss:$16 sps:$4 sm:$0xff]   ;;  %v8374_v14 = vld [vmem:[#allocation8 + $0xa8] ss:$16 sps:$4 sm:$0xff]  }
 0x33a   :  { %3788 = vmatpush1.bf16.msra.mxu0 %v8311_v19  ;;  %3874 = vmatpush1.bf16.msra.mxu1 %v8314_v20  ;;  %v8379_v19 = vld [vmem:[#allocation8 + $0xc4] ss:$16 sps:$4 sm:$0xff]   ;;  %v8382_v20 = vld [vmem:[#allocation8 + $0xcc] ss:$16 sps:$4 sm:$0xff]  }
 0x33b   :  { %3789 = vmatprep.subr.bf16.mxu0 %v8319_v21  ;;  %3875 = vmatprep.subr.bf16.mxu1 %v8322_v23  ;;  %v8377_v21 = vld [vmem:[#allocation8 + $0xc0] ss:$16 sps:$4 sm:$0xff]   ;;  %v8380_v23 = vld [vmem:[#allocation8 + $0xc8] ss:$16 sps:$4 sm:$0xff]  }
 0x33e   :  { %3790 = vmatpush1.bf16.msra.mxu0 %v8317_v24  ;;  %3876 = vmatpush1.bf16.msra.mxu1 %v8320_v25  ;;  %v8385_v24 = vld [vmem:[#allocation8 + $0xe4] ss:$16 sps:$4 sm:$0xff]   ;;  %v8388_v25 = vld [vmem:[#allocation8 + $0xec] ss:$16 sps:$4 sm:$0xff]  }
 0x33f   :  { %3791 = vmatprep.subr.bf16.mxu0 %v8325_v27  ;;  %3877 = vmatprep.subr.bf16.mxu1 %v8328_v28  ;;  %v8383_v27 = vld [vmem:[#allocation8 + $0xe0] ss:$16 sps:$4 sm:$0xff]   ;;  %v8386_v28 = vld [vmem:[#allocation8 + $0xe8] ss:$16 sps:$4 sm:$0xff]  }
 0x342   :  { %3792 = vmatpush1.bf16.msra.mxu0 %v8323_v10  ;;  %3878 = vmatpush1.bf16.msra.mxu1 %v8326_v32  ;;  %v8394_v10 = vld [vmem:[#allocation8 + $0x10c] ss:$16 sps:$4 sm:$0xff]   ;;  %v8389_v32 = vld [vmem:[#allocation8 + $0x100] ss:$16 sps:$4 sm:$0xff]  }
 0x343   :  { %3793 = vmatprep.subr.bf16.mxu0 %v8331_v36  ;;  %3879 = vmatprep.subr.bf16.mxu1 %v8334_v40  ;;  %v8397_v36 = vld [vmem:[#allocation8 + $0x124] ss:$16 sps:$4 sm:$0xff]   ;;  %v8400_v40 = vld [vmem:[#allocation8 + $0x12c] ss:$16 sps:$4 sm:$0xff]  }
 0x346   :  { %3794 = vmatpush1.bf16.msra.mxu0 %v8329_v43  ;;  %3880 = vmatpush1.bf16.msra.mxu1 %v8332_v31  ;;  %v8398_v43 = vld [vmem:[#allocation8 + $0x128] ss:$16 sps:$4 sm:$0xff]   ;;  %v8403_v31 = vld [vmem:[#allocation8 + $0x144] ss:$16 sps:$4 sm:$0xff]  }
 0x347   :  { %3795 = vmatprep.subr.bf16.mxu0 %v8337_v52  ;;  %3881 = vmatprep.subr.bf16.mxu1 %v8340_v45  ;;  %v8401_v52 = vld [vmem:[#allocation8 + $0x140] ss:$16 sps:$4 sm:$0xff]   ;;  %v8404_v45 = vld [vmem:[#allocation8 + $0x148] ss:$16 sps:$4 sm:$0xff]  }
 0x34a   :  { %3796 = vmatpush1.bf16.msra.mxu0 %v8335_v30  ;;  %3882 = vmatpush1.bf16.msra.mxu1 %v8338_v1  ;;  %v8412_v30 = vld [vmem:[#allocation8 + $0x16c] ss:$16 sps:$4 sm:$0xff]   ;;  %v8407_v1 = vld [vmem:[#allocation8 + $0x160] ss:$16 sps:$4 sm:$0xff]  }
 0x34b   :  { %4695 = vmatprep.subr.bf16.mxu0 %v8343_v48  ;;  %4781 = vmatprep.subr.bf16.mxu1 %v8346_v58  ;;  %v8410_v48 = vld [vmem:[#allocation8 + $0x168] ss:$16 sps:$4 sm:$0xff]   ;;  %v8415_v58 = vld [vmem:[#allocation8 + $0x184] ss:$16 sps:$4 sm:$0xff]  }
 0x34d   :  { %3798 = vmatmul.mubr.bf16.vlgmr.msra.gmra.mrb[12].mxu0 %v2931_v54  ;;  %3884 = vmatmul.mubr.bf16.vlgmr.msra.gmra.mrb[16].mxu1 %v2931_v54  ;;  %v8416_v54 = vld [vmem:[#allocation8 + $0x188] ss:$16 sps:$4 sm:$0xff]  }
 0x34e   :  { %4696 = vmatpush1.bf16.msra.mxu0 %v8341_v11  ;;  %4782 = vmatpush1.bf16.msra.mxu1 %v8344_v51  ;;  %v8418_v11 = vld [vmem:[#allocation8 + $0x18c] ss:$16 sps:$4 sm:$0xff]   ;;  %v8413_v51 = vld [vmem:[#allocation8 + $0x180] ss:$16 sps:$4 sm:$0xff]  }
 0x34f   :  { %4697 = vmatprep.subr.bf16.mxu0 %v8349_v55  ;;  %4783 = vmatprep.subr.bf16.mxu1 %v8352_v56  ;;  %v8421_v55 = vld [vmem:[#allocation8 + $0x1a4] ss:$16 sps:$4 sm:$0xff]   ;;  %v8424_v56 = vld [vmem:[#allocation8 + $0x1ac] ss:$16 sps:$4 sm:$0xff]  }
 0x352   :  { %4698 = vmatpush1.bf16.msra.mxu0 %v8347_v57  ;;  %4784 = vmatpush1.bf16.msra.mxu1 %v8350_v5  ;;  %v8419_v57 = vld [vmem:[#allocation8 + $0x1a0] ss:$16 sps:$4 sm:$0xff]   ;;  %v8422_v5 = vld [vmem:[#allocation8 + $0x1a8] ss:$16 sps:$4 sm:$0xff]  }
 0x353   :  { %4699 = vmatprep.subr.bf16.mxu0 %v8355_v38  ;;  %4785 = vmatprep.subr.bf16.mxu1 %v8358_v59  ;;  %v8427_v38 = vld [vmem:[#allocation8 + $0x1c4] ss:$16 sps:$4 sm:$0xff]   ;;  %v8430_v59 = vld [vmem:[#allocation8 + $0x1cc] ss:$16 sps:$4 sm:$0xff]  }
 0x356   :  { %4700 = vmatpush1.bf16.msra.mxu0 %v8353_v60  ;;  %4786 = vmatpush1.bf16.msra.mxu1 %v8356_v61  ;;  %v8425_v60 = vld [vmem:[#allocation8 + $0x1c0] ss:$16 sps:$4 sm:$0xff]   ;;  %v8428_v61 = vld [vmem:[#allocation8 + $0x1c8] ss:$16 sps:$4 sm:$0xff]  }
 0x357   :  { %4701 = vmatprep.subr.bf16.mxu0 %v8361_v62  ;;  %4787 = vmatprep.subr.bf16.mxu1 %v8364_v63  ;;  %v8433_v62 = vld [vmem:[#allocation8 + $0x1e4] ss:$16 sps:$4 sm:$0xff]   ;;  %v8436_v63 = vld [vmem:[#allocation8 + $0x1ec] ss:$16 sps:$4 sm:$0xff]  }
 0x35a   :  { %4702 = vmatpush1.bf16.msra.mxu0 %v8359_v2  ;;  %4788 = vmatpush1.bf16.msra.mxu1 %v8362_v3  ;;  %v8431_v2 = vld [vmem:[#allocation8 + $0x1e0] ss:$16 sps:$4 sm:$0xff]   ;;  %v8434_v3 = vld [vmem:[#allocation8 + $0x1e8] ss:$16 sps:$4 sm:$0xff]  }
 0x35b   :  { %4703 = vmatprep.subr.bf16.mxu0 %v8367_v34  ;;  %4789 = vmatprep.subr.bf16.mxu1 %v8370_v4  ;;  %v8439_v34 = vld [vmem:[#allocation8 + $0x204] ss:$16 sps:$4 sm:$0xff]   ;;  %v8442_v4 = vld [vmem:[#allocation8 + $0x20c] ss:$16 sps:$4 sm:$0xff]  }
 0x35e   :  { %4704 = vmatpush1.bf16.msra.mxu0 %v8365_v6  ;;  %4790 = vmatpush1.bf16.msra.mxu1 %v8368_v7  ;;  %v104_v6 = vld [vmem:[%s9459_s8 + $0xc] sm:$0xf] }
 0x35f   :  { %4705 = vmatprep.subr.bf16.mxu0 %v8373_v8  ;;  %4791 = vmatprep.subr.bf16.mxu1 %v8376_v9  ;;  %v3065_v7 = vrot.slane %v104_v6, %v9263_v0  ;;  %v3073_v8 = vrot.slane %v104_v6, %v9290_v35  ;;  %v3069_v9 = vrot.slane %v104_v6, %v9271_v39 }
 0x362   :  { %4706 = vmatpush1.bf16.msra.mxu0 %v8371_v12  ;;  %4792 = vmatpush1.bf16.msra.mxu1 %v8374_v14  ;;  %v3077_v12 = vrot.slane %v104_v6, %v9293_v41  ;;  %v8466_v6 = vld [vmem:[#allocation8 + $0x28c] ss:$16 sps:$4 sm:$0xff]  }
 0x363   :  { %4707 = vmatprep.subr.bf16.mxu0 %v8379_v19  ;;  %4793 = vmatprep.subr.bf16.mxu1 %v8382_v20 }
 0x366   :  { %4708 = vmatpush1.bf16.msra.mxu0 %v8377_v21  ;;  %4794 = vmatpush1.bf16.msra.mxu1 %v8380_v23 }
 0x367   :  { %4709 = vmatprep.subr.bf16.mxu0 %v8385_v24  ;;  %4795 = vmatprep.subr.bf16.mxu1 %v8388_v25 }
 0x36a   :  { %4710 = vmatpush1.bf16.msra.mxu0 %v8383_v27  ;;  %4796 = vmatpush1.bf16.msra.mxu1 %v8386_v28 }
 0x36b   :  { %4711 = vmatprep.subr.bf16.mxu0 %v8391_v29  ;;  %4797 = vmatprep.subr.bf16.mxu1 %v8394_v10 }
 0x36e   :  { %4712 = vmatpush1.bf16.msra.mxu0 %v8389_v32  ;;  %4798 = vmatpush1.bf16.msra.mxu1 %v8392_v33 }
 0x36f   :  { %4713 = vmatprep.subr.bf16.mxu0 %v8397_v36  ;;  %4799 = vmatprep.subr.bf16.mxu1 %v8400_v40 }
 0x372   :  { %4714 = vmatpush1.bf16.msra.mxu0 %v8395_v42  ;;  %4800 = vmatpush1.bf16.msra.mxu1 %v8398_v43 }
 0x373   :  { %4715 = vmatprep.subr.bf16.mxu0 %v8403_v31  ;;  %4801 = vmatprep.subr.bf16.mxu1 %v8406_v44 }
 0x376   :  { %4716 = vmatpush1.bf16.msra.mxu0 %v8401_v52  ;;  %4802 = vmatpush1.bf16.msra.mxu1 %v8404_v45 }
 0x377   :  { %4717 = vmatprep.subr.bf16.mxu0 %v8409_v46  ;;  %4803 = vmatprep.subr.bf16.mxu1 %v8412_v30 }
 0x37a   :  { %4718 = vmatpush1.bf16.msra.mxu0 %v8407_v1  ;;  %4804 = vmatpush1.bf16.msra.mxu1 %v8410_v48 }
 0x37b   :  { %4719 = vmatprep.subr.bf16.mxu0 %v8415_v58  ;;  %4805 = vmatprep.subr.bf16.mxu1 %v8418_v11 }
 0x37e   :  { %4720 = vmatpush1.bf16.msra.mxu0 %v8413_v51  ;;  %4806 = vmatpush1.bf16.msra.mxu1 %v8416_v54  ;;  %v8437_v54 = vld [vmem:[#allocation8 + $0x200] ss:$16 sps:$4 sm:$0xff]  }
 0x37f   :  { %4721 = vmatprep.subr.bf16.mxu0 %v8421_v55  ;;  %4807 = vmatprep.subr.bf16.mxu1 %v8424_v56  ;;  %v8440_v55 = vld [vmem:[#allocation8 + $0x208] ss:$16 sps:$4 sm:$0xff]   ;;  %v8445_v56 = vld [vmem:[#allocation8 + $0x224] ss:$16 sps:$4 sm:$0xff]  }
 0x382   :  { %4722 = vmatpush1.bf16.msra.mxu0 %v8419_v57  ;;  %4808 = vmatpush1.bf16.msra.mxu1 %v8422_v5  ;;  %v8448_v57 = vld [vmem:[#allocation8 + $0x22c] ss:$16 sps:$4 sm:$0xff]   ;;  %v8443_v5 = vld [vmem:[#allocation8 + $0x220] ss:$16 sps:$4 sm:$0xff]  }
 0x383   :  { %4723 = vmatprep.subr.bf16.mxu0 %v8427_v38  ;;  %4809 = vmatprep.subr.bf16.mxu1 %v8430_v59  ;;  %v8446_v38 = vld [vmem:[#allocation8 + $0x228] ss:$16 sps:$4 sm:$0xff]   ;;  %v8451_v59 = vld [vmem:[#allocation8 + $0x244] ss:$16 sps:$4 sm:$0xff]  }
 0x386   :  { %4724 = vmatpush1.bf16.msra.mxu0 %v8425_v60  ;;  %4810 = vmatpush1.bf16.msra.mxu1 %v8428_v61  ;;  %v8454_v60 = vld [vmem:[#allocation8 + $0x24c] ss:$16 sps:$4 sm:$0xff]   ;;  %v8449_v61 = vld [vmem:[#allocation8 + $0x240] ss:$16 sps:$4 sm:$0xff]  }
 0x387   :  { %4725 = vmatprep.subr.bf16.mxu0 %v8433_v62  ;;  %4811 = vmatprep.subr.bf16.mxu1 %v8436_v63  ;;  %v8452_v62 = vld [vmem:[#allocation8 + $0x248] ss:$16 sps:$4 sm:$0xff]   ;;  %v8457_v63 = vld [vmem:[#allocation8 + $0x264] ss:$16 sps:$4 sm:$0xff]  }
 0x38a   :  { %4726 = vmatpush1.bf16.msra.mxu0 %v8431_v2  ;;  %4812 = vmatpush1.bf16.msra.mxu1 %v8434_v3  ;;  %v8460_v2 = vld [vmem:[#allocation8 + $0x26c] ss:$16 sps:$4 sm:$0xff]   ;;  %v8455_v3 = vld [vmem:[#allocation8 + $0x260] ss:$16 sps:$4 sm:$0xff]  }
 0x38b   :  { %4738 = vmatprep.subr.bf16.mxu0 %v8439_v34  ;;  %4824 = vmatprep.subr.bf16.mxu1 %v8442_v4  ;;  %v8458_v34 = vld [vmem:[#allocation8 + $0x268] ss:$16 sps:$4 sm:$0xff]   ;;  %v8463_v4 = vld [vmem:[#allocation8 + $0x284] ss:$16 sps:$4 sm:$0xff]  }
 0x420   :  { %v3799_v14 = vpop.f32.mrb[12].mxu0  ;;  %v3885_v19 = vpop.f32.mrb[16].mxu1 }
 0x421   :  { %v7652_v20 = vadd.f32 %v3799_v14, %v3065_v7  ;;  %v7656_v21 = vadd.f32 %v3885_v19, %v3073_v8  ;;  %v3801_v23 = vpop.f32.mrb[13].mxu0  ;;  %v3887_v24 = vpop.f32.mrb[17].mxu1  ;;  %v8467_v14 = vld [vmem:[#allocation8 + $0x2a0] ss:$16 sps:$4 sm:$0xff]   ;;  %v8470_v19 = vld [vmem:[#allocation8 + $0x2a8] ss:$16 sps:$4 sm:$0xff]  }
 0x422   :  { %v7653_v25 = vadd.f32 %v3801_v23, %v3069_v9  ;;  %v7657_v27 = vadd.f32 %v3887_v24, %v3077_v12  ;;  %v3803_v28 = vpop.f32.mrb[14].mxu0  ;;  %v3889_v29 = vpop.f32.mrb[18].mxu1  ;;  %v8473_v23 = vld [vmem:[#allocation8 + $0x2c0] ss:$16 sps:$4 sm:$0xff]   ;;  %v8476_v24 = vld [vmem:[#allocation8 + $0x2c8] ss:$16 sps:$4 sm:$0xff]  }
 0x423   :  { %v7654_v10 = vadd.f32 %v3803_v28, %v3065_v7  ;;  %v7658_v32 = vadd.f32 %v3889_v29, %v3073_v8  ;;  %v3805_v33 = vpop.f32.mrb[15].mxu0  ;;  %v3891_v36 = vpop.f32.mrb[19].mxu1  ;;  %v3894_v43 = vmax.f32 %v7652_v20, 0.0  ;;  %v3896_v31 = vmax.f32 %v7656_v21, 0.0  ;;  %v8461_v7 = vld [vmem:[#allocation8 + $0x280] ss:$16 sps:$4 sm:$0xff]  }
 0x424   :  { %v7655_v40 = vadd.f32 %v3805_v33, %v3069_v9  ;;  %v7659_v42 = vadd.f32 %v3891_v36, %v3077_v12  ;;  %v3895_v45 = vmax.f32 %v7653_v25, 0.0  ;;  %v3897_v46 = vmax.f32 %v7657_v27, 0.0  ;;  %v8464_v8 = vld [vmem:[#allocation8 + $0x288] ss:$16 sps:$4 sm:$0xff]   ;;  %v8469_v9 = vld [vmem:[#allocation8 + $0x2a4] ss:$16 sps:$4 sm:$0xff]  }
 0x425   :  { %v3898_v44 = vmax.f32 %v7654_v10, 0.0  ;;  %v3900_v52 = vmax.f32 %v7658_v32, 0.0  ;;  %v8472_v12 = vld [vmem:[#allocation8 + $0x2ac] ss:$16 sps:$4 sm:$0xff]   ;;  %v8475_v20 = vld [vmem:[#allocation8 + $0x2c4] ss:$16 sps:$4 sm:$0xff]  }
 0x426   :  { %v3899_v30 = vmax.f32 %v7655_v40, 0.0  ;;  %v3901_v1 = vmax.f32 %v7659_v42, 0.0  ;;  %v8478_v21 = vld [vmem:[#allocation8 + $0x2cc] ss:$16 sps:$4 sm:$0xff]   ;;  %v8481_v25 = vld [vmem:[#allocation8 + $0x2e4] ss:$16 sps:$4 sm:$0xff]  }
 0x427   :  { %v3902_v48 = vpack.c.bf16 %v3898_v44, %v3894_v43  ;;  %v9371_v58 = vpack.c.bf16 %v3900_v52, %v3896_v31  ;;  %v8484_v27 = vld [vmem:[#allocation8 + $0x2ec] ss:$16 sps:$4 sm:$0xff]   ;;  %v8479_v28 = vld [vmem:[#allocation8 + $0x2e0] ss:$16 sps:$4 sm:$0xff]   ;;  %v8482_v29 = vld [vmem:[#allocation8 + $0x2e8] ss:$16 sps:$4 sm:$0xff]  }
 0x428   :  { %v3903_v11 = vpack.c.bf16 %v3899_v30, %v3895_v45  ;;  %v3905_v51 = vpack.c.bf16 %v3901_v1, %v3897_v46  ;;  %v8487_v10 = vld [vmem:[#allocation8 + $0x304] ss:$16 sps:$4 sm:$0xff]   ;;  %v8490_v32 = vld [vmem:[#allocation8 + $0x30c] ss:$16 sps:$4 sm:$0xff]   ;;  %v8485_v33 = vld [vmem:[#allocation8 + $0x300] ss:$16 sps:$4 sm:$0xff]  }
 0x429   :  { %v8488_v36 = vld [vmem:[#allocation8 + $0x308] ss:$16 sps:$4 sm:$0xff]   ;;  %v8493_v40 = vld [vmem:[#allocation8 + $0x324] ss:$16 sps:$4 sm:$0xff]   ;;  %v8496_v42 = vld [vmem:[#allocation8 + $0x32c] ss:$16 sps:$4 sm:$0xff]  }
 0x42a   :  { %4727 = vmatprep.mubr.bf16.mxu0 %v3903_v11  ;;  %4813 = vmatprep.mubr.bf16.mxu1 %v3903_v11  ;;  %v8491_v43 = vld [vmem:[#allocation8 + $0x320] ss:$16 sps:$4 sm:$0xff]   ;;  %v8494_v31 = vld [vmem:[#allocation8 + $0x328] ss:$16 sps:$4 sm:$0xff]   ;;  %v8499_v44 = vld [vmem:[#allocation8 + $0x344] ss:$16 sps:$4 sm:$0xff]  }
 0x42b   :  { %4728 = vmatmul.mubr.bf16.vlgmr.msra.gmra.mrb[16].mxu0 %v3902_v48  ;;  %4814 = vmatmul.mubr.bf16.vlgmr.msra.gmra.mrb[20].mxu1 %v3902_v48  ;;  %v8502_v52 = vld [vmem:[#allocation8 + $0x34c] ss:$16 sps:$4 sm:$0xff]   ;;  %v8497_v45 = vld [vmem:[#allocation8 + $0x340] ss:$16 sps:$4 sm:$0xff]   ;;  %v8500_v46 = vld [vmem:[#allocation8 + $0x348] ss:$16 sps:$4 sm:$0xff]  }
 0x42c   :  { %4739 = vmatpush1.bf16.msra.mxu0 %v8437_v54  ;;  %4825 = vmatpush1.bf16.msra.mxu1 %v8440_v55  ;;  %v8505_v30 = vld [vmem:[#allocation8 + $0x364] ss:$16 sps:$4 sm:$0xff]   ;;  %v8508_v1 = vld [vmem:[#allocation8 + $0x36c] ss:$16 sps:$4 sm:$0xff]   ;;  %v8503_v48 = vld [vmem:[#allocation8 + $0x360] ss:$16 sps:$4 sm:$0xff]  }
 0x42d   :  { %4770 = vmatprep.mubr.bf16.mxu0 %v3905_v51  ;;  %4856 = vmatprep.mubr.bf16.mxu1 %v3905_v51  ;;  %v8506_v11 = vld [vmem:[#allocation8 + $0x368] ss:$16 sps:$4 sm:$0xff]   ;;  %v8511_v51 = vld [vmem:[#allocation8 + $0x384] ss:$16 sps:$4 sm:$0xff]   ;;  %v8514_v54 = vld [vmem:[#allocation8 + $0x38c] ss:$16 sps:$4 sm:$0xff]  }
 0x42e   :  { %4740 = vmatprep.subr.bf16.mxu0 %v8445_v56  ;;  %4826 = vmatprep.subr.bf16.mxu1 %v8448_v57  ;;  %v8509_v55 = vld [vmem:[#allocation8 + $0x380] ss:$16 sps:$4 sm:$0xff]   ;;  %v8512_v56 = vld [vmem:[#allocation8 + $0x388] ss:$16 sps:$4 sm:$0xff]   ;;  %v8517_v57 = vld [vmem:[#allocation8 + $0x3a4] ss:$16 sps:$4 sm:$0xff]  }
 0x430   :  { %4741 = vmatpush1.bf16.msra.mxu0 %v8443_v5  ;;  %4827 = vmatpush1.bf16.msra.mxu1 %v8446_v38  ;;  %v8520_v5 = vld [vmem:[#allocation8 + $0x3ac] ss:$16 sps:$4 sm:$0xff]   ;;  %v8515_v38 = vld [vmem:[#allocation8 + $0x3a0] ss:$16 sps:$4 sm:$0xff]  }
 0x431   :  { %4742 = vmatprep.subr.bf16.mxu0 %v8451_v59  ;;  %4828 = vmatprep.subr.bf16.mxu1 %v8454_v60  ;;  %v8518_v59 = vld [vmem:[#allocation8 + $0x3a8] ss:$16 sps:$4 sm:$0xff]   ;;  %v8523_v60 = vld [vmem:[#allocation8 + $0x3c4] ss:$16 sps:$4 sm:$0xff]  }
 0x434   :  { %4743 = vmatpush1.bf16.msra.mxu0 %v8449_v61  ;;  %4829 = vmatpush1.bf16.msra.mxu1 %v8452_v62  ;;  %v8526_v61 = vld [vmem:[#allocation8 + $0x3cc] ss:$16 sps:$4 sm:$0xff]   ;;  %v8521_v62 = vld [vmem:[#allocation8 + $0x3c0] ss:$16 sps:$4 sm:$0xff]  }
 0x435   :  { %4744 = vmatprep.subr.bf16.mxu0 %v8457_v63  ;;  %4830 = vmatprep.subr.bf16.mxu1 %v8460_v2  ;;  %v8524_v63 = vld [vmem:[#allocation8 + $0x3c8] ss:$16 sps:$4 sm:$0xff]   ;;  %v8529_v2 = vld [vmem:[#allocation8 + $0x3e4] ss:$16 sps:$4 sm:$0xff]  }
 0x438   :  { %4745 = vmatpush1.bf16.msra.mxu0 %v8455_v3  ;;  %4831 = vmatpush1.bf16.msra.mxu1 %v8458_v34  ;;  %v8532_v3 = vld [vmem:[#allocation8 + $0x3ec] ss:$16 sps:$4 sm:$0xff]   ;;  %v8527_v34 = vld [vmem:[#allocation8 + $0x3e0] ss:$16 sps:$4 sm:$0xff]  }
 0x439   :  { %4746 = vmatprep.subr.bf16.mxu0 %v8463_v4  ;;  %4832 = vmatprep.subr.bf16.mxu1 %v8466_v6  ;;  %v8530_v4 = vld [vmem:[#allocation8 + $0x3e8] ss:$16 sps:$4 sm:$0xff]   ;;  %v8535_v6 = vld [vmem:[#allocation10 + $0x4] ss:$28 sps:$4 sm:$0xff]  }
 0x43c   :  { %4747 = vmatpush1.bf16.msra.mxu0 %v8461_v7  ;;  %4833 = vmatpush1.bf16.msra.mxu1 %v8464_v8  ;;  %v8538_v7 = vld [vmem:[#allocation10 + $0xc] ss:$28 sps:$4 sm:$0xff]   ;;  %v8533_v8 = vld [vmem:[#allocation10] ss:$28 sps:$4 sm:$0xff]  }
 0x43d   :  { %4748 = vmatprep.subr.bf16.mxu0 %v8469_v9  ;;  %4834 = vmatprep.subr.bf16.mxu1 %v8472_v12  ;;  %v8536_v9 = vld [vmem:[#allocation10 + $0x8] ss:$28 sps:$4 sm:$0xff]   ;;  %v8541_v12 = vld [vmem:[#allocation10 + $0x3c] ss:$28 sps:$4 sm:$0xff]  }
 0x440   :  { %4749 = vmatpush1.bf16.msra.mxu0 %v8467_v14  ;;  %4835 = vmatpush1.bf16.msra.mxu1 %v8470_v19  ;;  %v8544_v14 = vld [vmem:[#allocation10 + $0x44] ss:$28 sps:$4 sm:$0xff]   ;;  %v8539_v19 = vld [vmem:[#allocation10 + $0x38] ss:$28 sps:$4 sm:$0xff]  }
 0x441   :  { %4750 = vmatprep.subr.bf16.mxu0 %v8475_v20  ;;  %4836 = vmatprep.subr.bf16.mxu1 %v8478_v21  ;;  %v8542_v20 = vld [vmem:[#allocation10 + $0x40] ss:$28 sps:$4 sm:$0xff]   ;;  %v8547_v21 = vld [vmem:[#allocation10 + $0x74] ss:$28 sps:$4 sm:$0xff]  }
 0x444   :  { %4751 = vmatpush1.bf16.msra.mxu0 %v8473_v23  ;;  %4837 = vmatpush1.bf16.msra.mxu1 %v8476_v24  ;;  %v8550_v23 = vld [vmem:[#allocation10 + $0x7c] ss:$28 sps:$4 sm:$0xff]   ;;  %v8545_v24 = vld [vmem:[#allocation10 + $0x70] ss:$28 sps:$4 sm:$0xff]  }
 0x445   :  { %4752 = vmatprep.subr.bf16.mxu0 %v8481_v25  ;;  %4838 = vmatprep.subr.bf16.mxu1 %v8484_v27  ;;  %v8548_v25 = vld [vmem:[#allocation10 + $0x78] ss:$28 sps:$4 sm:$0xff]   ;;  %v8553_v27 = vld [vmem:[#allocation10 + $0xac] ss:$28 sps:$4 sm:$0xff]  }
 0x448   :  { %4753 = vmatpush1.bf16.msra.mxu0 %v8479_v28  ;;  %4839 = vmatpush1.bf16.msra.mxu1 %v8482_v29  ;;  %v8556_v28 = vld [vmem:[#allocation10 + $0xb4] ss:$28 sps:$4 sm:$0xff]   ;;  %v8551_v29 = vld [vmem:[#allocation10 + $0xa8] ss:$28 sps:$4 sm:$0xff]  }
 0x449   :  { %4754 = vmatprep.subr.bf16.mxu0 %v8487_v10  ;;  %4840 = vmatprep.subr.bf16.mxu1 %v8490_v32  ;;  %v8559_v10 = vld [vmem:[#allocation10 + $0xe4] ss:$28 sps:$4 sm:$0xff]   ;;  %v8562_v32 = vld [vmem:[#allocation10 + $0xec] ss:$28 sps:$4 sm:$0xff]  }
 0x44c   :  { %4755 = vmatpush1.bf16.msra.mxu0 %v8485_v33  ;;  %4841 = vmatpush1.bf16.msra.mxu1 %v8488_v36  ;;  %v8557_v33 = vld [vmem:[#allocation10 + $0xe0] ss:$28 sps:$4 sm:$0xff]   ;;  %v8560_v36 = vld [vmem:[#allocation10 + $0xe8] ss:$28 sps:$4 sm:$0xff]  }
 0x44d   :  { %4756 = vmatprep.subr.bf16.mxu0 %v8493_v40  ;;  %4842 = vmatprep.subr.bf16.mxu1 %v8496_v42  ;;  %v8565_v40 = vld [vmem:[#allocation10 + $0x11c] ss:$28 sps:$4 sm:$0xff]   ;;  %v8568_v42 = vld [vmem:[#allocation10 + $0x124] ss:$28 sps:$4 sm:$0xff]  }
 0x450   :  { %4757 = vmatpush1.bf16.msra.mxu0 %v8491_v43  ;;  %4843 = vmatpush1.bf16.msra.mxu1 %v8494_v31  ;;  %v8563_v43 = vld [vmem:[#allocation10 + $0x118] ss:$28 sps:$4 sm:$0xff]   ;;  %v8566_v31 = vld [vmem:[#allocation10 + $0x120] ss:$28 sps:$4 sm:$0xff]  }
 0x451   :  { %4758 = vmatprep.subr.bf16.mxu0 %v8499_v44  ;;  %4844 = vmatprep.subr.bf16.mxu1 %v8502_v52  ;;  %v8571_v44 = vld [vmem:[#allocation10 + $0x154] ss:$28 sps:$4 sm:$0xff]   ;;  %v8574_v52 = vld [vmem:[#allocation10 + $0x15c] ss:$28 sps:$4 sm:$0xff]  }
 0x454   :  { %4759 = vmatpush1.bf16.msra.mxu0 %v8497_v45  ;;  %4845 = vmatpush1.bf16.msra.mxu1 %v8500_v46  ;;  %v8569_v45 = vld [vmem:[#allocation10 + $0x150] ss:$28 sps:$4 sm:$0xff]   ;;  %v8572_v46 = vld [vmem:[#allocation10 + $0x158] ss:$28 sps:$4 sm:$0xff]  }
 0x455   :  { %4760 = vmatprep.subr.bf16.mxu0 %v8505_v30  ;;  %4846 = vmatprep.subr.bf16.mxu1 %v8508_v1  ;;  %v8577_v30 = vld [vmem:[#allocation10 + $0x18c] ss:$28 sps:$4 sm:$0xff]   ;;  %v8580_v1 = vld [vmem:[#allocation10 + $0x194] ss:$28 sps:$4 sm:$0xff]  }
 0x458   :  { %4761 = vmatpush1.bf16.msra.mxu0 %v8503_v48  ;;  %4847 = vmatpush1.bf16.msra.mxu1 %v8506_v11  ;;  %v8575_v48 = vld [vmem:[#allocation10 + $0x188] ss:$28 sps:$4 sm:$0xff]   ;;  %v8578_v11 = vld [vmem:[#allocation10 + $0x190] ss:$28 sps:$4 sm:$0xff]  }
 0x459   :  { %4762 = vmatprep.subr.bf16.mxu0 %v8511_v51  ;;  %4848 = vmatprep.subr.bf16.mxu1 %v8514_v54  ;;  %v8583_v51 = vld [vmem:[#allocation10 + $0x1c4] ss:$28 sps:$4 sm:$0xff]   ;;  %v8586_v54 = vld [vmem:[#allocation10 + $0x1cc] ss:$28 sps:$4 sm:$0xff]  }
 0x45c   :  { %4763 = vmatpush1.bf16.msra.mxu0 %v8509_v55  ;;  %4849 = vmatpush1.bf16.msra.mxu1 %v8512_v56  ;;  %v8581_v55 = vld [vmem:[#allocation10 + $0x1c0] ss:$28 sps:$4 sm:$0xff]   ;;  %v8584_v56 = vld [vmem:[#allocation10 + $0x1c8] ss:$28 sps:$4 sm:$0xff]  }
 0x45d   :  { %4764 = vmatprep.subr.bf16.mxu0 %v8517_v57  ;;  %4850 = vmatprep.subr.bf16.mxu1 %v8520_v5  ;;  %v8589_v57 = vld [vmem:[#allocation10 + $0x1fc] ss:$28 sps:$4 sm:$0xff]   ;;  %v8592_v5 = vld [vmem:[#allocation10 + $0x204] ss:$28 sps:$4 sm:$0xff]  }
 0x460   :  { %4765 = vmatpush1.bf16.msra.mxu0 %v8515_v38  ;;  %4851 = vmatpush1.bf16.msra.mxu1 %v8518_v59  ;;  %v8587_v38 = vld [vmem:[#allocation10 + $0x1f8] ss:$28 sps:$4 sm:$0xff]   ;;  %v8590_v59 = vld [vmem:[#allocation10 + $0x200] ss:$28 sps:$4 sm:$0xff]  }
 0x461   :  { %4766 = vmatprep.subr.bf16.mxu0 %v8523_v60  ;;  %4852 = vmatprep.subr.bf16.mxu1 %v8526_v61  ;;  %v8595_v60 = vld [vmem:[#allocation10 + $0x234] ss:$28 sps:$4 sm:$0xff]   ;;  %v8598_v61 = vld [vmem:[#allocation10 + $0x23c] ss:$28 sps:$4 sm:$0xff]  }
 0x464   :  { %4767 = vmatpush1.bf16.msra.mxu0 %v8521_v62  ;;  %4853 = vmatpush1.bf16.msra.mxu1 %v8524_v63  ;;  %v8593_v62 = vld [vmem:[#allocation10 + $0x230] ss:$28 sps:$4 sm:$0xff]   ;;  %v8596_v63 = vld [vmem:[#allocation10 + $0x238] ss:$28 sps:$4 sm:$0xff]  }
 0x465   :  { %4768 = vmatprep.subr.bf16.mxu0 %v8529_v2  ;;  %4854 = vmatprep.subr.bf16.mxu1 %v8532_v3  ;;  %v8601_v2 = vld [vmem:[#allocation10 + $0x26c] ss:$28 sps:$4 sm:$0xff]   ;;  %v8604_v3 = vld [vmem:[#allocation10 + $0x274] ss:$28 sps:$4 sm:$0xff]  }
 0x468   :  { %4769 = vmatpush1.bf16.msra.mxu0 %v8527_v34  ;;  %4855 = vmatpush1.bf16.msra.mxu1 %v8530_v4  ;;  %v8599_v34 = vld [vmem:[#allocation10 + $0x268] ss:$28 sps:$4 sm:$0xff]   ;;  %v8602_v4 = vld [vmem:[#allocation10 + $0x270] ss:$28 sps:$4 sm:$0xff]  }
 0x469   :  { %6331 = vmatprep.subr.bf16.mxu0 %v8535_v6  ;;  %6417 = vmatprep.subr.bf16.mxu1 %v8538_v7  ;;  %v8607_v6 = vld [vmem:[#allocation10 + $0x2a4] ss:$28 sps:$4 sm:$0xff]   ;;  %v8610_v7 = vld [vmem:[#allocation10 + $0x2ac] ss:$28 sps:$4 sm:$0xff]  }
 0x46b   :  { %4771 = vmatmul.mubr.bf16.vlgmr.msra.gmra.mrb[16].mxu0 %v9371_v58  ;;  %4857 = vmatmul.mubr.bf16.vlgmr.msra.gmra.mrb[20].mxu1 %v9371_v58  ;;  %v8554_v58 = vld [vmem:[#allocation10 + $0xb0] ss:$28 sps:$4 sm:$0xff]  }
 0x46c   :  { %6332 = vmatpush1.bf16.msra.mxu0 %v8533_v8  ;;  %6418 = vmatpush1.bf16.msra.mxu1 %v8536_v9  ;;  %v8605_v8 = vld [vmem:[#allocation10 + $0x2a0] ss:$28 sps:$4 sm:$0xff]   ;;  %v8608_v9 = vld [vmem:[#allocation10 + $0x2a8] ss:$28 sps:$4 sm:$0xff]  }
 0x46d   :  { %6333 = vmatprep.subr.bf16.mxu0 %v8541_v12  ;;  %6419 = vmatprep.subr.bf16.mxu1 %v8544_v14  ;;  %v8613_v12 = vld [vmem:[#allocation10 + $0x2dc] ss:$28 sps:$4 sm:$0xff]   ;;  %v8616_v14 = vld [vmem:[#allocation10 + $0x2e4] ss:$28 sps:$4 sm:$0xff]  }
 0x470   :  { %6334 = vmatpush1.bf16.msra.mxu0 %v8539_v19  ;;  %6420 = vmatpush1.bf16.msra.mxu1 %v8542_v20  ;;  %v8611_v19 = vld [vmem:[#allocation10 + $0x2d8] ss:$28 sps:$4 sm:$0xff]   ;;  %v8614_v20 = vld [vmem:[#allocation10 + $0x2e0] ss:$28 sps:$4 sm:$0xff]  }
 0x471   :  { %6335 = vmatprep.subr.bf16.mxu0 %v8547_v21  ;;  %6421 = vmatprep.subr.bf16.mxu1 %v8550_v23  ;;  %v8619_v21 = vld [vmem:[#allocation10 + $0x314] ss:$28 sps:$4 sm:$0xff]   ;;  %v8622_v23 = vld [vmem:[#allocation10 + $0x31c] ss:$28 sps:$4 sm:$0xff]  }
 0x474   :  { %6336 = vmatpush1.bf16.msra.mxu0 %v8545_v24  ;;  %6422 = vmatpush1.bf16.msra.mxu1 %v8548_v25  ;;  %v8617_v24 = vld [vmem:[#allocation10 + $0x310] ss:$28 sps:$4 sm:$0xff]   ;;  %v8620_v25 = vld [vmem:[#allocation10 + $0x318] ss:$28 sps:$4 sm:$0xff]  }
 0x475   :  { %6337 = vmatprep.subr.bf16.mxu0 %v8553_v27  ;;  %6423 = vmatprep.subr.bf16.mxu1 %v8556_v28  ;;  %v8625_v27 = vld [vmem:[#allocation10 + $0x34c] ss:$28 sps:$4 sm:$0xff]   ;;  %v8628_v28 = vld [vmem:[#allocation10 + $0x354] ss:$28 sps:$4 sm:$0xff]  }
 0x478   :  { %6338 = vmatpush1.bf16.msra.mxu0 %v8551_v29  ;;  %6424 = vmatpush1.bf16.msra.mxu1 %v8554_v58  ;;  %v8623_v29 = vld [vmem:[#allocation10 + $0x348] ss:$28 sps:$4 sm:$0xff]   ;;  %v8626_v58 = vld [vmem:[#allocation10 + $0x350] ss:$28 sps:$4 sm:$0xff]  }
 0x479   :  { %6339 = vmatprep.subr.bf16.mxu0 %v8559_v10  ;;  %6425 = vmatprep.subr.bf16.mxu1 %v8562_v32  ;;  %v8631_v10 = vld [vmem:[#allocation10 + $0x384] ss:$28 sps:$4 sm:$0xff]   ;;  %v8634_v32 = vld [vmem:[#allocation10 + $0x38c] ss:$28 sps:$4 sm:$0xff]  }
 0x47c   :  { %6340 = vmatpush1.bf16.msra.mxu0 %v8557_v33  ;;  %6426 = vmatpush1.bf16.msra.mxu1 %v8560_v36  ;;  %v105_v33 = vld [vmem:[%s9459_s8 + $0x10] sm:$0xf] }
 0x47d   :  { %6341 = vmatprep.subr.bf16.mxu0 %v8565_v40  ;;  %6427 = vmatprep.subr.bf16.mxu1 %v8568_v42  ;;  %v4038_v36 = vrot.slane %v105_v33, %v9263_v0  ;;  %v4046_v40 = vrot.slane %v105_v33, %v9290_v35  ;;  %v4042_v42 = vrot.slane %v105_v33, %v9271_v39 }
 0x480   :  { %6342 = vmatpush1.bf16.msra.mxu0 %v8563_v43  ;;  %6428 = vmatpush1.bf16.msra.mxu1 %v8566_v31  ;;  %v4050_v43 = vrot.slane %v105_v33, %v9293_v41  ;;  %v8658_v33 = vld [vmem:[#allocation10 + $0x46c] ss:$28 sps:$4 sm:$0xff]  }
 0x481   :  { %6343 = vmatprep.subr.bf16.mxu0 %v8571_v44  ;;  %6429 = vmatprep.subr.bf16.mxu1 %v8574_v52 }
 0x484   :  { %6344 = vmatpush1.bf16.msra.mxu0 %v8569_v45  ;;  %6430 = vmatpush1.bf16.msra.mxu1 %v8572_v46 }
 0x485   :  { %6345 = vmatprep.subr.bf16.mxu0 %v8577_v30  ;;  %6431 = vmatprep.subr.bf16.mxu1 %v8580_v1 }
 0x488   :  { %6346 = vmatpush1.bf16.msra.mxu0 %v8575_v48  ;;  %6432 = vmatpush1.bf16.msra.mxu1 %v8578_v11 }
 0x489   :  { %6347 = vmatprep.subr.bf16.mxu0 %v8583_v51  ;;  %6433 = vmatprep.subr.bf16.mxu1 %v8586_v54 }
 0x48c   :  { %6348 = vmatpush1.bf16.msra.mxu0 %v8581_v55  ;;  %6434 = vmatpush1.bf16.msra.mxu1 %v8584_v56 }
 0x48d   :  { %6349 = vmatprep.subr.bf16.mxu0 %v8589_v57  ;;  %6435 = vmatprep.subr.bf16.mxu1 %v8592_v5 }
 0x490   :  { %6350 = vmatpush1.bf16.msra.mxu0 %v8587_v38  ;;  %6436 = vmatpush1.bf16.msra.mxu1 %v8590_v59 }
 0x491   :  { %6351 = vmatprep.subr.bf16.mxu0 %v8595_v60  ;;  %6437 = vmatprep.subr.bf16.mxu1 %v8598_v61 }
 0x494   :  { %6352 = vmatpush1.bf16.msra.mxu0 %v8593_v62  ;;  %6438 = vmatpush1.bf16.msra.mxu1 %v8596_v63 }
 0x495   :  { %6353 = vmatprep.subr.bf16.mxu0 %v8601_v2  ;;  %6439 = vmatprep.subr.bf16.mxu1 %v8604_v3 }
 0x498   :  { %6354 = vmatpush1.bf16.msra.mxu0 %v8599_v34  ;;  %6440 = vmatpush1.bf16.msra.mxu1 %v8602_v4 }
 0x499   :  { %6355 = vmatprep.subr.bf16.mxu0 %v8607_v6  ;;  %6441 = vmatprep.subr.bf16.mxu1 %v8610_v7 }
 0x49c   :  { %6356 = vmatpush1.bf16.msra.mxu0 %v8605_v8  ;;  %6442 = vmatpush1.bf16.msra.mxu1 %v8608_v9 }
 0x49d   :  { %6357 = vmatprep.subr.bf16.mxu0 %v8613_v12  ;;  %6443 = vmatprep.subr.bf16.mxu1 %v8616_v14 }
 0x4a0   :  { %6358 = vmatpush1.bf16.msra.mxu0 %v8611_v19  ;;  %6444 = vmatpush1.bf16.msra.mxu1 %v8614_v20  ;;  %v8640_v19 = vld [vmem:[#allocation10 + $0x3c4] ss:$28 sps:$4 sm:$0xff]   ;;  %v8635_v20 = vld [vmem:[#allocation10 + $0x3b8] ss:$28 sps:$4 sm:$0xff]  }
 0x4a1   :  { %6359 = vmatprep.subr.bf16.mxu0 %v8619_v21  ;;  %6445 = vmatprep.subr.bf16.mxu1 %v8622_v23  ;;  %v8638_v21 = vld [vmem:[#allocation10 + $0x3c0] ss:$28 sps:$4 sm:$0xff]   ;;  %v8643_v23 = vld [vmem:[#allocation10 + $0x3f4] ss:$28 sps:$4 sm:$0xff]  }
 0x4a4   :  { %6360 = vmatpush1.bf16.msra.mxu0 %v8617_v24  ;;  %6446 = vmatpush1.bf16.msra.mxu1 %v8620_v25  ;;  %v8646_v24 = vld [vmem:[#allocation10 + $0x3fc] ss:$28 sps:$4 sm:$0xff]   ;;  %v8641_v25 = vld [vmem:[#allocation10 + $0x3f0] ss:$28 sps:$4 sm:$0xff]  }
 0x4a5   :  { %6361 = vmatprep.subr.bf16.mxu0 %v8625_v27  ;;  %6447 = vmatprep.subr.bf16.mxu1 %v8628_v28  ;;  %v8644_v27 = vld [vmem:[#allocation10 + $0x3f8] ss:$28 sps:$4 sm:$0xff]   ;;  %v8649_v28 = vld [vmem:[#allocation10 + $0x42c] ss:$28 sps:$4 sm:$0xff]  }
 0x4a8   :  { %6362 = vmatpush1.bf16.msra.mxu0 %v8623_v29  ;;  %6448 = vmatpush1.bf16.msra.mxu1 %v8626_v58  ;;  %v8652_v29 = vld [vmem:[#allocation10 + $0x434] ss:$28 sps:$4 sm:$0xff]   ;;  %v8647_v58 = vld [vmem:[#allocation10 + $0x428] ss:$28 sps:$4 sm:$0xff]  }
 0x4a9   :  { %6374 = vmatprep.subr.bf16.mxu0 %v8631_v10  ;;  %6460 = vmatprep.subr.bf16.mxu1 %v8634_v32  ;;  %v8650_v10 = vld [vmem:[#allocation10 + $0x430] ss:$28 sps:$4 sm:$0xff]   ;;  %v8655_v32 = vld [vmem:[#allocation10 + $0x464] ss:$28 sps:$4 sm:$0xff]  }
 0x53e   :  { %v4772_v31 = vpop.f32.mrb[16].mxu0  ;;  %v4858_v44 = vpop.f32.mrb[20].mxu1 }
 0x53f   :  { %v7660_v52 = vadd.f32 %v4772_v31, %v4038_v36  ;;  %v7664_v45 = vadd.f32 %v4858_v44, %v4046_v40  ;;  %v4774_v46 = vpop.f32.mrb[17].mxu0  ;;  %v4860_v30 = vpop.f32.mrb[21].mxu1  ;;  %v8659_v31 = vld [vmem:[#allocation10 + $0x498] ss:$28 sps:$4 sm:$0xff]   ;;  %v8662_v44 = vld [vmem:[#allocation10 + $0x4a0] ss:$28 sps:$4 sm:$0xff]  }
 0x540   :  { %v7661_v1 = vadd.f32 %v4774_v46, %v4042_v42  ;;  %v7665_v48 = vadd.f32 %v4860_v30, %v4050_v43  ;;  %v4776_v11 = vpop.f32.mrb[18].mxu0  ;;  %v4862_v51 = vpop.f32.mrb[22].mxu1  ;;  %v8665_v46 = vld [vmem:[#allocation10 + $0x4d0] ss:$28 sps:$4 sm:$0xff]   ;;  %v8668_v30 = vld [vmem:[#allocation10 + $0x4d8] ss:$28 sps:$4 sm:$0xff]  }
 0x541   :  { %v4867_v54 = vadd.f32 %v7660_v52, %v9342_v17  ;;  %v4869_v55 = vadd.f32 %v7664_v45, %v9360_v49  ;;  %v7662_v56 = vadd.f32 %v4776_v11, %v4038_v36  ;;  %v7666_v57 = vadd.f32 %v4862_v51, %v4046_v40  ;;  %v4778_v5 = vpop.f32.mrb[19].mxu0  ;;  %v4864_v38 = vpop.f32.mrb[23].mxu1  ;;  %v8653_v36 = vld [vmem:[#allocation10 + $0x460] ss:$28 sps:$4 sm:$0xff]   ;;  %v8656_v40 = vld [vmem:[#allocation10 + $0x468] ss:$28 sps:$4 sm:$0xff]  }
 0x542   :  { %v4868_v59 = vadd.f32 %v7661_v1, %v9338_v15  ;;  %v4870_v60 = vadd.f32 %v7665_v48, %v9348_v22  ;;  %v7663_v61 = vadd.f32 %v4778_v5, %v4042_v42  ;;  %v7667_v62 = vadd.f32 %v4864_v38, %v4050_v43  ;;  %v8661_v42 = vld [vmem:[#allocation10 + $0x49c] ss:$28 sps:$4 sm:$0xff]   ;;  %v8664_v43 = vld [vmem:[#allocation10 + $0x4a4] ss:$28 sps:$4 sm:$0xff]   ;;  %v8667_v52 = vld [vmem:[#allocation10 + $0x4d4] ss:$28 sps:$4 sm:$0xff]  }
 0x543   :  { %v4871_v63 = vadd.f32 %v7662_v56, %v9336_v13  ;;  %v4873_v2 = vadd.f32 %v7666_v57, %v9358_v47  ;;  %v4875_v34 = vmax.f32 %v4867_v54, 0.0  ;;  %v4877_v49 = vmax.f32 %v4869_v55, 0.0  ;;  %v8629_v47 = vld [vmem:[#allocation10 + $0x380] ss:$28 sps:$4 sm:$0xff]   ;;  %v8673_v1 = vld [vmem:[#allocation10 + $0x50c] ss:$28 sps:$4 sm:$0xff]  }
 0x544   :  { %v4872_v3 = vadd.f32 %v7663_v61, %v9340_v16  ;;  %v4874_v17 = vadd.f32 %v7667_v62, %v9344_v18  ;;  %v4876_v7 = vmax.f32 %v4868_v59, 0.0  ;;  %v4878_v8 = vmax.f32 %v4870_v60, 0.0  ;;  %v8632_v16 = vld [vmem:[#allocation10 + $0x388] ss:$28 sps:$4 sm:$0xff]   ;;  %v8637_v18 = vld [vmem:[#allocation10 + $0x3bc] ss:$28 sps:$4 sm:$0xff]  }
 0x545   :  { %v4879_v4 = vmax.f32 %v4871_v63, 0.0  ;;  %v4881_v6 = vmax.f32 %v4873_v2, 0.0  ;;  %v8670_v45 = vld [vmem:[#allocation10 + $0x4dc] ss:$28 sps:$4 sm:$0xff]   ;;  %v8676_v48 = vld [vmem:[#allocation10 + $0x514] ss:$28 sps:$4 sm:$0xff]  }
 0x546   :  { %v4880_v9 = vmax.f32 %v4872_v3, 0.0  ;;  %v4882_v15 = vmax.f32 %v4874_v17, 0.0  ;;  %v8671_v11 = vld [vmem:[#allocation10 + $0x508] ss:$28 sps:$4 sm:$0xff]   ;;  %v8674_v51 = vld [vmem:[#allocation10 + $0x510] ss:$28 sps:$4 sm:$0xff]  }
 0x547   :  { %v9390_v12 = vpack.c.bf16 %v4879_v4, %v4875_v34  ;;  %v9392_v22 = vpack.c.bf16 %v4881_v6, %v4877_v49  ;;  %v8679_v54 = vld [vmem:[#allocation10 + $0x544] ss:$28 sps:$4 sm:$0xff]   ;;  %v8682_v55 = vld [vmem:[#allocation10 + $0x54c] ss:$28 sps:$4 sm:$0xff]   ;;  %v8685_v5 = vld [vmem:[#allocation10 + $0x57c] ss:$28 sps:$4 sm:$0xff]  }
 0x548   :  { %v9394_v14 = vpack.c.bf16 %v4880_v9, %v4876_v7  ;;  %v9396_v13 = vpack.c.bf16 %v4882_v15, %v4878_v8  ;;  %v8677_v56 = vld [vmem:[#allocation10 + $0x540] ss:$28 sps:$4 sm:$0xff]   ;;  %v8680_v57 = vld [vmem:[#allocation10 + $0x548] ss:$28 sps:$4 sm:$0xff]   ;;  %v8683_v59 = vld [vmem:[#allocation10 + $0x578] ss:$28 sps:$4 sm:$0xff]  }
 0x549   :  { %v8688_v38 = vld [vmem:[#allocation10 + $0x584] ss:$28 sps:$4 sm:$0xff]   ;;  %v8691_v61 = vld [vmem:[#allocation10 + $0x5b4] ss:$28 sps:$4 sm:$0xff]   ;;  %v8694_v62 = vld [vmem:[#allocation10 + $0x5bc] ss:$28 sps:$4 sm:$0xff]  }
 0x54a   :  { %6363 = vmatprep.mubr.bf16.mxu0 %v9394_v14  ;;  %6449 = vmatprep.mubr.bf16.mxu1 %v9394_v14  ;;  %v8686_v60 = vld [vmem:[#allocation10 + $0x580] ss:$28 sps:$4 sm:$0xff]   ;;  %v8689_v63 = vld [vmem:[#allocation10 + $0x5b0] ss:$28 sps:$4 sm:$0xff]   ;;  %v8692_v2 = vld [vmem:[#allocation10 + $0x5b8] ss:$28 sps:$4 sm:$0xff]  }
 0x54b   :  { %6364 = vmatmul.mubr.bf16.vlgmr.msra.gmra.mrb[20].mxu0 %v9390_v12  ;;  %6450 = vmatmul.mubr.bf16.vlgmr.msra.gmra.mrb[24].mxu1 %v9390_v12  ;;  %v8697_v3 = vld [vmem:[#allocation10 + $0x5ec] ss:$28 sps:$4 sm:$0xff]   ;;  %v8700_v17 = vld [vmem:[#allocation10 + $0x5f4] ss:$28 sps:$4 sm:$0xff]   ;;  %v8703_v4 = vld [vmem:[#allocation10 + $0x624] ss:$28 sps:$4 sm:$0xff]  }
 0x54c   :  { %6375 = vmatpush1.bf16.msra.mxu0 %v8629_v47  ;;  %6461 = vmatpush1.bf16.msra.mxu1 %v8632_v16  ;;  %v8695_v34 = vld [vmem:[#allocation10 + $0x5e8] ss:$28 sps:$4 sm:$0xff]   ;;  %v8698_v49 = vld [vmem:[#allocation10 + $0x5f0] ss:$28 sps:$4 sm:$0xff]   ;;  %v8701_v7 = vld [vmem:[#allocation10 + $0x620] ss:$28 sps:$4 sm:$0xff]  }
 0x54d   :  { %6406 = vmatprep.mubr.bf16.mxu0 %v9396_v13  ;;  %6492 = vmatprep.mubr.bf16.mxu1 %v9396_v13  ;;  %v8706_v6 = vld [vmem:[#allocation10 + $0x62c] ss:$28 sps:$4 sm:$0xff]   ;;  %v8709_v9 = vld [vmem:[#allocation10 + $0x65c] ss:$28 sps:$4 sm:$0xff]   ;;  %v8712_v15 = vld [vmem:[#allocation10 + $0x664] ss:$28 sps:$4 sm:$0xff]  }
 0x54e   :  { %6376 = vmatprep.subr.bf16.mxu0 %v8637_v18  ;;  %6462 = vmatprep.subr.bf16.mxu1 %v8640_v19  ;;  %v8704_v8 = vld [vmem:[#allocation10 + $0x628] ss:$28 sps:$4 sm:$0xff]   ;;  %v8707_v47 = vld [vmem:[#allocation10 + $0x658] ss:$28 sps:$4 sm:$0xff]   ;;  %v8710_v16 = vld [vmem:[#allocation10 + $0x660] ss:$28 sps:$4 sm:$0xff]  }
 0x54f   :  { %v8715_v18 = vld [vmem:[#allocation10 + $0x694] ss:$28 sps:$4 sm:$0xff]   ;;  %v8718_v19 = vld [vmem:[#allocation10 + $0x69c] ss:$28 sps:$4 sm:$0xff]  }
 0x550   :  { %6377 = vmatpush1.bf16.msra.mxu0 %v8635_v20  ;;  %6463 = vmatpush1.bf16.msra.mxu1 %v8638_v21  ;;  %v8713_v20 = vld [vmem:[#allocation10 + $0x690] ss:$28 sps:$4 sm:$0xff]   ;;  %v8716_v21 = vld [vmem:[#allocation10 + $0x698] ss:$28 sps:$4 sm:$0xff]  }
 0x551   :  { %6378 = vmatprep.subr.bf16.mxu0 %v8643_v23  ;;  %6464 = vmatprep.subr.bf16.mxu1 %v8646_v24  ;;  %v8721_v23 = vld [vmem:[#allocation10 + $0x6cc] ss:$28 sps:$4 sm:$0xff]   ;;  %v8724_v24 = vld [vmem:[#allocation10 + $0x6d4] ss:$28 sps:$4 sm:$0xff]  }
 0x554   :  { %6379 = vmatpush1.bf16.msra.mxu0 %v8641_v25  ;;  %6465 = vmatpush1.bf16.msra.mxu1 %v8644_v27  ;;  %v8719_v25 = vld [vmem:[#allocation10 + $0x6c8] ss:$28 sps:$4 sm:$0xff]   ;;  %v8722_v27 = vld [vmem:[#allocation10 + $0x6d0] ss:$28 sps:$4 sm:$0xff]  }
 0x555   :  { %6380 = vmatprep.subr.bf16.mxu0 %v8649_v28  ;;  %6466 = vmatprep.subr.bf16.mxu1 %v8652_v29  ;;  %v8727_v28 = vld [vmem:[#allocation10 + $0x14] ss:$28 sps:$4 sm:$0xff]  }
 0x556   :  { %v8728_v29 = vld [vmem:[#allocation10 + $0x1d8] ss:$28 sps:$4 sm:$0xff]  }
 0x558   :  { %6381 = vmatpush1.bf16.msra.mxu0 %v8647_v58  ;;  %6467 = vmatpush1.bf16.msra.mxu1 %v8650_v10  ;;  %v8725_v58 = vld [vmem:[#allocation10 + $0x10] ss:$28 sps:$4 sm:$0xff]   ;;  %v8729_v10 = vld [vmem:[#allocation10 + $0x18] ss:$28 sps:$4 sm:$0xff]  }
 0x559   :  { %6382 = vmatprep.subr.bf16.mxu0 %v8655_v32  ;;  %6468 = vmatprep.subr.bf16.mxu1 %v8658_v33  ;;  %v8732_v32 = vld [vmem:[#allocation10 + $0x4c] ss:$28 sps:$4 sm:$0xff]  }
 0x55a   :  { %v8733_v33 = vld [vmem:[#allocation10 + $0x210] ss:$28 sps:$4 sm:$0xff]  }
 0x55c   :  { %6383 = vmatpush1.bf16.msra.mxu0 %v8653_v36  ;;  %6469 = vmatpush1.bf16.msra.mxu1 %v8656_v40  ;;  %v8730_v36 = vld [vmem:[#allocation10 + $0x48] ss:$28 sps:$4 sm:$0xff]   ;;  %v8734_v40 = vld [vmem:[#allocation10 + $0x50] ss:$28 sps:$4 sm:$0xff]  }
 0x55d   :  { %6384 = vmatprep.subr.bf16.mxu0 %v8661_v42  ;;  %6470 = vmatprep.subr.bf16.mxu1 %v8664_v43  ;;  %v8737_v42 = vld [vmem:[#allocation10 + $0x84] ss:$28 sps:$4 sm:$0xff]  }
 0x55e   :  { %v8738_v43 = vld [vmem:[#allocation10 + $0x248] ss:$28 sps:$4 sm:$0xff]  }
 0x560   :  { %6385 = vmatpush1.bf16.msra.mxu0 %v8659_v31  ;;  %6471 = vmatpush1.bf16.msra.mxu1 %v8662_v44  ;;  %v8735_v31 = vld [vmem:[#allocation10 + $0x80] ss:$28 sps:$4 sm:$0xff]   ;;  %v8739_v44 = vld [vmem:[#allocation10 + $0x88] ss:$28 sps:$4 sm:$0xff]  }
 0x561   :  { %6386 = vmatprep.subr.bf16.mxu0 %v8667_v52  ;;  %6472 = vmatprep.subr.bf16.mxu1 %v8670_v45  ;;  %v8742_v52 = vld [vmem:[#allocation10 + $0xbc] ss:$28 sps:$4 sm:$0xff]  }
 0x562   :  { %v8743_v45 = vld [vmem:[#allocation10 + $0x280] ss:$28 sps:$4 sm:$0xff]  }
 0x564   :  { %6387 = vmatpush1.bf16.msra.mxu0 %v8665_v46  ;;  %6473 = vmatpush1.bf16.msra.mxu1 %v8668_v30  ;;  %v8740_v46 = vld [vmem:[#allocation10 + $0xb8] ss:$28 sps:$4 sm:$0xff]   ;;  %v8744_v30 = vld [vmem:[#allocation10 + $0xc0] ss:$28 sps:$4 sm:$0xff]  }
 0x565   :  { %6388 = vmatprep.subr.bf16.mxu0 %v8673_v1  ;;  %6474 = vmatprep.subr.bf16.mxu1 %v8676_v48  ;;  %v8747_v1 = vld [vmem:[#allocation10 + $0xf4] ss:$28 sps:$4 sm:$0xff]  }
 0x566   :  { %v8745_v48 = vld [vmem:[#allocation10 + $0xf0] ss:$28 sps:$4 sm:$0xff]  }
 0x568   :  { %6389 = vmatpush1.bf16.msra.mxu0 %v8671_v11  ;;  %6475 = vmatpush1.bf16.msra.mxu1 %v8674_v51  ;;  %v8749_v11 = vld [vmem:[#allocation10 + $0xf8] ss:$28 sps:$4 sm:$0xff]   ;;  %v8752_v51 = vld [vmem:[#allocation10 + $0x12c] ss:$28 sps:$4 sm:$0xff]  }
 0x569   :  { %6390 = vmatprep.subr.bf16.mxu0 %v8679_v54  ;;  %6476 = vmatprep.subr.bf16.mxu1 %v8682_v55  ;;  %v8753_v54 = vld [vmem:[#allocation10 + $0x2f0] ss:$28 sps:$4 sm:$0xff]   ;;  %v8750_v55 = vld [vmem:[#allocation10 + $0x128] ss:$28 sps:$4 sm:$0xff]  }
 0x56c   :  { %6391 = vmatpush1.bf16.msra.mxu0 %v8677_v56  ;;  %6477 = vmatpush1.bf16.msra.mxu1 %v8680_v57  ;;  %v8754_v56 = vld [vmem:[#allocation10 + $0x130] ss:$28 sps:$4 sm:$0xff]   ;;  %v8757_v57 = vld [vmem:[#allocation10 + $0x164] ss:$28 sps:$4 sm:$0xff]  }
 0x56d   :  { %6392 = vmatprep.subr.bf16.mxu0 %v8685_v5  ;;  %6478 = vmatprep.subr.bf16.mxu1 %v8688_v38  ;;  %v8758_v5 = vld [vmem:[#allocation10 + $0x328] ss:$28 sps:$4 sm:$0xff]   ;;  %v8755_v38 = vld [vmem:[#allocation10 + $0x160] ss:$28 sps:$4 sm:$0xff]  }
 0x570   :  { %6393 = vmatpush1.bf16.msra.mxu0 %v8683_v59  ;;  %6479 = vmatpush1.bf16.msra.mxu1 %v8686_v60  ;;  %v8759_v59 = vld [vmem:[#allocation10 + $0x168] ss:$28 sps:$4 sm:$0xff]   ;;  %v8762_v60 = vld [vmem:[#allocation10 + $0x19c] ss:$28 sps:$4 sm:$0xff]  }
 0x571   :  { %6394 = vmatprep.subr.bf16.mxu0 %v8691_v61  ;;  %6480 = vmatprep.subr.bf16.mxu1 %v8694_v62  ;;  %v8763_v61 = vld [vmem:[#allocation10 + $0x360] ss:$28 sps:$4 sm:$0xff]   ;;  %v8760_v62 = vld [vmem:[#allocation10 + $0x198] ss:$28 sps:$4 sm:$0xff]  }
 0x574   :  { %6395 = vmatpush1.bf16.msra.mxu0 %v8689_v63  ;;  %6481 = vmatpush1.bf16.msra.mxu1 %v8692_v2  ;;  %v8764_v63 = vld [vmem:[#allocation10 + $0x1a0] ss:$28 sps:$4 sm:$0xff]   ;;  %v8767_v2 = vld [vmem:[#allocation10 + $0x1d4] ss:$28 sps:$4 sm:$0xff]  }
 0x575   :  { %6396 = vmatprep.subr.bf16.mxu0 %v8697_v3  ;;  %6482 = vmatprep.subr.bf16.mxu1 %v8700_v17  ;;  %v8768_v3 = vld [vmem:[#allocation10 + $0x558] ss:$28 sps:$4 sm:$0xff]   ;;  %v8765_v17 = vld [vmem:[#allocation10 + $0x1d0] ss:$28 sps:$4 sm:$0xff]  }
 0x578   :  { %6397 = vmatpush1.bf16.msra.mxu0 %v8695_v34  ;;  %6483 = vmatpush1.bf16.msra.mxu1 %v8698_v49  ;;  %v8769_v34 = vld [vmem:[#allocation10 + $0x398] ss:$28 sps:$4 sm:$0xff]   ;;  %v8772_v49 = vld [vmem:[#allocation10 + $0x20c] ss:$28 sps:$4 sm:$0xff]  }
 0x579   :  { %6398 = vmatprep.subr.bf16.mxu0 %v8703_v4  ;;  %6484 = vmatprep.subr.bf16.mxu1 %v8706_v6  ;;  %v8773_v4 = vld [vmem:[#allocation10 + $0x590] ss:$28 sps:$4 sm:$0xff]   ;;  %v8770_v6 = vld [vmem:[#allocation10 + $0x208] ss:$28 sps:$4 sm:$0xff]  }
 0x57c   :  { %6399 = vmatpush1.bf16.msra.mxu0 %v8701_v7  ;;  %6485 = vmatpush1.bf16.msra.mxu1 %v8704_v8  ;;  %v8774_v7 = vld [vmem:[#allocation10 + $0x3d0] ss:$28 sps:$4 sm:$0xff]   ;;  %v8777_v8 = vld [vmem:[#allocation10 + $0x244] ss:$28 sps:$4 sm:$0xff]  }
 0x57d   :  { %6400 = vmatprep.subr.bf16.mxu0 %v8709_v9  ;;  %6486 = vmatprep.subr.bf16.mxu1 %v8712_v15  ;;  %v8778_v9 = vld [vmem:[#allocation10 + $0x5c8] ss:$28 sps:$4 sm:$0xff]   ;;  %v8775_v15 = vld [vmem:[#allocation10 + $0x240] ss:$28 sps:$4 sm:$0xff]  }
 0x580   :  { %6401 = vmatpush1.bf16.msra.mxu0 %v8707_v47  ;;  %6487 = vmatpush1.bf16.msra.mxu1 %v8710_v16  ;;  %v8779_v47 = vld [vmem:[#allocation10 + $0x408] ss:$28 sps:$4 sm:$0xff]   ;;  %v8782_v16 = vld [vmem:[#allocation10 + $0x27c] ss:$28 sps:$4 sm:$0xff]  }
 0x581   :  { %6402 = vmatprep.subr.bf16.mxu0 %v8715_v18  ;;  %6488 = vmatprep.subr.bf16.mxu1 %v8718_v19  ;;  %v8783_v18 = vld [vmem:[#allocation10 + $0x600] ss:$28 sps:$4 sm:$0xff]   ;;  %v8780_v19 = vld [vmem:[#allocation10 + $0x278] ss:$28 sps:$4 sm:$0xff]  }
 0x584   :  { %6403 = vmatpush1.bf16.msra.mxu0 %v8713_v20  ;;  %6489 = vmatpush1.bf16.msra.mxu1 %v8716_v21  ;;  %v8784_v20 = vld [vmem:[#allocation10 + $0x440] ss:$28 sps:$4 sm:$0xff]   ;;  %v8787_v21 = vld [vmem:[#allocation10 + $0x2b4] ss:$28 sps:$4 sm:$0xff]  }
 0x585   :  { %6404 = vmatprep.subr.bf16.mxu0 %v8721_v23  ;;  %6490 = vmatprep.subr.bf16.mxu1 %v8724_v24  ;;  %v8788_v23 = vld [vmem:[#allocation10 + $0x638] ss:$28 sps:$4 sm:$0xff]   ;;  %v8785_v24 = vld [vmem:[#allocation10 + $0x2b0] ss:$28 sps:$4 sm:$0xff]  }
 0x588   :  { %6405 = vmatpush1.bf16.msra.mxu0 %v8719_v25  ;;  %6491 = vmatpush1.bf16.msra.mxu1 %v8722_v27  ;;  %v8789_v25 = vld [vmem:[#allocation10 + $0x478] ss:$28 sps:$4 sm:$0xff]   ;;  %v8792_v27 = vld [vmem:[#allocation10 + $0x2ec] ss:$28 sps:$4 sm:$0xff]  }
 0x589   :  { %6503 = vmatprep.subr.bf16.mxu0 %v8727_v28  ;;  %7596 = vmatprep.subr.bf16.mxu1 %v8728_v29  ;;  %v8793_v28 = vld [vmem:[#allocation10 + $0x670] ss:$28 sps:$4 sm:$0xff]   ;;  %v8790_v29 = vld [vmem:[#allocation10 + $0x2e8] ss:$28 sps:$4 sm:$0xff]  }
 0x58b   :  { %6407 = vmatmul.mubr.bf16.vlgmr.msra.gmra.mrb[20].mxu0 %v9392_v22  ;;  %6493 = vmatmul.mubr.bf16.vlgmr.msra.gmra.mrb[24].mxu1 %v9392_v22 }
 0x58c   :  { %6504 = vmatpush1.bf16.msra.mxu0 %v8725_v58  ;;  %6535 = vmatprep.mubr.bf16.mxu0 %v9394_v14  ;;  %v8794_v58 = vld [vmem:[#allocation10 + $0x4b0] ss:$28 sps:$4 sm:$0xff]  }
 0x58d   :  { %7597 = vmatpush3.bf16.msra.mxu1 %v8729_v10  ;;  %6621 = vmatprep.mubr.bf16.mxu1 %v9394_v14  ;;  %v8748_v14 = vld [vmem:[#allocation10 + $0x2b8] ss:$28 sps:$4 sm:$0xff]   ;;  %v8797_v10 = vld [vmem:[#allocation10 + $0x324] ss:$28 sps:$4 sm:$0xff]  }
 0x58e   :  { %6505 = vmatprep.subr.bf16.mxu0 %v8732_v32  ;;  %7598 = vmatprep.subr.bf16.mxu1 %v8733_v33  ;;  %v8798_v32 = vld [vmem:[#allocation10 + $0x6a8] ss:$28 sps:$4 sm:$0xff]   ;;  %v8795_v33 = vld [vmem:[#allocation10 + $0x320] ss:$28 sps:$4 sm:$0xff]  }
 0x590   :  { %6506 = vmatpush1.bf16.msra.mxu0 %v8730_v36  ;;  %v8799_v36 = vld [vmem:[#allocation10 + $0x4e8] ss:$28 sps:$4 sm:$0xff]  }
 0x591   :  { %7599 = vmatpush3.bf16.msra.mxu1 %v8734_v40  ;;  %6507 = vmatprep.subr.bf16.mxu0 %v8737_v42  ;;  %v8802_v40 = vld [vmem:[#allocation10 + $0x35c] ss:$28 sps:$4 sm:$0xff]  }
 0x592   :  { %7600 = vmatprep.subr.bf16.mxu1 %v8738_v43  ;;  %v8803_v42 = vld [vmem:[#allocation10 + $0x6e0] ss:$28 sps:$4 sm:$0xff]   ;;  %v8800_v43 = vld [vmem:[#allocation10 + $0x358] ss:$28 sps:$4 sm:$0xff]  }
 0x594   :  { %6508 = vmatpush1.bf16.msra.mxu0 %v8735_v31  ;;  %v8804_v31 = vld [vmem:[#allocation10 + $0x520] ss:$28 sps:$4 sm:$0xff]  }
 0x595   :  { %7601 = vmatpush3.bf16.msra.mxu1 %v8739_v44  ;;  %6509 = vmatprep.subr.bf16.mxu0 %v8742_v52  ;;  %v8807_v44 = vld [vmem:[#allocation10 + $0x394] ss:$28 sps:$4 sm:$0xff]  }
 0x596   :  { %7602 = vmatprep.subr.bf16.mxu1 %v8743_v45  ;;  %v8805_v52 = vld [vmem:[#allocation10 + $0x390] ss:$28 sps:$4 sm:$0xff]  }
 0x597   :  { %v8810_v45 = vld [vmem:[#allocation10 + $0x3cc] ss:$28 sps:$4 sm:$0xff]  }
 0x598   :  { %6510 = vmatpush1.bf16.msra.mxu0 %v8740_v46  ;;  %v8808_v46 = vld [vmem:[#allocation10 + $0x3c8] ss:$28 sps:$4 sm:$0xff]  }
 0x599   :  { %7603 = vmatpush3.bf16.msra.mxu1 %v8744_v30  ;;  %6511 = vmatprep.subr.bf16.mxu0 %v8747_v1  ;;  %v8813_v30 = vld [vmem:[#allocation10 + $0x404] ss:$28 sps:$4 sm:$0xff]  }
 0x59a   :  { %7604 = vmatprep.subr.bf16.mxu1 %v8748_v14  ;;  %v8811_v1 = vld [vmem:[#allocation10 + $0x400] ss:$28 sps:$4 sm:$0xff]  }
 0x59b   :  { %v8816_v14 = vld [vmem:[#allocation10 + $0x43c] ss:$28 sps:$4 sm:$0xff]  }
 0x59c   :  { %6512 = vmatpush1.bf16.msra.mxu0 %v8745_v48  ;;  %v8814_v48 = vld [vmem:[#allocation10 + $0x438] ss:$28 sps:$4 sm:$0xff]  }
 0x59d   :  { %7605 = vmatpush3.bf16.msra.mxu1 %v8749_v11  ;;  %6513 = vmatprep.subr.bf16.mxu0 %v8752_v51  ;;  %v8819_v11 = vld [vmem:[#allocation10 + $0x474] ss:$28 sps:$4 sm:$0xff]  }
 0x59e   :  { %7606 = vmatprep.subr.bf16.mxu1 %v8753_v54  ;;  %v8817_v51 = vld [vmem:[#allocation10 + $0x470] ss:$28 sps:$4 sm:$0xff]   ;;  %v8820_v54 = vld [vmem:[#allocation10 + $0x4a8] ss:$28 sps:$4 sm:$0xff]  }
 0x5a0   :  { %6514 = vmatpush1.bf16.msra.mxu0 %v8750_v55  ;;  %v8825_v55 = vld [vmem:[#allocation10 + $0x4e4] ss:$28 sps:$4 sm:$0xff]  }
 0x5a1   :  { %7607 = vmatpush3.bf16.msra.mxu1 %v8754_v56  ;;  %6515 = vmatprep.subr.bf16.mxu0 %v8757_v57  ;;  %v8828_v56 = vld [vmem:[#allocation10 + $0x51c] ss:$28 sps:$4 sm:$0xff]  }
 0x5a2   :  { %7608 = vmatprep.subr.bf16.mxu1 %v8758_v5  ;;  %v8826_v57 = vld [vmem:[#allocation10 + $0x518] ss:$28 sps:$4 sm:$0xff]  }
 0x5a3   :  { %v8831_v5 = vld [vmem:[#allocation10 + $0x554] ss:$28 sps:$4 sm:$0xff]  }
 0x5a4   :  { %6516 = vmatpush1.bf16.msra.mxu0 %v8755_v38  ;;  %v8829_v38 = vld [vmem:[#allocation10 + $0x550] ss:$28 sps:$4 sm:$0xff]  }
 0x5a5   :  { %7609 = vmatpush3.bf16.msra.mxu1 %v8759_v59  ;;  %6517 = vmatprep.subr.bf16.mxu0 %v8762_v60  ;;  %v8834_v59 = vld [vmem:[#allocation10 + $0x58c] ss:$28 sps:$4 sm:$0xff]  }
 0x5a6   :  { %7610 = vmatprep.subr.bf16.mxu1 %v8763_v61  ;;  %v8832_v60 = vld [vmem:[#allocation10 + $0x588] ss:$28 sps:$4 sm:$0xff]  }
 0x5a7   :  { %v8837_v61 = vld [vmem:[#allocation10 + $0x5c4] ss:$28 sps:$4 sm:$0xff]  }
 0x5a8   :  { %6518 = vmatpush1.bf16.msra.mxu0 %v8760_v62  ;;  %v8835_v62 = vld [vmem:[#allocation10 + $0x5c0] ss:$28 sps:$4 sm:$0xff]  }
 0x5a9   :  { %7611 = vmatpush3.bf16.msra.mxu1 %v8764_v63  ;;  %6519 = vmatprep.subr.bf16.mxu0 %v8767_v2  ;;  %v8840_v63 = vld [vmem:[#allocation10 + $0x5fc] ss:$28 sps:$4 sm:$0xff]  }
 0x5aa   :  { %7618 = vmatprep.subr.bf16.mxu1 %v8768_v3  ;;  %v8838_v2 = vld [vmem:[#allocation10 + $0x5f8] ss:$28 sps:$4 sm:$0xff]  }
 0x5ab   :  { %v8843_v3 = vld [vmem:[#allocation10 + $0x634] ss:$28 sps:$4 sm:$0xff]  }
 0x5ac   :  { %6622 = vmatmul.mubr.bf16.vlgmr.msra.gmra.mrb[28].mxu1 %v9390_v12  ;;  %6520 = vmatpush1.bf16.msra.mxu0 %v8765_v17  ;;  %v8841_v17 = vld [vmem:[#allocation10 + $0x630] ss:$28 sps:$4 sm:$0xff]  }
 0x5ad   :  { %7619 = vmatpush3.bf16.msra.mxu1 %v8769_v34  ;;  %6662 = vmatprep.mubr.bf16.mxu1 %v9396_v13  ;;  %v8846_v34 = vld [vmem:[#allocation10 + $0x66c] ss:$28 sps:$4 sm:$0xff]  }
 0x5ae   :  { %6521 = vmatprep.subr.bf16.mxu0 %v8772_v49  ;;  %7620 = vmatprep.subr.bf16.mxu1 %v8773_v4  ;;  %v8844_v49 = vld [vmem:[#allocation10 + $0x668] ss:$28 sps:$4 sm:$0xff]  }
 0x5af   :  { %v8849_v4 = vld [vmem:[#allocation10 + $0x6a4] ss:$28 sps:$4 sm:$0xff]  }
 0x5b0   :  { %6522 = vmatpush1.bf16.msra.mxu0 %v8770_v6  ;;  %v8847_v6 = vld [vmem:[#allocation10 + $0x6a0] ss:$28 sps:$4 sm:$0xff]  }
 0x5b1   :  { %7621 = vmatpush3.bf16.msra.mxu1 %v8774_v7  ;;  %6523 = vmatprep.subr.bf16.mxu0 %v8777_v8  ;;  %v8852_v7 = vld [vmem:[#allocation10 + $0x6dc] ss:$28 sps:$4 sm:$0xff]  }
 0x5b2   :  { %7622 = vmatprep.subr.bf16.mxu1 %v8778_v9  ;;  %v8850_v8 = vld [vmem:[#allocation10 + $0x6d8] ss:$28 sps:$4 sm:$0xff]   ;;  %v9417_v9 = vld [vmem:[%s9459_s8 + $0x14] sm:$0xff]  ;;  %s9033_s8 = smov [#allocation11]  }
 0x5b3   :  { %s6742_s20 = sshll.u32 %s9033_s8, 4  ;;  %s6743_s20 = int_to_ptr.vmem [resolvable:$true] %s6742_s20 }
 0x5b4   :  { %6524 = vmatpush1.bf16.msra.mxu0 %v8775_v15  ;;  %v5147_v15 = vrot.slane %v9417_v9, %v9263_v0  ;;  %s8991_s29 = scalar_lea.vmem %s6743_s20, 896  ;;  %p8996_p13 = scmp.lt.s32.totalorder %s6743_s20, %s6743_s20 }
 0x5b5   :  { %7623 = vmatpush3.bf16.msra.mxu1 %v8779_v47  ;;  %6525 = vmatprep.subr.bf16.mxu0 %v8782_v16  ;;  %v5155_v47 = vrot.slane %v9417_v9, %v9290_v35  ;;  %v5151_v16 = vrot.slane %v9417_v9, %v9271_v39  ;;  %p8992_p12 = scmp.ne.s32.totalorder %s6743_s20, %s8991_s29  ;;  %p8997_p0 = scmp.lt.s32.totalorder %s8991_s29, %s8991_s29 }
 0x5b6   :  { %7624 = vmatprep.subr.bf16.mxu1 %v8783_v18  ;;  %v5159_v18 = vrot.slane %v9417_v9, %v9293_v41 }
 0x5b7   :  { %p8998_p1 = por %p8997_p0, %p8996_p13 }
 0x5b8   :  { %6526 = vmatpush1.bf16.msra.mxu0 %v8780_v19 }
 0x5b9   :  { %7625 = vmatpush3.bf16.msra.mxu1 %v8784_v20  ;;  %6527 = vmatprep.subr.bf16.mxu0 %v8787_v21  ;;  %p8999_p2 = pnand %p8998_p1, %p8992_p12 }
 0x5ba   :  { %7626 = vmatprep.subr.bf16.mxu1 %v8788_v23 }
 0x5bc   :  { %6528 = vmatpush1.bf16.msra.mxu0 %v8785_v24 }
 0x5bd   :  { %7627 = vmatpush3.bf16.msra.mxu1 %v8789_v25  ;;  %6529 = vmatprep.subr.bf16.mxu0 %v8792_v27 }
 0x5be   :  { %7628 = vmatprep.subr.bf16.mxu1 %v8793_v28 }
 0x5c0   :  { %6530 = vmatpush1.bf16.msra.mxu0 %v8790_v29 }
 0x5c1   :  { %7629 = vmatpush3.bf16.msra.mxu1 %v8794_v58  ;;  %6531 = vmatprep.subr.bf16.mxu0 %v8797_v10 }
 0x5c2   :  { %7630 = vmatprep.subr.bf16.mxu1 %v8798_v32 }
 0x5c4   :  { %6532 = vmatpush1.bf16.msra.mxu0 %v8795_v33 }
 0x5c5   :  { %7631 = vmatpush3.bf16.msra.mxu1 %v8799_v36  ;;  %6533 = vmatprep.subr.bf16.mxu0 %v8802_v40 }
 0x5c6   :  { %7632 = vmatprep.subr.bf16.mxu1 %v8803_v42 }
 0x5c8   :  { %6534 = vmatpush1.bf16.msra.mxu0 %v8800_v43 }
 0x5c9   :  { %7633 = vmatpush3.bf16.msra.mxu1 %v8804_v31  ;;  %6546 = vmatprep.subr.bf16.mxu0 %v8807_v44 }
 0x5cb   :  { %6536 = vmatmul.mubr.bf16.vlgmr.msra.gmra.mrb[24].mxu0 %v9390_v12  ;;  %v8822_v12 = vld [vmem:[#allocation10 + $0x4ac] ss:$28 sps:$4 sm:$0xff]  }
 0x5cc   :  { %6663 = vmatmul.mubr.bf16.vlgmr.msra.gmra.mrb[32].mxu1 %v9392_v22  ;;  %6547 = vmatpush1.bf16.msra.mxu0 %v8805_v52 }
 0x5cd   :  { %6578 = vmatprep.mubr.bf16.mxu0 %v9396_v13  ;;  %6548 = vmatprep.subr.bf16.mxu0 %v8810_v45  ;;  %v8823_v13 = vld [vmem:[#allocation10 + $0x4e0] ss:$28 sps:$4 sm:$0xff]  }
 0x5d0   :  { %6549 = vmatpush1.bf16.msra.mxu0 %v8808_v46 }
 0x5d1   :  { %6550 = vmatprep.subr.bf16.mxu0 %v8813_v30 }
 0x5d4   :  { %6551 = vmatpush1.bf16.msra.mxu0 %v8811_v1 }
 0x5d5   :  { %6552 = vmatprep.subr.bf16.mxu0 %v8816_v14 }
 0x5d8   :  { %6553 = vmatpush1.bf16.msra.mxu0 %v8814_v48 }
 0x5d9   :  { %6554 = vmatprep.subr.bf16.mxu0 %v8819_v11 }
 0x5dc   :  { %6555 = vmatpush1.bf16.msra.mxu0 %v8817_v51 }
 0x5dd   :  { %6556 = vmatprep.subr.bf16.mxu0 %v8822_v12 }
 0x5e0   :  { %6557 = vmatpush1.bf16.msra.mxu0 %v8820_v54  ;;  %v5171_v54 = vrot.slane %v9417_v9, %v942_v26  ;;  %v5163_v26 = vrot.slane %v9417_v9, %v934_v50 }
 0x5e1   :  { %6558 = vmatprep.subr.bf16.mxu0 %v8825_v55 }
 0x5e4   :  { %6559 = vmatpush1.bf16.msra.mxu0 %v8823_v13 }
 0x5e5   :  { %6560 = vmatprep.subr.bf16.mxu0 %v8828_v56 }
 0x5e8   :  { %6561 = vmatpush1.bf16.msra.mxu0 %v8826_v57 }
 0x5e9   :  { %6562 = vmatprep.subr.bf16.mxu0 %v8831_v5 }
 0x5ec   :  { %6563 = vmatpush1.bf16.msra.mxu0 %v8829_v38 }
 0x5ed   :  { %6564 = vmatprep.subr.bf16.mxu0 %v8834_v59 }
 0x5f0   :  { %6565 = vmatpush1.bf16.msra.mxu0 %v8832_v60 }
 0x5f1   :  { %6566 = vmatprep.subr.bf16.mxu0 %v8837_v61 }
 0x5f4   :  { %6567 = vmatpush1.bf16.msra.mxu0 %v8835_v62 }
 0x5f5   :  { %6568 = vmatprep.subr.bf16.mxu0 %v8840_v63 }
 0x5f8   :  { %6569 = vmatpush1.bf16.msra.mxu0 %v8838_v2 }
 0x5f9   :  { %6570 = vmatprep.subr.bf16.mxu0 %v8843_v3 }
 0x5fc   :  { %6571 = vmatpush1.bf16.msra.mxu0 %v8841_v17 }
 0x5fd   :  { %6572 = vmatprep.subr.bf16.mxu0 %v8846_v34  ;;  %v5167_v34 = vrot.slane %v9417_v9, %v938_v53 }
 0x600   :  { %6573 = vmatpush1.bf16.msra.mxu0 %v8844_v49 }
 0x601   :  { %6574 = vmatprep.subr.bf16.mxu0 %v8849_v4 }
 0x604   :  { %6575 = vmatpush1.bf16.msra.mxu0 %v8847_v6 }
 0x605   :  { %6576 = vmatprep.subr.bf16.mxu0 %v8852_v7 }
 0x608   :  { %6577 = vmatpush1.bf16.msra.mxu0 %v8850_v8 }
 0x60b   :  { %6579 = vmatmul.mubr.bf16.vlgmr.msra.gmra.mrb[24].mxu0 %v9392_v22 }
 0x65e   :  { %v6408_v19 = vpop.f32.mrb[20].mxu0  ;;  %v6494_v20 = vpop.f32.mrb[24].mxu1 }
 0x65f   :  { %v7668_v22 = vadd.f32 %v6408_v19, %v5147_v15  ;;  %v7672_v21 = vadd.f32 %v6494_v20, %v5155_v47  ;;  %v6410_v23 = vpop.f32.mrb[21].mxu0  ;;  %v6496_v24 = vpop.f32.mrb[25].mxu1 }
 0x660   :  { %v7669_v25 = vadd.f32 %v6410_v23, %v5151_v16  ;;  %v7673_v27 = vadd.f32 %v6496_v24, %v5159_v18  ;;  %v6412_v28 = vpop.f32.mrb[22].mxu0  ;;  %v6498_v29 = vpop.f32.mrb[26].mxu1 }
 0x661   :  { %8853 = vtanh.f32 %v7668_v22  ;;  %v7670_v0 = vadd.f32 %v6412_v28, %v5147_v15  ;;  %v6414_v58 = vpop.f32.mrb[23].mxu0  ;;  %v6500_v35 = vpop.f32.mrb[27].mxu1  ;;  %v7674_v10 = vadd.f32 %v6498_v29, %v5155_v47 }
 0x662   :  { %8855 = vtanh.f32 %v7672_v21  ;;  %v7671_v39 = vadd.f32 %v6414_v58, %v5151_v16  ;;  %v7675_v41 = vadd.f32 %v6500_v35, %v5159_v18 }
 0x663   :  { %8857 = vtanh.f32 %v7669_v25 }
 0x664   :  { %8859 = vtanh.f32 %v7673_v27 }
 0x665   :  { %8861 = vtanh.f32 %v7670_v0 }
 0x666   :  { %8863 = vtanh.f32 %v7674_v10 }
 0x667   :  { %8865 = vtanh.f32 %v7671_v39 }
 0x668   :  { %8867 = vtanh.f32 %v7675_v41 }
 0x66b   :  { %v8854_v32 = vpop.eup %8853 }
 0x66c   :  { %v8856_v33 = vpop.eup %8855 }
 0x66d   :  { %v8858_v36 = vpop.eup %8857 }
 0x66e   :  { %v8860_v40 = vpop.eup %8859  ;;  %v7588_v42 = vpack.c.bf16 %v8858_v36, %v8854_v32 }
 0x66f   :  { %v8862_v43 = vpop.eup %8861  ;;  %v7589_v31 = vpack.c.bf16 %v8860_v40, %v8856_v33 }
 0x670   :  { %v8864_v44 = vpop.eup %8863  ;;  %6729 = vst [vmem:[#allocation11] sm:$0xff] %v7588_v42 }
 0x671   :  { %v8866_v52 = vpop.eup %8865  ;;  %6730 = vst [vmem:[#allocation11 + $0x8] sm:$0xff] %v7589_v31 }
 0x672   :  { %v8868_v45 = vpop.eup %8867  ;;  %v7592_v46 = vpack.c.bf16 %v8866_v52, %v8862_v43 }
 0x673   :  { %v7593_v30 = vpack.c.bf16 %v8868_v45, %v8864_v44 }
 0x674   :  { %6733 = vst [vmem:[#allocation11 + $0x1c] sm:$0xff] %v7592_v46 }
 0x675   :  { %6734 = vst [vmem:[#allocation11 + $0x24] sm:$0xff] %v7593_v30 }
 0x67f   :  { %v7612_v1 = vpop.f32.mrb[28].mxu1 }
 0x680   :  { %v7613_v14 = vpop.f32.mrb[29].mxu1 }
 0x681   :  { %v7614_v48 = vadd.f32 %v7613_v14, %v7612_v1  ;;  %v7615_v11 = vpop.f32.mrb[30].mxu1 }
 0x682   :  { %v7616_v51 = vpop.f32.mrb[31].mxu1 }
 0x683   :  { %v7617_v12 = vadd.f32 %v7616_v51, %v7615_v11  ;;  %v6624_v56 = vadd.f32 %v7614_v48, %v5171_v54 }
 0x685   :  { %v6627_v59 = vadd.f32 %v7617_v12, %v5171_v54 }
 0x69f   :  { %v7634_v55 = vpop.f32.mrb[32].mxu1 }
 0x6a0   :  { %v7635_v13 = vpop.f32.mrb[33].mxu1 }
 0x6a1   :  { %v7636_v57 = vadd.f32 %v7635_v13, %v7634_v55  ;;  %v7637_v5 = vpop.f32.mrb[34].mxu1 }
 0x6a2   :  { %v7638_v38 = vpop.f32.mrb[35].mxu1 }
 0x6a3   :  { %v6665_v60 = vadd.f32 %v7636_v57, %v6624_v56  ;;  %v7639_v61 = vadd.f32 %v7638_v38, %v7637_v5 }
 0x6a5   :  { %8869 = vtanh.f32 %v6665_v60  ;;  %v6668_v62 = vadd.f32 %v7639_v61, %v6627_v59 }
 0x6a7   :  { %8871 = vtanh.f32 %v6668_v62 }
 0x6af   :  { %v8870_v63 = vpop.eup %8869 }
 0x6b0   :  { %v7591_v2 = vpack.c.bf16 %v8870_v63, %v8870_v63 }
 0x6b1   :  { %v8872_v3 = vpop.eup %8871 }
 0x6b2   :  { %6732 = vst [vmem:[#allocation11 + $0x18] sm:$0xf] %v7591_v2  ;;  %v7595_v17 = vpack.c.bf16 %v8872_v3, %v8872_v3 }
 0x6b4   :  { %6736 = vst [vmem:[#allocation11 + $0x34] sm:$0xf] %v7595_v17 }
 0x6de   :  { %v6580_v49 = vpop.f32.mrb[24].mxu0 }
 0x6df   :  { %v7676_v4 = vadd.f32 %v6580_v49, %v5163_v26  ;;  %v6582_v6 = vpop.f32.mrb[25].mxu0 }
 0x6e0   :  { %v7677_v7 = vadd.f32 %v6582_v6, %v5167_v34  ;;  %v6584_v8 = vpop.f32.mrb[26].mxu0 }
 0x6e1   :  { %8873 = vtanh.f32 %v7676_v4  ;;  %v7678_v15 = vadd.f32 %v6584_v8, %v5163_v26  ;;  %v6586_v47 = vpop.f32.mrb[27].mxu0 }
 0x6e2   :  { %8875 = vtanh.f32 %v7677_v7  ;;  %v7679_v16 = vadd.f32 %v6586_v47, %v5167_v34 }
 0x6e3   :  { %8877 = vtanh.f32 %v7678_v15 }
 0x6e4   :  { %8879 = vtanh.f32 %v7679_v16 }
 0x6eb   :  { %v8874_v18 = vpop.eup %8873 }
 0x6ec   :  { %v8876_v19 = vpop.eup %8875 }
 0x6ed   :  { %v8878_v50 = vpop.eup %8877  ;;  %v7590_v37 = vpack.c.bf16 %v8876_v19, %v8874_v18 }
 0x6ee   :  { %v8880_v20 = vpop.eup %8879 }
 0x6ef   :  { %6731 = vst [vmem:[#allocation11 + $0x10] sm:$0xff] %v7590_v37  ;;  %v7594_v53 = vpack.c.bf16 %v8880_v20, %v8878_v50 }
 0x6f1   :  { %6735 = vst [vmem:[#allocation11 + $0x2c] sm:$0xff] %v7594_v53 }
 0x6f2   :  { %9002 = shalt.err (!%p8999_p2)
}
 0x6f3   :  { %s9003_s13 = scalar_lea.hbm %s9460_s9, 896 }
 0x6f4   :  { %p9004_p3 = scmp.ne.s32.totalorder %s9460_s9, %s9003_s13  ;;  %p9007_p4 = scmp.lt.u32.totalorder %s9003_s13, %s9460_s9 }
 0x6f6   :  { %p9009_p5 = pnand %p9007_p4, %p9004_p3 }
 0x6f8   :  { %9012 = shalt.err (!%p9009_p5)
}
 0x6f9   :  { %6748 = dma.vmem_to_hbm [thread:$0]  %s6743_s20, 896, %s9460_s9, [#allocation4], %s9030_s5, %s9030_s5, %s9031_s19  }
 0x6fa   :  { %9019 = dma.done.wait [#allocation4], 896  }
 0x6fb   :  { %9020 = vsyncadd [#allocation4], 4294966400 }
 0x6fc   :  { %6752 = vsyncpa [#allocation3], 1 }
 0x6fd   :  { %6753 = vsyncpa [#allocation6], 1 }
 0x6fe   :  { %6754 = vsyncpa [#allocation9], 1 }
 0x6ff   :  { %6755 = vsyncpa [#allocation4], 1 }

</bundles_post_ra>
